<compile_context>
chip_gen: v6e
topology: v6e:2x2x1
jax: 0.10.0
libtpu: 0.0.40
codegen_flags: <defaults>
</compile_context>

<pallas_src>
import functools

import jax
import jax.numpy as jnp
from jax.experimental import pallas as pl
from jax.experimental.pallas import tpu as pltpu


# ----------------------------------------------------------------------------
# Helpers
# ----------------------------------------------------------------------------
def _round_up(x, m):
    return ((x + m - 1) // m) * m


def _cp(n_grid_dims):
    return pltpu.CompilerParams(
        dimension_semantics=("parallel",) * n_grid_dims,
        vmem_limit_bytes=32 * 1024 * 1024,
    )


# ----------------------------------------------------------------------------
# Pallas kernels
# ----------------------------------------------------------------------------
def _conv3x3_bnrelu_kernel(x_ref, w_ref, scale_ref, shift_ref, o_ref, *, H, W):
    # x_ref:  (1, H*W + 2*(W+1), Cin) bf16 -- spatially flattened image with zero
    #          halo rows, so every 3x3 tap is a static row-shifted slice.
    # w_ref:  (9, Cin, Cout) bf16 ; scale/shift: (1, Cin) f32 ; o_ref: (1, H*W, Cout) bf16
    M = H * W
    pad = W + 1
    Cout = o_ref.shape[-1]

    # Fused BN + ReLU prologue (f32 math), then re-zero the halo rows so the
    # result matches conv(zero_pad(bn_relu(x))).
    x = x_ref[0].astype(jnp.float32)
    act = jnp.maximum(x * scale_ref[0] + shift_ref[0], 0.0)
    rows = jax.lax.broadcasted_iota(jnp.int32, (M + 2 * pad, 1), 0)
    act = jnp.where((rows >= pad) & (rows < pad + M), act, 0.0)

    # per-output-pixel column index, used to mask left/right wrap-around
    wcol = jax.lax.broadcasted_iota(jnp.int32, (M, 1), 0) % W

    acc = jnp.zeros((M, Cout), jnp.float32)
    for di in range(3):
        for dj in range(3):
            off = pad + (di - 1) * W + (dj - 1)
            patch = act[off:off + M, :]
            if dj == 0:
                patch = jnp.where(wcol >= 1, patch, 0.0)
            elif dj == 2:
                patch = jnp.where(wcol <= W - 2, patch, 0.0)
            acc = acc + jnp.dot(patch.astype(jnp.bfloat16), w_ref[di * 3 + dj],
                                preferred_element_type=jnp.float32)
    o_ref[0] = acc.astype(o_ref.dtype)


def _matmul_bnrelu_kernel(a_ref, w_ref, scale_ref, shift_ref, o_ref):
    # out = relu(a * scale + shift) @ w       (bf16 MXU, f32 accumulation)
    a = jnp.maximum(a_ref[...].astype(jnp.float32) * scale_ref[...] + shift_ref[...], 0.0)
    o_ref[...] = jnp.dot(a.astype(jnp.bfloat16), w_ref[...],
                         preferred_element_type=jnp.float32).astype(o_ref.dtype)


def _linear_bnrelu_bias_kernel(a_ref, w_ref, b_ref, scale_ref, shift_ref, o_ref):
    # out = relu(a * scale + shift) @ w + b   (bf16 MXU, f32 accumulation, f32 out)
    a = jnp.maximum(a_ref[...].astype(jnp.float32) * scale_ref[...] + shift_ref[...], 0.0)
    o_ref[...] = (jnp.dot(a.astype(jnp.bfloat16), w_ref[...],
                          preferred_element_type=jnp.float32) + b_ref[...])


# ----------------------------------------------------------------------------
# Layer wrappers
# ----------------------------------------------------------------------------
def conv3x3_bn_relu(x, w, scale=None, shift=None):
    """Fused conv3x3 'same' over bn_relu(x).  x: [N,H,W,Cin] -> [N,H,W,Cout] (bf16)."""
    N, H, W, Cin = x.shape
    Cout = w.shape[-1]
    if scale is None:  # conv0: no preceding BN -> identity prologue
        scale = jnp.ones((Cin,), jnp.float32)
        shift = jnp.zeros((Cin,), jnp.float32)
    pad = W + 1
    M = H * W

    xf = x.reshape(N, M, Cin).astype(jnp.bfloat16)
    w9 = w.reshape(9, Cin, Cout)
    Cp = max(Cin, 8)  # pad tiny channel counts (conv0 Cin=1) for friendlier layouts
    if Cp != Cin:
        xf = jnp.pad(xf, ((0, 0), (0, 0), (0, Cp - Cin)))
        w9 = jnp.pad(w9, ((0, 0), (0, Cp - Cin), (0, 0)))
        scale = jnp.pad(scale, (0, Cp - Cin), constant_values=1.0)
        shift = jnp.pad(shift, (0, Cp - Cin))
    xp = jnp.pad(xf, ((0, 0), (pad, pad), (0, 0)))  # zero halo rows

    kernel = functools.partial(_conv3x3_bnrelu_kernel, H=H, W=W)
    out = pl.pallas_call(
        kernel,
        out_shape=jax.ShapeDtypeStruct((N, M, Cout), jnp.bfloat16),
        grid=(N,),
        in_specs=[
            pl.BlockSpec((1, M + 2 * pad, Cp), lambda n: (n, 0, 0)),
            pl.BlockSpec((9, Cp, Cout), lambda n: (0, 0, 0)),
            pl.BlockSpec((1, Cp), lambda n: (0, 0)),
            pl.BlockSpec((1, Cp), lambda n: (0, 0)),
        ],
        out_specs=pl.BlockSpec((1, M, Cout), lambda n: (n, 0, 0)),
        compiler_params=_cp(1),
    )(xp, w9.astype(jnp.bfloat16),
      scale.reshape(1, Cp).astype(jnp.float32),
      shift.reshape(1, Cp).astype(jnp.float32))
    return out.reshape(N, H, W, Cout)


def matmul_bn_relu(a, w, scale, shift, out_dtype=jnp.bfloat16):
    """out = relu(a * scale + shift) @ w, row-tiled (rows padded, tile capped at 512)."""
    M, K = a.shape
    N = w.shape[-1]
    tm = min(512, _round_up(M, 8))
    Mp = _round_up(M, tm)
    a_p = a.astype(jnp.bfloat16)
    if Mp != M:
        a_p = jnp.pad(a_p, ((0, Mp - M), (0, 0)))
    out = pl.pallas_call(
        _matmul_bnrelu_kernel,
        out_shape=jax.ShapeDtypeStruct((Mp, N), out_dtype),
        grid=(Mp // tm,),
        in_specs=[
            pl.BlockSpec((tm, K), lambda i: (i, 0)),
            pl.BlockSpec((K, N), lambda i: (0, 0)),
            pl.BlockSpec((1, K), lambda i: (0, 0)),
            pl.BlockSpec((1, K), lambda i: (0, 0)),
        ],
        out_specs=pl.BlockSpec((tm, N), lambda i: (i, 0)),
        compiler_params=_cp(1),
    )(a_p, w.astype(jnp.bfloat16),
      scale.reshape(1, K).astype(jnp.float32),
      shift.reshape(1, K).astype(jnp.float32))
    return out[:M] if Mp != M else out


def linear_bn_relu_bias(feats, w, b, scale, shift):
    """Final BatchNormReLU + OutputLayer gather result -> Linear, lane-padded to 128."""
    M, K = feats.shape
    N = w.shape[-1]
    Np = _round_up(N, 128)
    tm = min(512, _round_up(M, 8))
    Mp = _round_up(M, tm)
    a_p = feats.astype(jnp.bfloat16)
    if Mp != M:
        a_p = jnp.pad(a_p, ((0, Mp - M), (0, 0)))
    w_p = jnp.pad(w, ((0, 0), (0, Np - N))).astype(jnp.bfloat16)
    b_p = jnp.pad(b, (0, Np - N)).reshape(1, Np).astype(jnp.float32)
    out = pl.pallas_call(
        _linear_bnrelu_bias_kernel,
        out_shape=jax.ShapeDtypeStruct((Mp, Np), jnp.float32),
        grid=(Mp // tm,),
        in_specs=[
            pl.BlockSpec((tm, K), lambda i: (i, 0)),
            pl.BlockSpec((K, Np), lambda i: (0, 0)),
            pl.BlockSpec((1, Np), lambda i: (0, 0)),
            pl.BlockSpec((1, K), lambda i: (0, 0)),
            pl.BlockSpec((1, K), lambda i: (0, 0)),
        ],
        out_specs=pl.BlockSpec((tm, Np), lambda i: (i, 0)),
        compiler_params=_cp(1),
    )(a_p, w_p, b_p,
      scale.reshape(1, K).astype(jnp.float32),
      shift.reshape(1, K).astype(jnp.float32))
    return out[:M, :N]


def down_conv2x2_bn_relu(x, w, bn):
    # scn.Convolution(dim, cin, cout, 2, 2, bias=False) over bn_relu(x)
    N, H, W, Cin = x.shape
    Cout = w.shape[-1]
    Ho, Wo = H // 2, W // 2
    col = (x.astype(jnp.bfloat16)
           .reshape(N, Ho, 2, Wo, 2, Cin)
           .transpose(0, 1, 3, 2, 4, 5)
           .reshape(N * Ho * Wo, 4 * Cin))
    out = matmul_bn_relu(col, w.reshape(4 * Cin, Cout),
                         jnp.tile(bn["scale"], 4), jnp.tile(bn["shift"], 4))
    return out.reshape(N, Ho, Wo, Cout)


def deconv2x2_bn_relu(x, w, bn):
    # scn.Deconvolution(dim, cin, cout, 2, 2, bias=False) over bn_relu(x)
    N, H, W, Cin = x.shape
    Cout = w.shape[-1]
    w2 = w.transpose(2, 0, 1, 3).reshape(Cin, 4 * Cout)
    out = matmul_bn_relu(x.reshape(N * H * W, Cin), w2, bn["scale"], bn["shift"])
    out = out.reshape(N, H, W, 2, 2, Cout).transpose(0, 1, 3, 2, 4, 5)
    return out.reshape(N, 2 * H, 2 * W, Cout)


# ----------------------------------------------------------------------------
# Parameter init (deterministic, shapes per UResNet.__init__)
# ----------------------------------------------------------------------------
def init_bn(key, c):
    k1, k2 = jax.random.split(key)
    gamma = 1.0 + 0.1 * jax.random.normal(k1, (c,), jnp.float32)
    beta = 0.1 * jax.random.normal(k2, (c,), jnp.float32)
    eps = 1e-4  # scn BatchNorm default
    # eval-style BN with running_mean=0, running_var=1
    scale = gamma / jnp.sqrt(1.0 + eps)
    shift = beta
    return {"scale": scale, "shift": shift}


def init_conv(key, kh, kw, cin, cout):
    std = (2.0 / (kh * kw * cin)) ** 0.5
    return std * jax.random.normal(key, (kh, kw, cin, cout), jnp.float32)


def init_unet(key, planes, reps):
    keys = iter(jax.random.split(key, 16))
    p0 = planes[0]
    params = {"pre": []}
    a = p0
    for _ in range(reps):
        params["pre"].append(
            {"bn": init_bn(next(keys), a), "conv": init_conv(next(keys), 3, 3, a, p0)}
        )
        a = p0
    if len(planes) > 1:
        p1 = planes[1]
        params["down_bn"] = init_bn(next(keys), p0)
        params["down_conv"] = init_conv(next(keys), 2, 2, p0, p1)
        params["inner"] = init_unet(next(keys), planes[1:], reps)
        params["up_bn"] = init_bn(next(keys), p1)
        params["up_conv"] = init_conv(next(keys), 2, 2, p1, p0)
        params["post"] = []
        for r in range(reps):
            a = 2 * p0 if r == 0 else p0
            params["post"].append(
                {"bn": init_bn(next(keys), a), "conv": init_conv(next(keys), 3, 3, a, p0)}
            )
    return params


def init_uresnet(key, m, num_strides, num_classes, n_input_features=1, reps=2):
    k0, k1, k2, k3, k4 = jax.random.split(key, 5)
    planes = [i * m for i in range(1, num_strides + 1)]
    return {
        "conv0": init_conv(k0, 3, 3, n_input_features, m),
        "unet": init_unet(k1, planes, reps),
        "final_bn": init_bn(k2, m),
        "linear_w": (1.0 / m**0.5) * jax.random.normal(k3, (m, num_classes), jnp.float32),
        "linear_b": (1.0 / m**0.5) * jax.random.normal(k4, (num_classes,), jnp.float32),
    }


# ----------------------------------------------------------------------------
# Forward pass
# ----------------------------------------------------------------------------
def unet_forward(params, x):
    for blk in params["pre"]:
        x = conv3x3_bn_relu(x, blk["conv"], blk["bn"]["scale"], blk["bn"]["shift"])
    if "inner" in params:
        y = down_conv2x2_bn_relu(x, params["down_conv"], params["down_bn"])
        y = unet_forward(params["inner"], y)
        y = deconv2x2_bn_relu(y, params["up_conv"], params["up_bn"])
        x = jnp.concatenate([x, y], axis=-1)  # scn.JoinTable
        for blk in params["post"]:
            x = conv3x3_bn_relu(x, blk["conv"], blk["bn"]["scale"], blk["bn"]["shift"])
    return x


def uresnet_forward(params, coords, features, spatial_size, batch_size):
    # coords: [P, 3] int32 = (row, col, batch_idx); features: [P, n_input_features]
    cin = features.shape[1]
    # InputLayer(mode=3): scatter-add duplicates onto the dense grid
    dense = jnp.zeros((batch_size, spatial_size, spatial_size, cin), jnp.float32)
    b, r, c = coords[:, 2], coords[:, 0], coords[:, 1]
    dense = dense.at[b, r, c].add(features.astype(jnp.float32))
    dense = dense.astype(jnp.bfloat16)

    h = conv3x3_bn_relu(dense, params["conv0"])       # SubmanifoldConvolution(1 -> m)
    h = unet_forward(params["unet"], h)               # scn.UNet
    feats = h[b, r, c]                                # OutputLayer gather (pre final BN)
    # BatchNormReLU(m) is fused as the prologue of the Linear (gather commutes with it)
    logits = linear_bn_relu_bias(feats, params["linear_w"], params["linear_b"],
                                 params["final_bn"]["scale"], params["final_bn"]["shift"])
    return logits                                     # [P, num_classes] f32


# ----------------------------------------------------------------------------
if __name__ == "__main__":
    # Module config: is_3d=False (2D), num_strides=3, base_num_outputs=16,
    # num_classes=3, spatialSize=16 (small for the demo)
    B = 2
    S = 16
    m = 16
    num_strides = 3
    num_classes = 3

    params = init_uresnet(jax.random.PRNGKey(42), m, num_strides, num_classes)

    key = jax.random.PRNGKey(0)
    kr, kc, kf = jax.random.split(key, 3)
    n_points = 64
    rows = jax.random.randint(kr, (n_points,), 0, S)
    cols = jax.random.randint(kc, (n_points,), 0, S)
    batch_idx = jnp.arange(n_points) % B
    coords = jnp.stack([rows, cols, batch_idx], axis=1).astype(jnp.int32)
    features = jax.random.normal(kf, (n_points, 1), jnp.float32)

    out = uresnet_forward(params, coords, features, S, B)
    out = jax.block_until_ready(out)
    assert out.shape == (n_points, num_classes), out.shape
    assert jnp.all(jnp.isfinite(out))
    print("KERNEL_OK")
</pallas_src>

<mosaic_0001>
module attributes {stable_mosaic.version = 11 : i64} {
  func.func @_conv3x3_bnrelu_kernel(%arg0: i32, %arg1: memref<1x290x8xbf16, #tpu.memory_space<vmem>>, %arg2: memref<9x8x16xbf16, #tpu.memory_space<vmem>>, %arg3: memref<1x8xf32, #tpu.memory_space<vmem>>, %arg4: memref<1x8xf32, #tpu.memory_space<vmem>>, %arg5: memref<1x256x16xbf16, #tpu.memory_space<vmem>>) attributes {dimension_semantics = [#tpu.dimension_semantics<parallel>], iteration_bounds = array<i64: 2>, scalar_prefetch = 0 : i64, scratch_operands = 0 : i64, tpu.core_type = #tpu.core_type<tc>, window_params = [{transform_indices = @transform_0, window_bounds = array<i64: 1, 290, 8>}, {pipeline_mode = #tpu.pipeline_mode<synchronous>, transform_indices = @transform_1, window_bounds = array<i64: 9, 8, 16>}, {pipeline_mode = #tpu.pipeline_mode<synchronous>, transform_indices = @transform_2, window_bounds = array<i64: 1, 8>}, {pipeline_mode = #tpu.pipeline_mode<synchronous>, transform_indices = @transform_3, window_bounds = array<i64: 1, 8>}, {transform_indices = @transform_4, window_bounds = array<i64: 1, 256, 16>}]} {
    %c0 = arith.constant 0 : index
    %c0_0 = arith.constant 0 : index
    %c0_1 = arith.constant 0 : index
    %0 = vector.load %arg1[%c0, %c0_0, %c0_1] : memref<1x290x8xbf16, #tpu.memory_space<vmem>>, vector<1x290x8xbf16>
    %1 = vector.shape_cast %0 : vector<1x290x8xbf16> to vector<290x8xbf16>
    %2 = arith.extf %1 : vector<290x8xbf16> to vector<290x8xf32>
    %c0_2 = arith.constant 0 : index
    %c0_3 = arith.constant 0 : index
    %3 = vector.load %arg3[%c0_2, %c0_3] : memref<1x8xf32, #tpu.memory_space<vmem>>, vector<1x8xf32>
    %4 = vector.shape_cast %3 : vector<1x8xf32> to vector<8xf32>
    %5 = vector.shape_cast %4 : vector<8xf32> to vector<1x8xf32>
    %6 = vector.broadcast %5 : vector<1x8xf32> to vector<290x8xf32>
    %7 = arith.mulf %2, %6 : vector<290x8xf32>
    %c0_4 = arith.constant 0 : index
    %c0_5 = arith.constant 0 : index
    %8 = vector.load %arg4[%c0_4, %c0_5] : memref<1x8xf32, #tpu.memory_space<vmem>>, vector<1x8xf32>
    %9 = vector.shape_cast %8 : vector<1x8xf32> to vector<8xf32>
    %10 = vector.shape_cast %9 : vector<8xf32> to vector<1x8xf32>
    %11 = vector.broadcast %10 : vector<1x8xf32> to vector<290x8xf32>
    %12 = arith.addf %7, %11 : vector<290x8xf32>
    %cst = arith.constant 0.000000e+00 : f32
    %13 = vector.broadcast %cst : f32 to vector<290x8xf32>
    %14 = arith.maximumf %12, %13 : vector<290x8xf32>
    %15 = tpu.iota {dimensions = array<i32: 0>} : vector<290x1xi32>
    %c17_i32 = arith.constant 17 : i32
    %16 = vector.broadcast %c17_i32 : i32 to vector<290x1xi32>
    %17 = arith.cmpi sge, %15, %16 : vector<290x1xi32>
    %c273_i32 = arith.constant 273 : i32
    %18 = vector.broadcast %c273_i32 : i32 to vector<290x1xi32>
    %19 = arith.cmpi slt, %15, %18 : vector<290x1xi32>
    %20 = arith.andi %17, %19 : vector<290x1xi1>
    %cst_6 = arith.constant 0.000000e+00 : f32
    %21 = vector.shape_cast %20 : vector<290x1xi1> to vector<290x1xi1>
    %22 = vector.broadcast %21 : vector<290x1xi1> to vector<290x8xi1>
    %23 = vector.broadcast %cst_6 : f32 to vector<290x8xf32>
    %24 = arith.select %22, %14, %23 : vector<290x8xi1>, vector<290x8xf32>
    %25 = tpu.iota {dimensions = array<i32: 0>} : vector<256x1xi32>
    %c16_i32 = arith.constant 16 : i32
    %c0_i32 = arith.constant 0 : i32
    %26 = arith.cmpi eq, %c16_i32, %c0_i32 : i32
    %c1_i32 = arith.constant 1 : i32
    %27 = arith.select %26, %c1_i32, %c16_i32 : i32
    %28 = vector.broadcast %27 : i32 to vector<256x1xi32>
    %29 = arith.remsi %25, %28 : vector<256x1xi32>
    %c0_i32_7 = arith.constant 0 : i32
    %30 = vector.broadcast %c0_i32_7 : i32 to vector<256x1xi32>
    %31 = arith.cmpi ne, %29, %30 : vector<256x1xi32>
    %c0_i32_8 = arith.constant 0 : i32
    %32 = vector.broadcast %c0_i32_8 : i32 to vector<256x1xi32>
    %33 = arith.cmpi slt, %29, %32 : vector<256x1xi32>
    %c0_i32_9 = arith.constant 0 : i32
    %34 = arith.cmpi slt, %27, %c0_i32_9 : i32
    %35 = vector.broadcast %34 : i1 to vector<256x1xi1>
    %36 = vector.broadcast %35 : vector<256x1xi1> to vector<256x1xi1>
    %37 = arith.xori %33, %36 : vector<256x1xi1>
    %38 = arith.andi %37, %31 : vector<256x1xi1>
    %39 = vector.broadcast %27 : i32 to vector<256x1xi32>
    %40 = arith.addi %29, %39 : vector<256x1xi32>
    %41 = arith.select %38, %40, %29 : vector<256x1xi1>, vector<256x1xi32>
    %cst_10 = arith.constant 0.000000e+00 : f32
    %42 = vector.broadcast %cst_10 : f32 to vector<256x16xf32>
    %43 = vector.extract_strided_slice %24 {offsets = [0, 0], sizes = [256, 8], strides = [1, 1]} : vector<290x8xf32> to vector<256x8xf32>
    %c1_i32_11 = arith.constant 1 : i32
    %44 = vector.broadcast %c1_i32_11 : i32 to vector<256x1xi32>
    %45 = arith.cmpi sge, %41, %44 : vector<256x1xi32>
    %cst_12 = arith.constant 0.000000e+00 : f32
    %46 = vector.shape_cast %45 : vector<256x1xi1> to vector<256x1xi1>
    %47 = vector.broadcast %46 : vector<256x1xi1> to vector<256x8xi1>
    %48 = vector.broadcast %cst_12 : f32 to vector<256x8xf32>
    %49 = arith.select %47, %43, %48 : vector<256x8xi1>, vector<256x8xf32>
    %50 = arith.truncf %49 : vector<256x8xf32> to vector<256x8xbf16>
    %c0_13 = arith.constant 0 : index
    %c0_14 = arith.constant 0 : index
    %c0_15 = arith.constant 0 : index
    %51 = vector.load %arg2[%c0_13, %c0_14, %c0_15] : memref<9x8x16xbf16, #tpu.memory_space<vmem>>, vector<1x8x16xbf16>
    %52 = vector.shape_cast %51 : vector<1x8x16xbf16> to vector<8x16xbf16>
    %cst_16 = arith.constant dense<0.000000e+00> : vector<256x16xf32>
    %53 = tpu.matmul %50, %52, %cst_16 {dimension_numbers = #tpu.dot_dimension_numbers<[1], [0], [0], [1], [0, 0, 1, 1], [], []>} : vector<256x8xbf16>, vector<8x16xbf16>, vector<256x16xf32> -> vector<256x16xf32>
    %54 = arith.addf %42, %53 : vector<256x16xf32>
    %55 = vector.extract_strided_slice %24 {offsets = [1, 0], sizes = [256, 8], strides = [1, 1]} : vector<290x8xf32> to vector<256x8xf32>
    %56 = arith.truncf %55 : vector<256x8xf32> to vector<256x8xbf16>
    %c1 = arith.constant 1 : index
    %c0_17 = arith.constant 0 : index
    %c0_18 = arith.constant 0 : index
    %57 = vector.load %arg2[%c1, %c0_17, %c0_18] : memref<9x8x16xbf16, #tpu.memory_space<vmem>>, vector<1x8x16xbf16>
    %58 = vector.shape_cast %57 : vector<1x8x16xbf16> to vector<8x16xbf16>
    %cst_19 = arith.constant dense<0.000000e+00> : vector<256x16xf32>
    %59 = tpu.matmul %56, %58, %cst_19 {dimension_numbers = #tpu.dot_dimension_numbers<[1], [0], [0], [1], [0, 0, 1, 1], [], []>} : vector<256x8xbf16>, vector<8x16xbf16>, vector<256x16xf32> -> vector<256x16xf32>
    %60 = arith.addf %54, %59 : vector<256x16xf32>
    %61 = vector.extract_strided_slice %24 {offsets = [2, 0], sizes = [256, 8], strides = [1, 1]} : vector<290x8xf32> to vector<256x8xf32>
    %c14_i32 = arith.constant 14 : i32
    %62 = vector.broadcast %c14_i32 : i32 to vector<256x1xi32>
    %63 = arith.cmpi sle, %41, %62 : vector<256x1xi32>
    %cst_20 = arith.constant 0.000000e+00 : f32
    %64 = vector.shape_cast %63 : vector<256x1xi1> to vector<256x1xi1>
    %65 = vector.broadcast %64 : vector<256x1xi1> to vector<256x8xi1>
    %66 = vector.broadcast %cst_20 : f32 to vector<256x8xf32>
    %67 = arith.select %65, %61, %66 : vector<256x8xi1>, vector<256x8xf32>
    %68 = arith.truncf %67 : vector<256x8xf32> to vector<256x8xbf16>
    %c2 = arith.constant 2 : index
    %c0_21 = arith.constant 0 : index
    %c0_22 = arith.constant 0 : index
    %69 = vector.load %arg2[%c2, %c0_21, %c0_22] : memref<9x8x16xbf16, #tpu.memory_space<vmem>>, vector<1x8x16xbf16>
    %70 = vector.shape_cast %69 : vector<1x8x16xbf16> to vector<8x16xbf16>
    %cst_23 = arith.constant dense<0.000000e+00> : vector<256x16xf32>
    %71 = tpu.matmul %68, %70, %cst_23 {dimension_numbers = #tpu.dot_dimension_numbers<[1], [0], [0], [1], [0, 0, 1, 1], [], []>} : vector<256x8xbf16>, vector<8x16xbf16>, vector<256x16xf32> -> vector<256x16xf32>
    %72 = arith.addf %60, %71 : vector<256x16xf32>
    %73 = vector.extract_strided_slice %24 {offsets = [16, 0], sizes = [256, 8], strides = [1, 1]} : vector<290x8xf32> to vector<256x8xf32>
    %c1_i32_24 = arith.constant 1 : i32
    %74 = vector.broadcast %c1_i32_24 : i32 to vector<256x1xi32>
    %75 = arith.cmpi sge, %41, %74 : vector<256x1xi32>
    %cst_25 = arith.constant 0.000000e+00 : f32
    %76 = vector.shape_cast %75 : vector<256x1xi1> to vector<256x1xi1>
    %77 = vector.broadcast %76 : vector<256x1xi1> to vector<256x8xi1>
    %78 = vector.broadcast %cst_25 : f32 to vector<256x8xf32>
    %79 = arith.select %77, %73, %78 : vector<256x8xi1>, vector<256x8xf32>
    %80 = arith.truncf %79 : vector<256x8xf32> to vector<256x8xbf16>
    %c3 = arith.constant 3 : index
    %c0_26 = arith.constant 0 : index
    %c0_27 = arith.constant 0 : index
    %81 = vector.load %arg2[%c3, %c0_26, %c0_27] : memref<9x8x16xbf16, #tpu.memory_space<vmem>>, vector<1x8x16xbf16>
    %82 = vector.shape_cast %81 : vector<1x8x16xbf16> to vector<8x16xbf16>
    %cst_28 = arith.constant dense<0.000000e+00> : vector<256x16xf32>
    %83 = tpu.matmul %80, %82, %cst_28 {dimension_numbers = #tpu.dot_dimension_numbers<[1], [0], [0], [1], [0, 0, 1, 1], [], []>} : vector<256x8xbf16>, vector<8x16xbf16>, vector<256x16xf32> -> vector<256x16xf32>
    %84 = arith.addf %72, %83 : vector<256x16xf32>
    %85 = vector.extract_strided_slice %24 {offsets = [17, 0], sizes = [256, 8], strides = [1, 1]} : vector<290x8xf32> to vector<256x8xf32>
    %86 = arith.truncf %85 : vector<256x8xf32> to vector<256x8xbf16>
    %c4 = arith.constant 4 : index
    %c0_29 = arith.constant 0 : index
    %c0_30 = arith.constant 0 : index
    %87 = vector.load %arg2[%c4, %c0_29, %c0_30] : memref<9x8x16xbf16, #tpu.memory_space<vmem>>, vector<1x8x16xbf16>
    %88 = vector.shape_cast %87 : vector<1x8x16xbf16> to vector<8x16xbf16>
    %cst_31 = arith.constant dense<0.000000e+00> : vector<256x16xf32>
    %89 = tpu.matmul %86, %88, %cst_31 {dimension_numbers = #tpu.dot_dimension_numbers<[1], [0], [0], [1], [0, 0, 1, 1], [], []>} : vector<256x8xbf16>, vector<8x16xbf16>, vector<256x16xf32> -> vector<256x16xf32>
    %90 = arith.addf %84, %89 : vector<256x16xf32>
    %91 = vector.extract_strided_slice %24 {offsets = [18, 0], sizes = [256, 8], strides = [1, 1]} : vector<290x8xf32> to vector<256x8xf32>
    %c14_i32_32 = arith.constant 14 : i32
    %92 = vector.broadcast %c14_i32_32 : i32 to vector<256x1xi32>
    %93 = arith.cmpi sle, %41, %92 : vector<256x1xi32>
    %cst_33 = arith.constant 0.000000e+00 : f32
    %94 = vector.shape_cast %93 : vector<256x1xi1> to vector<256x1xi1>
    %95 = vector.broadcast %94 : vector<256x1xi1> to vector<256x8xi1>
    %96 = vector.broadcast %cst_33 : f32 to vector<256x8xf32>
    %97 = arith.select %95, %91, %96 : vector<256x8xi1>, vector<256x8xf32>
    %98 = arith.truncf %97 : vector<256x8xf32> to vector<256x8xbf16>
    %c5 = arith.constant 5 : index
    %c0_34 = arith.constant 0 : index
    %c0_35 = arith.constant 0 : index
    %99 = vector.load %arg2[%c5, %c0_34, %c0_35] : memref<9x8x16xbf16, #tpu.memory_space<vmem>>, vector<1x8x16xbf16>
    %100 = vector.shape_cast %99 : vector<1x8x16xbf16> to vector<8x16xbf16>
    %cst_36 = arith.constant dense<0.000000e+00> : vector<256x16xf32>
    %101 = tpu.matmul %98, %100, %cst_36 {dimension_numbers = #tpu.dot_dimension_numbers<[1], [0], [0], [1], [0, 0, 1, 1], [], []>} : vector<256x8xbf16>, vector<8x16xbf16>, vector<256x16xf32> -> vector<256x16xf32>
    %102 = arith.addf %90, %101 : vector<256x16xf32>
    %103 = vector.extract_strided_slice %24 {offsets = [32, 0], sizes = [256, 8], strides = [1, 1]} : vector<290x8xf32> to vector<256x8xf32>
    %c1_i32_37 = arith.constant 1 : i32
    %104 = vector.broadcast %c1_i32_37 : i32 to vector<256x1xi32>
    %105 = arith.cmpi sge, %41, %104 : vector<256x1xi32>
    %cst_38 = arith.constant 0.000000e+00 : f32
    %106 = vector.shape_cast %105 : vector<256x1xi1> to vector<256x1xi1>
    %107 = vector.broadcast %106 : vector<256x1xi1> to vector<256x8xi1>
    %108 = vector.broadcast %cst_38 : f32 to vector<256x8xf32>
    %109 = arith.select %107, %103, %108 : vector<256x8xi1>, vector<256x8xf32>
    %110 = arith.truncf %109 : vector<256x8xf32> to vector<256x8xbf16>
    %c6 = arith.constant 6 : index
    %c0_39 = arith.constant 0 : index
    %c0_40 = arith.constant 0 : index
    %111 = vector.load %arg2[%c6, %c0_39, %c0_40] : memref<9x8x16xbf16, #tpu.memory_space<vmem>>, vector<1x8x16xbf16>
    %112 = vector.shape_cast %111 : vector<1x8x16xbf16> to vector<8x16xbf16>
    %cst_41 = arith.constant dense<0.000000e+00> : vector<256x16xf32>
    %113 = tpu.matmul %110, %112, %cst_41 {dimension_numbers = #tpu.dot_dimension_numbers<[1], [0], [0], [1], [0, 0, 1, 1], [], []>} : vector<256x8xbf16>, vector<8x16xbf16>, vector<256x16xf32> -> vector<256x16xf32>
    %114 = arith.addf %102, %113 : vector<256x16xf32>
    %115 = vector.extract_strided_slice %24 {offsets = [33, 0], sizes = [256, 8], strides = [1, 1]} : vector<290x8xf32> to vector<256x8xf32>
    %116 = arith.truncf %115 : vector<256x8xf32> to vector<256x8xbf16>
    %c7 = arith.constant 7 : index
    %c0_42 = arith.constant 0 : index
    %c0_43 = arith.constant 0 : index
    %117 = vector.load %arg2[%c7, %c0_42, %c0_43] : memref<9x8x16xbf16, #tpu.memory_space<vmem>>, vector<1x8x16xbf16>
    %118 = vector.shape_cast %117 : vector<1x8x16xbf16> to vector<8x16xbf16>
    %cst_44 = arith.constant dense<0.000000e+00> : vector<256x16xf32>
    %119 = tpu.matmul %116, %118, %cst_44 {dimension_numbers = #tpu.dot_dimension_numbers<[1], [0], [0], [1], [0, 0, 1, 1], [], []>} : vector<256x8xbf16>, vector<8x16xbf16>, vector<256x16xf32> -> vector<256x16xf32>
    %120 = arith.addf %114, %119 : vector<256x16xf32>
    %121 = vector.extract_strided_slice %24 {offsets = [34, 0], sizes = [256, 8], strides = [1, 1]} : vector<290x8xf32> to vector<256x8xf32>
    %c14_i32_45 = arith.constant 14 : i32
    %122 = vector.broadcast %c14_i32_45 : i32 to vector<256x1xi32>
    %123 = arith.cmpi sle, %41, %122 : vector<256x1xi32>
    %cst_46 = arith.constant 0.000000e+00 : f32
    %124 = vector.shape_cast %123 : vector<256x1xi1> to vector<256x1xi1>
    %125 = vector.broadcast %124 : vector<256x1xi1> to vector<256x8xi1>
    %126 = vector.broadcast %cst_46 : f32 to vector<256x8xf32>
    %127 = arith.select %125, %121, %126 : vector<256x8xi1>, vector<256x8xf32>
    %128 = arith.truncf %127 : vector<256x8xf32> to vector<256x8xbf16>
    %c8 = arith.constant 8 : index
    %c0_47 = arith.constant 0 : index
    %c0_48 = arith.constant 0 : index
    %129 = vector.load %arg2[%c8, %c0_47, %c0_48] : memref<9x8x16xbf16, #tpu.memory_space<vmem>>, vector<1x8x16xbf16>
    %130 = vector.shape_cast %129 : vector<1x8x16xbf16> to vector<8x16xbf16>
    %cst_49 = arith.constant dense<0.000000e+00> : vector<256x16xf32>
    %131 = tpu.matmul %128, %130, %cst_49 {dimension_numbers = #tpu.dot_dimension_numbers<[1], [0], [0], [1], [0, 0, 1, 1], [], []>} : vector<256x8xbf16>, vector<8x16xbf16>, vector<256x16xf32> -> vector<256x16xf32>
    %132 = arith.addf %120, %131 : vector<256x16xf32>
    %133 = arith.truncf %132 : vector<256x16xf32> to vector<256x16xbf16>
    %c0_50 = arith.constant 0 : index
    %c0_51 = arith.constant 0 : index
    %c0_52 = arith.constant 0 : index
    %134 = vector.load %arg5[%c0_50, %c0_51, %c0_52] : memref<1x256x16xbf16, #tpu.memory_space<vmem>>, vector<1x256x16xbf16>
    %135 = vector.shape_cast %134 : vector<1x256x16xbf16> to vector<256x16xbf16>
    %136 = vector.shape_cast %133 : vector<256x16xbf16> to vector<1x256x16xbf16>
    tpu.vector_store %arg5[%c0_50, %c0_51, %c0_52], %136 {strides = array<i32>} : memref<1x256x16xbf16, #tpu.memory_space<vmem>>, vector<1x256x16xbf16>,
    return
  }
  func.func @transform_0(%arg0: i32) -> (i32, i32, i32) {
    %c0_i32 = arith.constant 0 : i32
    %c0_i32_0 = arith.constant 0 : i32
    %c0_i32_1 = arith.constant 0 : i32
    return %arg0, %c0_i32, %c0_i32_0 : i32, i32, i32
  }
  func.func @transform_1(%arg0: i32) -> (i32, i32, i32) {
    %c0_i32 = arith.constant 0 : i32
    %c0_i32_0 = arith.constant 0 : i32
    %c0_i32_1 = arith.constant 0 : i32
    %c0_i32_2 = arith.constant 0 : i32
    return %c0_i32, %c0_i32_0, %c0_i32_1 : i32, i32, i32
  }
  func.func @transform_2(%arg0: i32) -> (i32, i32) {
    %c0_i32 = arith.constant 0 : i32
    %c0_i32_0 = arith.constant 0 : i32
    %c0_i32_1 = arith.constant 0 : i32
    return %c0_i32, %c0_i32_0 : i32, i32
  }
  func.func @transform_3(%arg0: i32) -> (i32, i32) {
    %c0_i32 = arith.constant 0 : i32
    %c0_i32_0 = arith.constant 0 : i32
    %c0_i32_1 = arith.constant 0 : i32
    return %c0_i32, %c0_i32_0 : i32, i32
  }
  func.func @transform_4(%arg0: i32) -> (i32, i32, i32) {
    %c0_i32 = arith.constant 0 : i32
    %c0_i32_0 = arith.constant 0 : i32
    %c0_i32_1 = arith.constant 0 : i32
    return %arg0, %c0_i32, %c0_i32_0 : i32, i32, i32
  }
}

</mosaic_0001>

<bundles_post_ra>
// kernel: tpu_custom_call.1
= control target key start
LH: loop header
LB: loop body
LE: loop exit
PB: predicated region body
PF: predicated region fallthrough
CT: control target
= control target key end

     0   :  { %s4961_s15 = smov 0   ;;  %s6793_s0 = inlined_call_operand.vmem [shape: bf16[2,290,8], index: 0, kind: input, shape index: {}]   ;;  %s6794_s1 = inlined_call_operand.vmem [shape: bf16[9,8,16], index: 1, kind: input, shape index: {}]   ;;  %s6795_s2 = inlined_call_operand.vmem [shape: f32[1,8], index: 2, kind: input, shape index: {}]   ;;  %s6796_s3 = inlined_call_operand.vmem [shape: f32[1,8], index: 3, kind: input, shape index: {}]   ;;  %s6797_s4 = inlined_call_operand.vmem [shape: bf16[2,256,16], index: 4, kind: output, shape index: {}]  }
   0x1 LB: > { %s4132_s16 = sadd.s32 4294967295, %s4931_s15   ;;  %p4136_p0 = scmp.ge.s32.totalorder %s4931_s15, 1  ;;  %s4931_s15 = sphi %s4961_s15, %s14_s15  }
   0x2   : > { %p162_p1 = scmp.lt.s32.totalorder %s4931_s15, 3 }
   0x4   : > { %p163_p2 = pnand %p4136_p0, %p162_p1 }
   0x6   : > { %166 = sbr.rel (%p163_p2) target bundleno = 550 (0x226), region = 36 }
   0xb   : > { %v4142_v0 = vld [vmem:[%s6794_s1 + $0x4] sm:$0xf]  ;;  %vm6854_vm0 = vcmask 1043456   ;;  %p188_p3 = scmp.lt.s32.totalorder %s4132_s16, 1  ;;  %v398_v1 = vlaneseq  ;;  %v1186_v4 = vld [vmem:[%s6794_s1] sm:$0xf] }
   0xc   : > { %4902 = vmatprep.subr.msk.bf16.mxu1 %vm6854_vm0, %v4142_v0  ;;  %4901 = vmatprep.subr.msk.bf16.mxu0 %vm6854_vm0, %v4142_v0  ;;  %v1390_v2 = vsel %vm6854_vm0, %v4142_v0, 0  ;;  %v4174_v5 = vld [vmem:[%s6794_s1 + $0x8] sm:$0xf]  ;;  %v4933_v8 = vmov 0   ;;  %v4997_v10 = vsel %vm6854_vm0, %v1186_v4, 0  ;;  %v6798_v13 = vmov 0.0  }
   0xd   : > { %4900 = vmatpush3.bf16.msra.mxu1 %v1390_v2  ;;  %4594 = vmatpush3.bf16.msra.mxu0 %v1390_v2  ;;  %s7498_s16 = smov (!%p188_p3, %s4132_s16), 1  ;;  %v4977_v3 = vshrl.u32 %v398_v1, 7  ;;  %v4994_v9 = vrot.slane %v4933_v8, 1  ;;  %v5007_v11 = vld [vmem:[%s6795_s2] ss:$0 sm:$0xff]  ;;  %v5010_v12 = vsel %vm6854_vm0, %v4174_v5, 0 }
   0xe   : > { %4903 = vmatprep.subr.msk.bf16.mxu1 %vm6854_vm0, %v1186_v4  ;;  %s4911_s23 = smul.u32 148, %s7498_s16  ;;  %4904 = vmatprep.subr.msk.bf16.mxu0 %vm6854_vm0, %v4174_v5  ;;  %v5013_v14 = vrot.slane %v6798_v13, 2  ;;  %v5031_v26 = vld [vmem:[%s6796_s3] ss:$0 sm:$0xff]  ;;  %vm6851_vm2 = vsmask.f32 7424 }
   0xf   : > { %v4988_v6 = vadd.s32 16, %v4977_v3  ;;  %v4992_v7 = vadd.s32 8, %v4977_v3  ;;  %6986 = vst [vmem:[#allocation2_spill] sm:$0xff] %v4994_v9  ;;  %v5016_v15 = vadd.s32 24, %v4977_v3  ;;  %v5024_v20 = vadd.s32 32, %v4977_v3 }
  0x10   : > { %s5002_s26 = scalar_lea.vmem %s6793_s0, %s4911_s23  ;;  %6987 = vst [vmem:[#allocation3_spill] sm:$0xff] %v5013_v14  ;;  %vm6867_vm3 = vcmask 64512   ;;  %v5057_v52 = vld [vmem:[%s6794_s1 + $0xc] sm:$0xf]  ;;  %vm6886_vm4 = vcmask 1045504   ;;  %s4327_s23 = sshll.u32 %s7498_s16, 7 }
  0x11   : > { %v4424_v16 = vld [vmem:[%s5002_s26 + $0x8] sm:$0xff]   ;;  %vm438_vm1 = vcmp.ge.s32.totalorder %v4988_v6, 17  ;;  %v4431_v18 = vld [vmem:[%s5002_s26 + $0x40] sm:$0xff]   ;;  %v4425_v24 = vld [vmem:[%s5002_s26 + $0x10] sm:$0xff]   ;;  %v5081_v0 = vsel %vm6854_vm0, %v5057_v52, 0  ;;  %s6641_s16 = scalar_lea.vmem %s6797_s4, %s4327_s23 }
  0x12   : > { %v4432_v19 = vld [vmem:[%s5002_s26 + $0x48] sm:$0xff]   ;;  %v4362_v21 = vunpack.c.l.bf16 %v4424_v16  ;;  %v4363_v22 = vunpack.c.h.bf16 %v4424_v16  ;;  %v4390_v23 = vunpack.c.l.bf16 %v4431_v18  ;;  %v4391_v27 = vunpack.c.h.bf16 %v4431_v18  ;;  %v4433_v47 = vld [vmem:[%s5002_s26 + $0x50] sm:$0xff]   ;;  %v4426_v5 = vld [vmem:[%s5002_s26 + $0x18] sm:$0xff]  }
  0x13   : > { %v4394_v28 = vunpack.c.l.bf16 %v4432_v19  ;;  %v4395_v29 = vunpack.c.h.bf16 %v4432_v19  ;;  %v4366_v30 = vunpack.c.l.bf16 %v4425_v24  ;;  %v4367_v34 = vunpack.c.h.bf16 %v4425_v24  ;;  %v5236_v8 = vld [vmem:[%s5002_s26 + $0x80] sm:$0xff]  }
  0x14   : > { %v282_v31 = vmul.f32 %v4362_v21, %v5007_v11  ;;  %v283_v32 = vmul.f32 %v4363_v22, %v5007_v11  ;;  %v296_v33 = vmul.f32 %v4390_v23, %v5007_v11  ;;  %v297_v35 = vmul.f32 %v4391_v27, %v5007_v11 }
  0x15   : > { %v298_v36 = vmul.f32 %v4394_v28, %v5007_v11  ;;  %v299_v37 = vmul.f32 %v4395_v29, %v5007_v11  ;;  %v284_v38 = vmul.f32 %v4366_v30, %v5007_v11  ;;  %v285_v42 = vmul.f32 %v4367_v34, %v5007_v11 }
  0x16   : > { %v326_v39 = vadd.f32 %v5031_v26, %v282_v31  ;;  %v327_v40 = vadd.f32 %v5031_v26, %v283_v32  ;;  %v340_v41 = vadd.f32 %v5031_v26, %v296_v33  ;;  %v341_v43 = vadd.f32 %v5031_v26, %v297_v35 }
  0x17   : > { %v342_v44 = vadd.f32 %v5031_v26, %v298_v36  ;;  %v343_v45 = vadd.f32 %v5031_v26, %v299_v37  ;;  %v328_v46 = vadd.f32 %v5031_v26, %v284_v38  ;;  %v329_v51 = vadd.f32 %v5031_v26, %v285_v42  ;;  %v4434_v36 = vld [vmem:[%s5002_s26 + $0x58] sm:$0xff]  }
  0x18   : > { %v363_v48 = vmax.f32 %v326_v39, 0.0  ;;  %v5049_v49 = vmax.f32 %v327_v40, 0.0  ;;  %v5051_v50 = vmax.f32 %v340_v41, 0.0  ;;  %v5059_v53 = vmax.f32 %v341_v43, 0.0 }
  0x19   : > { %v5061_v54 = vmax.f32 %v342_v44, 0.0  ;;  %v5063_v55 = vmax.f32 %v343_v45, 0.0  ;;  %v5065_v56 = vmax.f32 %v328_v46, 0.0  ;;  %v5071_v58 = vmax.f32 %v329_v51, 0.0  ;;  %v4427_v45 = vld [vmem:[%s5002_s26 + $0x20] sm:$0xff]  }
  0x1a   : > { %6988 = vst [vmem:[#allocation4_spill] sm:$0xff] %v5059_v53  ;;  %v5069_v57 = vsel %vm438_vm1, %v363_v48, 0.0  ;;  %v4398_v59 = vunpack.c.l.bf16 %v4433_v47  ;;  %v4399_v60 = vunpack.c.h.bf16 %v4433_v47  ;;  %v1195_v62 = vpack.c.bf16 %v5059_v53, %v5051_v50 }
  0x1b   : > { %6989 = vst [vmem:[#allocation5_spill] sm:$0xff] %v5071_v58  ;;  %v1188_v61 = vpack.c.bf16 %v5049_v49, %v5069_v57  ;;  %v1196_v63 = vpack.c.bf16 %v5063_v55, %v5061_v54  ;;  %v1189_v1 = vpack.c.bf16 %v5071_v58, %v5065_v56  ;;  %v4370_v31 = vunpack.c.l.bf16 %v4426_v5 }
  0x1c   : > { %v300_v2 = vmul.f32 %v4398_v59, %v5007_v11  ;;  %v301_v4 = vmul.f32 %v4399_v60, %v5007_v11  ;;  %v1271_v19 = vshll.u32 %v1195_v62, 16  ;;  %v1275_v21 = vshrl.u32 %v1195_v62, 16  ;;  %v5116_v59 = vld [vmem:[%s6794_s1 + $0x10] sm:$0xf] }
  0x1d   : > { %v1215_v16 = vshll.u32 %v1188_v61, 16  ;;  %v1219_v18 = vshrl.u32 %v1188_v61, 16  ;;  %v1279_v22 = vshll.u32 %v1196_v63, 16  ;;  %v1223_v23 = vshll.u32 %v1189_v1, 16 }
  0x1e   : > { %v344_v24 = vadd.f32 %v5031_v26, %v300_v2  ;;  %v345_v27 = vadd.f32 %v5031_v26, %v301_v4  ;;  %v5091_v29 = vrot.slane %v1271_v19, 1  ;;  %v1283_v30 = vshrl.u32 %v1196_v63, 16 }
  0x1f   : > { %v1217_v28 = vrot.slane %v1215_v16, 1  ;;  %v1281_v32 = vrot.slane %v1279_v22, 1  ;;  %v1225_v33 = vrot.slane %v1223_v23, 1  ;;  %v4371_v40 = vunpack.c.h.bf16 %v4426_v5 }
  0x20   : > { %v5093_v34 = vmax.f32 %v344_v24, 0.0  ;;  %v5095_v35 = vmax.f32 %v345_v27, 0.0  ;;  %v1277_v39 = vor.u32 %v1275_v21, %v5091_v29  ;;  %v286_v43 = vmul.f32 %v4370_v31, %v5007_v11 }
  0x21   : > { %v1218_v37 = vsel %vm6851_vm2, %v4994_v9, %v1217_v28  ;;  %v1221_v38 = vor.u32 %v1219_v18, %v1217_v28  ;;  %v1285_v42 = vor.u32 %v1283_v30, %v1281_v32  ;;  %v1227_v44 = vshrl.u32 %v1189_v1, 16  ;;  %v4435_v1 = vld [vmem:[%s5002_s26 + $0x60] sm:$0xff]   ;;  %v4428_v28 = vld [vmem:[%s5002_s26 + $0x28] sm:$0xff]  }
  0x22   : > { %6990 = vst [vmem:[#allocation6_spill] sm:$0xff] %v5095_v35  ;;  %4595 = vmatprep.mubr.msk.bf16.mxu0 %vm6867_vm3, %v1218_v37  ;;  %v1197_v41 = vpack.c.bf16 %v5095_v35, %v5093_v34  ;;  %v5107_v46 = vsel %vm6851_vm2, %v1277_v39, %v1281_v32  ;;  %v287_v48 = vmul.f32 %v4371_v40, %v5007_v11  ;;  %v4402_v51 = vunpack.c.l.bf16 %v4434_v36 }
  0x23   : > { %6991 = vst [vmem:[#allocation7_spill] sm:$0xff] %v5107_v46  ;;  %v5110_v47 = vsel %vm6851_vm2, %v1221_v38, %v1225_v33  ;;  %4611 = vmatprep.mubr.msk.bf16.mxu1 %vm6867_vm3, %v5107_v46  ;;  %v330_v61 = vadd.f32 %v5031_v26, %v286_v43  ;;  %v1229_v62 = vor.u32 %v1227_v44, %v1225_v33  ;;  %v4403_v63 = vunpack.c.h.bf16 %v4434_v36  ;;  %v4436_v44 = vld [vmem:[%s5002_s26 + $0x68] sm:$0xff]  }
  0x24   : > { %4596 = vmatmul.mubr.msk.bf16.vlgmr.msra.gmra.mxu0 %vm6867_vm3, %v5110_v47  ;;  %v1287_v60 = vshll.u32 %v1197_v41, 16  ;;  %v331_v2 = vadd.f32 %v5031_v26, %v287_v48  ;;  %v302_v4 = vmul.f32 %v4402_v51, %v5007_v11  ;;  %v1291_v5 = vshrl.u32 %v1197_v41, 16 }
  0x25   : > { %4662 = vmatpush3.bf16.msra.mxu0 %v5010_v12  ;;  %v4374_v16 = vunpack.c.l.bf16 %v4427_v45  ;;  %v5127_v19 = vmax.f32 %v330_v61, 0.0  ;;  %v303_v21 = vmul.f32 %v4403_v63, %v5007_v11  ;;  %v4375_v22 = vunpack.c.h.bf16 %v4427_v45 }
  0x26   : > { %v1289_v18 = vrot.slane %v1287_v60, 1  ;;  %4906 = vmatprep.subr.msk.bf16.mxu0 %vm6854_vm0, %v5116_v59  ;;  %v5132_v23 = vmax.f32 %v331_v2, 0.0  ;;  %v346_v24 = vadd.f32 %v5031_v26, %v302_v4  ;;  %v4406_v27 = vunpack.c.l.bf16 %v4435_v1 }
  0x27   : > { %v288_v12 = vmul.f32 %v4374_v16, %v5007_v11  ;;  %v347_v31 = vadd.f32 %v5031_v26, %v303_v21  ;;  %v289_v33 = vmul.f32 %v4375_v22, %v5007_v11  ;;  %v4407_v39 = vunpack.c.h.bf16 %v4435_v1 }
  0x28   : > { %v5138_v30 = vsel %vm6851_vm2, %v1285_v42, %v1289_v18  ;;  %v1293_v32 = vor.u32 %v1291_v5, %v1289_v18  ;;  %v1190_v36 = vpack.c.bf16 %v5132_v23, %v5127_v19  ;;  %v5146_v37 = vmax.f32 %v346_v24, 0.0 }
  0x29   : > { %6992 = vst [vmem:[#allocation8_spill] sm:$0xff] %v5138_v30  ;;  %4612 = vmatmul.mubr.msk.bf16.vlgmr.msra.gmra.mxu1 %vm6867_vm3, %v5138_v30  ;;  %v332_v38 = vadd.f32 %v5031_v26, %v288_v12  ;;  %v5150_v40 = vmax.f32 %v347_v31, 0.0  ;;  %v333_v41 = vadd.f32 %v5031_v26, %v289_v33  ;;  %v304_v42 = vmul.f32 %v4406_v27, %v5007_v11 }
  0x2a   : > { %4628 = vmatpush3.bf16.msra.mxu1 %v4997_v10  ;;  %v4378_v43 = vunpack.c.l.bf16 %v4428_v28  ;;  %v1231_v45 = vshll.u32 %v1190_v36, 16  ;;  %v1235_v51 = vshrl.u32 %v1190_v36, 16  ;;  %v305_v60 = vmul.f32 %v4407_v39, %v5007_v11 }
  0x2b   : > { %v5155_v48 = vmax.f32 %v332_v38, 0.0  ;;  %4905 = vmatprep.subr.msk.bf16.mxu1 %vm6854_vm0, %v5057_v52  ;;  %v1198_v10 = vpack.c.bf16 %v5150_v40, %v5146_v37  ;;  %v5162_v61 = vmax.f32 %v333_v41, 0.0  ;;  %v348_v63 = vadd.f32 %v5031_v26, %v304_v42 }
  0x2c   : > { %v4379_v1 = vunpack.c.h.bf16 %v4428_v28  ;;  %v1233_v2 = vrot.slane %v1231_v45, 1  ;;  %v349_v4 = vadd.f32 %v5031_v26, %v305_v60  ;;  %v290_v5 = vmul.f32 %v4378_v43, %v5007_v11  ;;  %v4429_v43 = vld [vmem:[%s5002_s26 + $0x30] sm:$0xff]  }
  0x2d   : > { %6993 = vst [vmem:[#allocation9_spill] sm:$0xff] %v5162_v61  ;;  %v4410_v16 = vunpack.c.l.bf16 %v4436_v44  ;;  %v1295_v18 = vshll.u32 %v1198_v10, 16  ;;  %v1191_v21 = vpack.c.bf16 %v5162_v61, %v5155_v48  ;;  %v5169_v52 = vmax.f32 %v348_v63, 0.0 }
  0x2e   : > { %v1299_v22 = vshrl.u32 %v1198_v10, 16  ;;  %v5172_v24 = vsel %vm6851_vm2, %v1229_v62, %v1233_v2  ;;  %v1237_v12 = vor.u32 %v1235_v51, %v1233_v2  ;;  %v5174_v27 = vmax.f32 %v349_v4, 0.0  ;;  %v4437_v4 = vld [vmem:[%s5002_s26 + $0x70] sm:$0xff]  }
  0x2f   : > { %6994 = vst [vmem:[#allocation10_spill] sm:$0xff] %v5172_v24  ;;  %v291_v28 = vmul.f32 %v4379_v1, %v5007_v11  ;;  %4599 = vmatprep.mubr.msk.bf16.mxu0 %vm6867_vm3, %v5172_v24  ;;  %v1297_v31 = vrot.slane %v1295_v18, 1  ;;  %v1239_v33 = vshll.u32 %v1191_v21, 16  ;;  %v334_v36 = vadd.f32 %v5031_v26, %v290_v5 }
  0x30   : > { %v1243_v38 = vshrl.u32 %v1191_v21, 16  ;;  %v1199_v39 = vpack.c.bf16 %v5174_v27, %v5169_v52  ;;  %v4411_v41 = vunpack.c.h.bf16 %v4436_v44  ;;  %v306_v42 = vmul.f32 %v4410_v16, %v5007_v11 }
  0x31   : > { %v335_v62 = vadd.f32 %v5031_v26, %v291_v28  ;;  %v5186_v45 = vsel %vm6851_vm2, %v1293_v32, %v1297_v31  ;;  %v1241_v51 = vrot.slane %v1239_v33, 1  ;;  %v1301_v60 = vor.u32 %v1299_v22, %v1297_v31 }
  0x32   : > { %6995 = vst [vmem:[#allocation11_spill] sm:$0xff] %v5186_v45  ;;  %v5188_v10 = vmax.f32 %v334_v36, 0.0  ;;  %4615 = vmatprep.mubr.msk.bf16.mxu1 %vm6867_vm3, %v5186_v45  ;;  %v1303_v63 = vshll.u32 %v1199_v39, 16  ;;  %v307_v2 = vmul.f32 %v4411_v41, %v5007_v11  ;;  %v350_v44 = vadd.f32 %v5031_v26, %v306_v42 }
  0x33   : > { %v5192_v1 = vmax.f32 %v335_v62, 0.0  ;;  %v5198_v5 = vsel %vm6851_vm2, %v1237_v12, %v1241_v51  ;;  %v1307_v32 = vshrl.u32 %v1199_v39, 16  ;;  %v4382_v16 = vunpack.c.l.bf16 %v4429_v43  ;;  %v4430_v62 = vld [vmem:[%s5002_s26 + $0x38] sm:$0xff]  }
  0x34   : > { %6996 = vst [vmem:[#allocation12_spill] sm:$0xff] %v5198_v5  ;;  %v5202_v18 = vsel %vm6854_vm0, %v5116_v59, 0  ;;  %4600 = vmatmul.mubr.msk.bf16.gmra.mxu0 %vm6867_vm3, %v5198_v5  ;;  %v1305_v21 = vrot.slane %v1303_v63, 1  ;;  %v351_v28 = vadd.f32 %v5031_v26, %v307_v2  ;;  %v5209_v31 = vmax.f32 %v350_v44, 0.0 }
  0x35   : > { %v1192_v22 = vpack.c.bf16 %v5192_v1, %v5188_v10  ;;  %v4383_v33 = vunpack.c.h.bf16 %v4429_v43  ;;  %v292_v12 = vmul.f32 %v4382_v16, %v5007_v11  ;;  %v4414_v36 = vunpack.c.l.bf16 %v4437_v4 }
  0x36   : > { %v4415_v39 = vunpack.c.h.bf16 %v4437_v4  ;;  %v5214_v59 = vsel %vm6851_vm2, %v1301_v60, %v1305_v21  ;;  %v1245_v41 = vor.u32 %v1243_v38, %v1241_v51  ;;  %v5216_v63 = vmax.f32 %v351_v28, 0.0 }
  0x37   : > { %6997 = vst [vmem:[#allocation13_spill] sm:$0xff] %v5214_v59  ;;  %v1247_v42 = vshll.u32 %v1192_v22, 16  ;;  %4616 = vmatmul.mubr.msk.bf16.gmra.mxu1 %vm6867_vm3, %v5214_v59  ;;  %v1309_v2 = vor.u32 %v1307_v32, %v1305_v21  ;;  %v293_v44 = vmul.f32 %v4383_v33, %v5007_v11  ;;  %v336_v43 = vadd.f32 %v5031_v26, %v292_v12  ;;  %v4438_v33 = vld [vmem:[%s5002_s26 + $0x78] sm:$0xff]  }
  0x38   : > { %6998 = vst [vmem:[#allocation14_spill] sm:$0xff] %v5216_v63  ;;  %v308_v4 = vmul.f32 %v4414_v36, %v5007_v11  ;;  %v1200_v60 = vpack.c.bf16 %v5216_v63, %v5209_v31  ;;  %v309_v38 = vmul.f32 %v4415_v39, %v5007_v11  ;;  %v4386_v51 = vunpack.c.l.bf16 %v4430_v62 }
  0x39   : > { %v1249_v16 = vrot.slane %v1247_v42, 1  ;;  %v337_v28 = vadd.f32 %v5031_v26, %v293_v44  ;;  %v5227_v13 = vmax.f32 %v336_v43, 0.0  ;;  %v4387_v21 = vunpack.c.h.bf16 %v4430_v62 }
  0x3a   : > { %v352_v32 = vadd.f32 %v5031_v26, %v308_v4  ;;  %v1311_v12 = vshll.u32 %v1200_v60, 16  ;;  %v1251_v36 = vshrl.u32 %v1192_v22, 16  ;;  %v353_v42 = vadd.f32 %v5031_v26, %v309_v38 }
  0x3b   : > { %6999 = vst [vmem:[#allocation15_spill] sm:$0xff] %v5227_v13  ;;  %v5232_v17 = vsel %vm6851_vm2, %v1245_v41, %v1249_v16  ;;  %v5240_v39 = vmax.f32 %v337_v28, 0.0  ;;  %v1315_v43 = vshrl.u32 %v1200_v60, 16  ;;  %v294_v62 = vmul.f32 %v4386_v51, %v5007_v11 }
  0x3c   : > { %7000 = vst [vmem:[#allocation16_spill] sm:$0xff] %v5232_v17  ;;  %4603 = vmatprep.mubr.msk.bf16.mxu0 %vm6867_vm3, %v5232_v17  ;;  %v5242_v44 = vmax.f32 %v352_v32, 0.0  ;;  %v1313_v4 = vrot.slane %v1311_v12, 1  ;;  %v5245_v41 = vmax.f32 %v353_v42, 0.0  ;;  %v295_v22 = vmul.f32 %v4387_v21, %v5007_v11 }
  0x3d   : > { %v4418_v25 = vunpack.c.l.bf16 %v4438_v33  ;;  %v1193_v38 = vpack.c.bf16 %v5240_v39, %v5227_v13  ;;  %v338_v9 = vadd.f32 %v5031_v26, %v294_v62  ;;  %v4419_v59 = vunpack.c.h.bf16 %v4438_v33 }
  0x3e   : > { %v4422_v28 = vunpack.c.l.bf16 %v5236_v8  ;;  %v5253_v32 = vsel %vm6851_vm2, %v1309_v2, %v1313_v4  ;;  %v1253_v60 = vor.u32 %v1251_v36, %v1249_v16  ;;  %v1201_v51 = vpack.c.bf16 %v5245_v41, %v5242_v44 }
  0x3f   : > { %7001 = vst [vmem:[#allocation17_spill] sm:$0xff] %v5253_v32  ;;  %v339_v12 = vadd.f32 %v5031_v26, %v295_v22  ;;  %4619 = vmatprep.mubr.msk.bf16.mxu1 %vm6867_vm3, %v5253_v32  ;;  %v1255_v21 = vshll.u32 %v1193_v38, 16  ;;  %v1317_v42 = vor.u32 %v1315_v43, %v1313_v4  ;;  %v5260_v45 = vmax.f32 %v338_v9, 0.0 }
  0x40   : > { %v310_v33 = vmul.f32 %v4418_v25, %v5007_v11  ;;  %v1319_v62 = vshll.u32 %v1201_v51, 16  ;;  %v1259_v2 = vshrl.u32 %v1193_v38, 16  ;;  %v311_v16 = vmul.f32 %v4419_v59, %v5007_v11 }
  0x41   : > { %v5263_v30 = vmax.f32 %v339_v12, 0.0  ;;  %v1257_v36 = vrot.slane %v1255_v21, 1  ;;  %v1323_v17 = vshrl.u32 %v1201_v51, 16  ;;  %v312_v22 = vmul.f32 %v4422_v28, %v5007_v11 }
  0x42   : > { %v354_v46 = vadd.f32 %v5031_v26, %v310_v33  ;;  %v1321_v5 = vrot.slane %v1319_v62, 1  ;;  %v355_v9 = vadd.f32 %v5031_v26, %v311_v16  ;;  %v1898_v25 = vrot.slane %v5069_v57, 2 }
  0x43   : > { %v1194_v43 = vpack.c.bf16 %v5263_v30, %v5260_v45  ;;  %v5273_v4 = vsel %vm6851_vm2, %v1253_v60, %v1257_v36  ;;  %v356_v59 = vadd.f32 %v5031_v26, %v312_v22  ;;  %v7003_v12 = vand.u32 15, %v4992_v7 }
  0x44   : > { %7002 = vst [vmem:[#allocation18_spill] sm:$0xff] %v5273_v4  ;;  %v5275_v38 = vmax.f32 %v354_v46, 0.0  ;;  %v7004_v51 = vmov 0  ;;  %4604 = vmatmul.mubr.msk.bf16.gmra.mxu0 %vm6867_vm3, %v5273_v4  ;;  %v5287_v11 = vsel %vm6851_vm2, %v1317_v42, %v1321_v5  ;;  %v1261_v28 = vor.u32 %v1259_v2, %v1257_v36 }
  0x45   : > { %vm5280_vm5 = vcmp.le.s32.totalorder %v7003_v12, 14  ;;  %7007 = vst [vmem:[#allocation20_spill] sm:$0xff] %v5287_v11  ;;  %v1263_v21 = vshll.u32 %v1194_v43, 16  ;;  %v5289_v60 = vmax.f32 %v355_v9, 0.0  ;;  %4620 = vmatmul.mubr.msk.bf16.gmra.mxu1 %vm6867_vm3, %v5287_v11  ;;  %v1267_v26 = vshrl.u32 %v1194_v43, 16 }
  0x46   : > { %v7005_v51 = vsel %vm5280_vm5, 4294967295, %v7004_v51  ;;  %v5293_v46 = vmax.f32 %v356_v59, 0.0  ;;  %v1899_v7 = vsel %vm6886_vm4, %v5013_v14, %v1898_v25  ;;  %v690_v33 = vand.u32 15, %v5024_v20 }
  0x47   : > { %7006 = vst [vmem:[#allocation19_spill] sm:$0xff] %v7005_v51  ;;  %v1265_v62 = vrot.slane %v1263_v21, 1  ;;  %v1202_v42 = vpack.c.bf16 %v5289_v60, %v5275_v38  ;;  %v1993_v2 = vsel %vm5280_vm5, %v1899_v7, 0.0  ;;  %v1900_v16 = vrot.slane %v5049_v49, 2 }
  0x48   : > { %v1325_v36 = vor.u32 %v1323_v17, %v1321_v5  ;;  %v1203_v22 = vpack.c.bf16 %v5293_v46, %v5293_v46  ;;  %v7008_v43 = vand.u32 15, %v5016_v15  ;;  %v7009_v9 = vmov 0 }
  0x49   : > { %v1902_v20 = vrot.slane %v5065_v56, 2  ;;  %v5313_v59 = vsel %vm6851_vm2, %v1261_v28, %v1265_v62  ;;  %v1327_v12 = vshll.u32 %v1202_v42, 16  ;;  %v1269_v21 = vor.u32 %v1267_v26, %v1265_v62 }
  0x4a   : > { %vm5307_vm6 = vcmp.le.s32.totalorder %v7008_v43, 14  ;;  %7012 = vst [vmem:[#allocation22_spill] sm:$0xff] %v5313_v59  ;;  %v1331_v7 = vshrl.u32 %v1202_v42, 16  ;;  %v7013_v11 = vand.u32 15, %v4988_v6  ;;  %4607 = vmatprep.mubr.msk.bf16.mxu0 %vm6867_vm3, %v5313_v59  ;;  %v1335_v15 = vshll.u32 %v1203_v22, 16 }
  0x4b   : > { %v7010_v9 = vsel %vm5307_vm6, 4294967295, %v7009_v9  ;;  %v2024_v5 = vpack.c.bf16 %v1993_v2, %v5013_v14  ;;  %v5325_v43 = vsel %vm6886_vm4, %v1900_v16, %v1902_v20  ;;  %v1329_v28 = vrot.slane %v1327_v12, 1 }
  0x4c   : > { %7011 = vst [vmem:[#allocation21_spill] sm:$0xff] %v7010_v9  ;;  %vm5317_vm7 = vcmp.ge.s32.totalorder %v7013_v11, 1  ;;  %v5329_v26 = vsel %vm6851_vm2, %v1269_v21, %v5091_v29  ;;  %v5332_v6 = vsel %vm6886_vm4, %v1898_v25, %v1900_v16  ;;  %vm5334_vm8 = vcmp.ge.s32.totalorder %v690_v33, 1 }
  0x4d   : > { %7016 = vst [vmem:[#allocation23_spill] sm:$0xff] %v5329_v26  ;;  %v1337_v62 = vrot.slane %v1335_v15, 1  ;;  %v1995_v42 = vsel %vm5307_vm6, %v5325_v43, 0.0  ;;  %v404_v2 = vadd.s32 40, %v4977_v3  ;;  %v1904_v22 = vrot.slane %v5071_v58, 2  ;;  %4608 = vmatmul.mubr.msk.bf16.gmra.mxu0 %vm6867_vm3, %v5329_v26 }
  0x4e   : > { %v5344_v12 = vsel %vm6851_vm2, %v1325_v36, %v1329_v28  ;;  %v5348_v29 = vor.u32 %v1331_v7, %v1329_v28  ;;  %v1906_v25 = vrot.slane %v5127_v19, 2  ;;  %v405_v33 = vadd.s32 48, %v4977_v3  ;;  %4663 = vmatprep.mubr.msk.bf16.mxu0 %vm6867_vm3, %v2024_v5 }
  0x4f   : > { %7019 = vst [vmem:[#allocation24_spill] sm:$0xff] %v5344_v12  ;;  %4623 = vmatprep.mubr.msk.bf16.mxu1 %vm6867_vm3, %v5344_v12  ;;  %v697_v16 = vand.u32 15, %v404_v2  ;;  %v5356_v21 = vsel %vm6886_vm4, %v1902_v20, %v1904_v22  ;;  %v406_v36 = vadd.s32 56, %v4977_v3  ;;  %v1908_v15 = vrot.slane %v5132_v23, 2 }
  0x50   : > { %7020 = vst [vmem:[#allocation25_spill] sm:$0xff] %v5348_v29  ;;  %7021 = vst [vmem:[#allocation26_spill] sm:$0xff] %v5356_v21  ;;  %v1338_v7 = vsel %vm6851_vm2, %v5348_v29, %v1337_v62  ;;  %v5363_v28 = vsel %vm6886_vm4, %v1904_v22, %v1906_v25  ;;  %v704_v14 = vand.u32 15, %v405_v33  ;;  %v1910_v32 = vrot.slane %v5155_v48, 2 }
  0x51   : > { %7022 = vst [vmem:[#allocation27_spill] sm:$0xff] %v5363_v28  ;;  %v1140_v5 = vsel %vm5317_vm7, %v5069_v57, 0.0  ;;  %4624 = vmatmul.mubr.msk.bf16.gmra.mxu1 %vm6867_vm3, %v1338_v7  ;;  %v1142_v20 = vsel %vm5334_vm8, %v5065_v56, 0.0  ;;  %vm5373_vm9 = vcmp.le.s32.totalorder %v697_v16, 14  ;;  %v7023_v2 = vmov 0  ;;  %v7186_v51 = vld [vmem:[#allocation22_spill] sm:$0xff] }
  0x52   : > { %v7024_v2 = vsel %vm5373_vm9, 4294967295, %v7023_v2  ;;  %v711_v62 = vand.u32 15, %v406_v36  ;;  %v4935_v22 = vmov 0.0|0.0   ;;  %v2025_v33 = vpack.c.bf16 %v1995_v42, %v5332_v6 }
  0x53   : > { %7025 = vst [vmem:[#allocation28_spill] sm:$0xff] %v7024_v2  ;;  %4629 = vmatprep.mubr.bf16.mxu1 %v4935_v22  ;;  %v1997_v12 = vsel %vm5373_vm9, %v5363_v28, 0.0  ;;  %vm5381_vm10 = vcmp.ge.s32.totalorder %v704_v14, 1  ;;  %v7026_v29 = vmov 0  ;;  %v5386_v7 = vsel %vm6886_vm4, %v1908_v15, %v1910_v32  ;;  %v7178_v2 = vld [vmem:[#allocation18_spill] sm:$0xff] }
  0x54   : > { %v7027_v29 = vsel %vm5381_vm10, 4294967295, %v7026_v29  ;;  %v2026_v16 = vpack.c.bf16 %v1997_v12, %v5356_v21  ;;  %vm5389_vm11 = vcmp.le.s32.totalorder %v711_v62, 14  ;;  %v7029_v26 = vmov 0 }
  0x55   : > { %7028 = vst [vmem:[#allocation29_spill] sm:$0xff] %v7027_v29  ;;  %v7030_v26 = vsel %vm5389_vm11, 4294967295, %v7029_v26  ;;  %v5394_v36 = vsel %vm6886_vm4, %v1906_v25, %v1908_v15  ;;  %v3625_v42 = vsel %vm5307_vm6, %v5386_v7, 0.0  ;;  %v1171_v14 = vpack.c.bf16 %v5049_v49, %v1140_v5  ;;  %v5414_v5 = vld [vmem:[%s6794_s1 + $0x18] sm:$0xf]  ;;  %4664 = vmatmul.mubr.msk.bf16.vlgmr.msra.gmra.mxu0 %vm6867_vm3, %v2025_v33 }
  0x56   : > { %7031 = vst [vmem:[#allocation30_spill] sm:$0xff] %v7030_v26  ;;  %v1172_v22 = vpack.c.bf16 %v5071_v58, %v1142_v20  ;;  %v5402_v28 = vpack.c.bf16 %v3625_v42, %v5394_v36  ;;  %v407_v12 = vadd.s32 64, %v4977_v3  ;;  %v1144_v62 = vsel %vm5381_vm10, %v5127_v19, 0.0  ;;  %4730 = vmatpush3.bf16.msra.mxu0 %v5202_v18  ;;  %4667 = vmatprep.mubr.msk.bf16.mxu0 %vm6867_vm3, %v2026_v16  ;;  %v5439_v18 = vld [vmem:[%s6794_s1 + $0x14] sm:$0xf] }
  0x57   : > { %v408_v25 = vadd.s32 72, %v4977_v3  ;;  %v1912_v15 = vrot.slane %v5162_v61, 2  ;;  %v1914_v21 = vrot.slane %v5188_v10, 2  ;;  %v1999_v20 = vsel %vm5389_vm11, %v5386_v7, 0.0  ;;  %4908 = vmatprep.subr.msk.bf16.mxu0 %vm6854_vm0, %v5414_v5 }
  0x58   : > { %7032 = vst [vmem:[#allocation31_spill] sm:$0xff] %v5402_v28  ;;  %v718_v42 = vand.u32 15, %v407_v12  ;;  %v409_v28 = vadd.s32 80, %v4977_v3  ;;  %v410_v9 = vadd.s32 88, %v4977_v3  ;;  %v1916_v33 = vrot.slane %v5192_v1, 2 }
  0x59   : > { %v725_v59 = vand.u32 15, %v408_v25  ;;  %v5425_v4 = vsel %vm6886_vm4, %v1910_v32, %v1912_v15  ;;  %v5428_v29 = vsel %vm6886_vm4, %v1912_v15, %v1914_v21  ;;  %v7035_v26 = vmov 0  ;;  %4630 = vmatmul.mubr.msk.bf16.vlgmr.msra.gmra.mxu1 %vm6867_vm3, %v1171_v14 }
  0x5a   : > { %7033 = vst [vmem:[#allocation32_spill] sm:$0xff] %v5425_v4  ;;  %7034 = vst [vmem:[#allocation33_spill] sm:$0xff] %v5428_v29  ;;  %vm5431_vm12 = vcmp.ge.s32.totalorder %v718_v42, 1  ;;  %v732_v12 = vand.u32 15, %v409_v28  ;;  %v739_v24 = vand.u32 15, %v410_v9  ;;  %v1918_v58 = vrot.slane %v5227_v13, 2  ;;  %4696 = vmatpush3.bf16.msra.mxu1 %v5081_v0  ;;  %4633 = vmatprep.mubr.msk.bf16.mxu1 %vm6867_vm3, %v1172_v22 }
  0x5b   : > { %v7036_v26 = vsel %vm5431_vm12, 4294967295, %v7035_v26  ;;  %vm5444_vm13 = vcmp.le.s32.totalorder %v725_v59, 14  ;;  %v7038_v32 = vmov 0  ;;  %v411_v16 = vadd.s32 96, %v4977_v3  ;;  %4907 = vmatprep.subr.msk.bf16.mxu1 %vm6854_vm0, %v5439_v18 }
  0x5c   : > { %7037 = vst [vmem:[#allocation34_spill] sm:$0xff] %v7036_v26  ;;  %v7039_v32 = vsel %vm5444_vm13, 4294967295, %v7038_v32  ;;  %v1173_v9 = vpack.c.bf16 %v5132_v23, %v1144_v62  ;;  %v2027_v28 = vpack.c.bf16 %v1999_v20, %v5394_v36  ;;  %v1146_v25 = vsel %vm5431_vm12, %v5155_v48, 0.0 }
  0x5d   : > { %7040 = vst [vmem:[#allocation35_spill] sm:$0xff] %v7039_v32  ;;  %v2001_v59 = vsel %vm5444_vm13, %v5428_v29, 0.0  ;;  %vm5460_vm14 = vcmp.ge.s32.totalorder %v732_v12, 1  ;;  %v7041_v15 = vmov 0  ;;  %v5465_v0 = vsel %vm6886_vm4, %v1914_v21, %v1916_v33 }
  0x5e   : > { %v2028_v14 = vpack.c.bf16 %v2001_v59, %v5425_v4  ;;  %v7042_v15 = vsel %vm5460_vm14, 4294967295, %v7041_v15  ;;  %7044 = vst [vmem:[#allocation37_spill] sm:$0xff] %v5465_v0  ;;  %v746_v22 = vand.u32 15, %v411_v16  ;;  %vm5469_vm15 = vcmp.le.s32.totalorder %v739_v24, 14  ;;  %4668 = vmatmul.mubr.msk.bf16.gmra.mxu0 %vm6867_vm3, %v2027_v28 }
  0x5f   : > { %7043 = vst [vmem:[#allocation36_spill] sm:$0xff] %v7042_v15  ;;  %v7045_v62 = vmov 0  ;;  %v5474_v20 = vsel %vm6886_vm4, %v1916_v33, %v1918_v58  ;;  %v412_v42 = vadd.s32 104, %v4977_v3  ;;  %v1920_v12 = vrot.slane %v5240_v39, 2 }
  0x60   : > { %v7046_v62 = vsel %vm5469_vm15, 4294967295, %v7045_v62  ;;  %7048 = vst [vmem:[#allocation39_spill] sm:$0xff] %v5474_v20  ;;  %v1174_v59 = vpack.c.bf16 %v5162_v61, %v1146_v25  ;;  %v1922_v21 = vrot.slane %v5260_v45, 2  ;;  %v413_v16 = vadd.s32 112, %v4977_v3  ;;  %4671 = vmatprep.mubr.msk.bf16.mxu0 %vm6867_vm3, %v2028_v14 }
  0x61   : > { %7047 = vst [vmem:[#allocation38_spill] sm:$0xff] %v7046_v62  ;;  %v414_v4 = vadd.s32 120, %v4977_v3  ;;  %v1148_v24 = vsel %vm5460_vm14, %v5188_v10, 0.0  ;;  %vm5486_vm1 = vcmp.ge.s32.totalorder %v746_v22, 1  ;;  %v7049_v33 = vmov 0  ;;  %4634 = vmatmul.mubr.msk.bf16.gmra.mxu1 %vm6867_vm3, %v1173_v9 }
  0x62   : > { %v7050_v33 = vsel %vm5486_vm1, 4294967295, %v7049_v33  ;;  %v753_v32 = vand.u32 15, %v412_v42  ;;  %v1924_v29 = vrot.slane %v5263_v30, 2  ;;  %v2003_v25 = vsel %vm5469_vm15, %v5474_v20, 0.0  ;;  %4637 = vmatprep.mubr.msk.bf16.mxu1 %vm6867_vm3, %v1174_v59 }
  0x63   : > { %7051 = vst [vmem:[#allocation40_spill] sm:$0xff] %v7050_v33  ;;  %v5496_v61 = vsel %vm6886_vm4, %v1918_v58, %v1920_v12  ;;  %v5499_v28 = vsel %vm6886_vm4, %v1920_v12, %v1922_v21  ;;  %v767_v15 = vand.u32 15, %v414_v4  ;;  %v7054_v22 = vmov 0 }
  0x64   : > { %7052 = vst [vmem:[#allocation41_spill] sm:$0xff] %v5496_v61  ;;  %7053 = vst [vmem:[#allocation42_spill] sm:$0xff] %v5499_v28  ;;  %vm5501_vm2 = vcmp.le.s32.totalorder %v753_v32, 14  ;;  %v760_v42 = vand.u32 15, %v413_v16  ;;  %v1926_v26 = vrot.slane %v5051_v50, 2  ;;  %v415_v14 = vadd.s32 128, %v4977_v3 }
  0x65   : > { %v7055_v22 = vsel %vm5501_vm2, 4294967295, %v7054_v22  ;;  %v1150_v58 = vsel %vm5486_vm1, %v5227_v13, 0.0  ;;  %v2005_v12 = vsel %vm5501_vm2, %v5499_v28, 0.0  ;;  %v416_v4 = vadd.s32 136, %v4977_v3 }
  0x66   : > { %7056 = vst [vmem:[#allocation43_spill] sm:$0xff] %v7055_v22  ;;  %v2029_v32 = vpack.c.bf16 %v2003_v25, %v5465_v0  ;;  %vm5517_vm0 = vcmp.le.s32.totalorder %v767_v15, 14  ;;  %v7057_v16 = vmov 0  ;;  %v5522_v9 = vsel %vm6886_vm4, %v1924_v29, %v1926_v26 }
  0x67   : > { %v7058_v16 = vsel %vm5517_vm0, 4294967295, %v7057_v16  ;;  %7060 = vst [vmem:[#allocation45_spill] sm:$0xff] %v5522_v9  ;;  %v774_v62 = vand.u32 15, %v415_v14  ;;  %v1175_v20 = vpack.c.bf16 %v5192_v1, %v1148_v24  ;;  %v2030_v33 = vpack.c.bf16 %v2005_v12, %v5496_v61 }
  0x68   : > { %7059 = vst [vmem:[#allocation44_spill] sm:$0xff] %v7058_v16  ;;  %v781_v22 = vand.u32 15, %v416_v4  ;;  %v1928_v28 = vrot.slane %v5059_v53, 2  ;;  %v1176_v13 = vpack.c.bf16 %v5240_v39, %v1150_v58  ;;  %vm5528_vm3 = vcmp.ge.s32.totalorder %v760_v42, 1 }
  0x69   : > { %v7061_v59 = vmov 0  ;;  %v5533_v15 = vsel %vm6886_vm4, %v1922_v21, %v1924_v29  ;;  %v1930_v25 = vrot.slane %v5061_v54, 2  ;;  %v2007_v24 = vsel %vm5517_vm0, %v5522_v9, 0.0 }
  0x6a   : > { %v7062_v59 = vsel %vm5528_vm3, 4294967295, %v7061_v59  ;;  %7063 = vst [vmem:[#allocation46_spill] sm:$0xff] %v5533_v15  ;;  %vm5539_vm2 = vcmp.ge.s32.totalorder %v774_v62, 1  ;;  %v7064_v14 = vmov 0  ;;  %vm5543_vm15 = vcmp.le.s32.totalorder %v781_v22, 14 }
  0x6b   : > { %v7065_v14 = vsel %vm5539_vm2, 4294967295, %v7064_v14  ;;  %v7067_v12 = vmov 0  ;;  %v418_v42 = vadd.s32 152, %v4977_v3  ;;  %vm7070_vm13 = vcmask 64512  }
  0x6c   : > { %7066 = vst [vmem:[#allocation47_spill] sm:$0xff] %v7065_v14  ;;  %v7068_v12 = vsel %vm5543_vm15, 4294967295, %v7067_v12  ;;  %4672 = vmatmul.mubr.msk.bf16.gmra.mxu0 %vm7070_vm13, %v2029_v32  ;;  %v5550_v29 = vsel %vm6886_vm4, %v1926_v26, %v1928_v28  ;;  %v5553_v21 = vsel %vm6886_vm4, %v1928_v28, %v1930_v25  ;;  %v417_v58 = vadd.s32 144, %v4977_v3  ;;  %vm7073_vm0 = vmmov %vm7070_vm13 }
  0x6d   : > { %7069 = vst [vmem:[#allocation48_spill] sm:$0xff] %v7068_v12  ;;  %7071 = vst [vmem:[#allocation49_spill] sm:$0xff] %v5550_v29  ;;  %v1932_v62 = vrot.slane %v5063_v55, 2  ;;  %4675 = vmatprep.mubr.msk.bf16.mxu0 %vm7073_vm0, %v2030_v33  ;;  %v2009_v22 = vsel %vm5543_vm15, %v5553_v21, 0.0  ;;  %v795_v4 = vand.u32 15, %v418_v42  ;;  %v1934_v16 = vrot.slane %v5093_v34, 2 }
  0x6e   : > { %7072 = vst [vmem:[#allocation50_spill] sm:$0xff] %v5553_v21  ;;  %v419_v32 = vadd.s32 160, %v4977_v3  ;;  %v420_v26 = vadd.s32 168, %v4977_v3  ;;  %vm7074_vm13 = vmmov %vm7073_vm0  ;;  %v1152_v28 = vsel %vm5528_vm3, %v5260_v45, 0.0  ;;  %v2031_v61 = vpack.c.bf16 %v2007_v24, %v5533_v15 }
  0x6f   : > { %4638 = vmatmul.mubr.msk.bf16.gmra.mxu1 %vm7074_vm13, %v1175_v20  ;;  %v1154_v33 = vsel %vm5539_vm2, %v5051_v50, 0.0  ;;  %v2032_v42 = vpack.c.bf16 %v2009_v22, %v5550_v29  ;;  %v788_v12 = vand.u32 15, %v417_v58  ;;  %v1936_v9 = vrot.slane %v5095_v35, 2 }
  0x70   : > { %4641 = vmatprep.mubr.msk.bf16.mxu1 %vm7073_vm0, %v1176_v13  ;;  %v809_v21 = vand.u32 15, %v420_v26  ;;  %vm5575_vm4 = vcmp.le.s32.totalorder %v795_v4, 14  ;;  %v7075_v20 = vmov 0  ;;  %vm7078_vm13 = vcmask 1045504  }
  0x71   : > { %v7076_v20 = vsel %vm5575_vm4, 4294967295, %v7075_v20  ;;  %v5580_v0 = vsel %vm7078_vm13, %v1932_v62, %v1934_v16  ;;  %v802_v24 = vand.u32 15, %v419_v32  ;;  %v1938_v15 = vrot.slane %v5146_v37, 2  ;;  %vm7083_vm15 = vmmov %vm7078_vm13 }
  0x72   : > { %7077 = vst [vmem:[#allocation51_spill] sm:$0xff] %v7076_v20  ;;  %7079 = vst [vmem:[#allocation52_spill] sm:$0xff] %v5580_v0  ;;  %v422_v14 = vadd.s32 184, %v4977_v3  ;;  %v1177_v13 = vpack.c.bf16 %v5263_v30, %v1152_v28  ;;  %v1178_v22 = vpack.c.bf16 %v5059_v53, %v1154_v33  ;;  %vm5586_vm0 = vcmp.le.s32.totalorder %v809_v21, 14 }
  0x73   : > { %v7080_v58 = vmov 0  ;;  %v5591_v4 = vsel %vm7083_vm15, %v1936_v9, %v1938_v15  ;;  %vm7085_vm11 = vcmask 64512   ;;  %vm5594_vm13 = vcmp.ge.s32.totalorder %v788_v12, 1  ;;  %vm7089_vm6 = vmmov %vm7083_vm15 }
  0x74   : > { %v7081_v58 = vsel %vm5586_vm0, 4294967295, %v7080_v58  ;;  %7084 = vst [vmem:[#allocation54_spill] sm:$0xff] %v5591_v4  ;;  %4676 = vmatmul.mubr.msk.bf16.gmra.mxu0 %vm7085_vm11, %v2031_v61  ;;  %v7086_v26 = vmov 0  ;;  %v5599_v32 = vsel %vm7089_vm6, %v1930_v25, %v1932_v62  ;;  %v2011_v28 = vsel %vm5575_vm4, %v5580_v0, 0.0  ;;  %vm7091_vm2 = vmmov %vm7085_vm11 }
  0x75   : > { %7082 = vst [vmem:[#allocation53_spill] sm:$0xff] %v7081_v58  ;;  %v7087_v26 = vsel %vm5594_vm13, 4294967295, %v7086_v26  ;;  %7090 = vst [vmem:[#allocation56_spill] sm:$0xff] %v5599_v32  ;;  %v421_v21 = vadd.s32 176, %v4977_v3  ;;  %4679 = vmatprep.mubr.msk.bf16.mxu0 %vm7091_vm2, %v2032_v42  ;;  %vm5606_vm3 = vcmp.ge.s32.totalorder %v802_v24, 1  ;;  %v7092_v33 = vmov 0 }
  0x76   : > { %7088 = vst [vmem:[#allocation55_spill] sm:$0xff] %v7087_v26  ;;  %v7093_v33 = vsel %vm5606_vm3, 4294967295, %v7092_v33  ;;  %vm7095_vm11 = vmmov %vm7089_vm6  ;;  %v423_v12 = vadd.s32 192, %v4977_v3  ;;  %v424_v25 = vadd.s32 200, %v4977_v3  ;;  %v2013_v62 = vsel %vm5586_vm0, %v5591_v4, 0.0 }
  0x77   : > { %7094 = vst [vmem:[#allocation57_spill] sm:$0xff] %v7093_v33  ;;  %v5611_v61 = vsel %vm7095_vm11, %v1934_v16, %v1936_v9  ;;  %v823_v20 = vand.u32 15, %v422_v14  ;;  %v1940_v29 = vrot.slane %v5150_v40, 2  ;;  %v1942_v42 = vrot.slane %v5169_v52, 2  ;;  %4642 = vmatmul.mubr.msk.bf16.gmra.mxu1 %vm7091_vm2, %v1177_v13  ;;  %vm7097_vm6 = vmmov %vm7091_vm2 }
  0x78   : > { %7096 = vst [vmem:[#allocation58_spill] sm:$0xff] %v5611_v61  ;;  %v1156_v16 = vsel %vm5594_vm13, %v5061_v54, 0.0  ;;  %v837_v9 = vand.u32 15, %v424_v25  ;;  %v1944_v24 = vrot.slane %v5174_v27, 2  ;;  %4645 = vmatprep.mubr.msk.bf16.mxu1 %vm7097_vm6, %v1178_v22  ;;  %v2033_v0 = vpack.c.bf16 %v2011_v28, %v5599_v32  ;;  %vm7105_vm6 = vmmov %vm7095_vm11 }
  0x79   : > { %v1158_v14 = vsel %vm5606_vm3, %v5093_v34, 0.0  ;;  %v816_v58 = vand.u32 15, %v421_v21  ;;  %v1946_v4 = vrot.slane %v5209_v31, 2  ;;  %v2034_v13 = vpack.c.bf16 %v2013_v62, %v5611_v61 }
  0x7a   : > { %v830_v53 = vand.u32 15, %v423_v12  ;;  %vm5632_vm15 = vcmp.le.s32.totalorder %v823_v20, 14  ;;  %v7098_v26 = vmov 0  ;;  %v5637_v25 = vsel %vm7095_vm11, %v1940_v29, %v1942_v42  ;;  %vm7111_vm11 = vmmov %vm7105_vm6 }
  0x7b   : > { %v7099_v26 = vsel %vm5632_vm15, 4294967295, %v7098_v26  ;;  %7101 = vst [vmem:[#allocation60_spill] sm:$0xff] %v5637_v25  ;;  %v426_v22 = vadd.s32 216, %v4977_v3  ;;  %v1179_v28 = vpack.c.bf16 %v5063_v55, %v1156_v16  ;;  %v1180_v32 = vpack.c.bf16 %v5095_v35, %v1158_v14 }
  0x7c   : > { %7100 = vst [vmem:[#allocation59_spill] sm:$0xff] %v7099_v26  ;;  %vm5642_vm2 = vcmp.le.s32.totalorder %v837_v9, 14  ;;  %v7102_v21 = vmov 0  ;;  %v5647_v62 = vsel %vm7105_vm6, %v1944_v24, %v1946_v4  ;;  %vm7107_vm0 = vcmask 64512  }
  0x7d   : > { %v7103_v21 = vsel %vm5642_vm2, 4294967295, %v7102_v21  ;;  %7106 = vst [vmem:[#allocation62_spill] sm:$0xff] %v5647_v62  ;;  %4680 = vmatmul.mubr.msk.bf16.gmra.mxu0 %vm7107_vm0, %v2033_v0  ;;  %vm5650_vm4 = vcmp.ge.s32.totalorder %v816_v58, 1  ;;  %v7108_v20 = vmov 0  ;;  %v5655_v12 = vsel %vm7111_vm11, %v1938_v15, %v1940_v29  ;;  %vm7113_vm3 = vmmov %vm7107_vm0 }
  0x7e   : > { %7104 = vst [vmem:[#allocation61_spill] sm:$0xff] %v7103_v21  ;;  %v7109_v20 = vsel %vm5650_vm4, 4294967295, %v7108_v20  ;;  %7112 = vst [vmem:[#allocation64_spill] sm:$0xff] %v5655_v12  ;;  %v425_v16 = vadd.s32 208, %v4977_v3  ;;  %v428_v14 = vadd.s32 232, %v4977_v3  ;;  %4683 = vmatprep.mubr.msk.bf16.mxu0 %vm7113_vm3, %v2034_v13  ;;  %v2015_v9 = vsel %vm5632_vm15, %v5637_v25, 0.0 }
  0x7f   : > { %7110 = vst [vmem:[#allocation63_spill] sm:$0xff] %v7109_v20  ;;  %vm5663_vm6 = vcmp.ge.s32.totalorder %v830_v53, 1  ;;  %v7114_v61 = vmov 0  ;;  %vm7117_vm0 = vmmov %vm7111_vm11  ;;  %v427_v15 = vadd.s32 224, %v4977_v3  ;;  %v2017_v29 = vsel %vm5642_vm2, %v5647_v62, 0.0  ;;  %4646 = vmatmul.mubr.msk.bf16.gmra.mxu1 %vm7113_vm3, %v1179_v28 }
  0x80   : > { %v7115_v61 = vsel %vm5663_vm6, 4294967295, %v7114_v61  ;;  %v5668_v0 = vsel %vm7117_vm0, %v1942_v42, %v1944_v24  ;;  %v851_v58 = vand.u32 15, %v426_v22  ;;  %v1948_v13 = vrot.slane %v5216_v63, 2  ;;  %vm7119_vm11 = vmmov %vm7113_vm3 }
  0x81   : > { %7116 = vst [vmem:[#allocation65_spill] sm:$0xff] %v7115_v61  ;;  %7118 = vst [vmem:[#allocation66_spill] sm:$0xff] %v5668_v0  ;;  %v1950_v35 = vrot.slane %v5242_v44, 2  ;;  %v865_v53 = vand.u32 15, %v428_v14  ;;  %v1952_v26 = vrot.slane %v5245_v41, 2  ;;  %v1954_v25 = vrot.slane %v5275_v38, 2  ;;  %4649 = vmatprep.mubr.msk.bf16.mxu1 %vm7119_vm11, %v1180_v32 }
  0x82   : > { %v1160_v42 = vsel %vm5650_vm4, %v5146_v37, 0.0  ;;  %v2035_v24 = vpack.c.bf16 %v2015_v9, %v5655_v12  ;;  %v844_v22 = vand.u32 15, %v425_v16  ;;  %v1162_v21 = vsel %vm5663_vm6, %v5169_v52, 0.0  ;;  %v7214_v12 = vld [vmem:[#allocation20_spill] sm:$0xff] }
  0x83   : > { %v2036_v28 = vpack.c.bf16 %v2017_v29, %v5668_v0  ;;  %v858_v14 = vand.u32 15, %v427_v15  ;;  %vm5688_vm0 = vcmp.le.s32.totalorder %v851_v58, 14  ;;  %v7120_v62 = vmov 0 }
  0x84   : > { %v7121_v62 = vsel %vm5688_vm0, 4294967295, %v7120_v62  ;;  %vm7123_vm3 = vcmask 1045504   ;;  %v430_v20 = vadd.s32 248, %v4977_v3  ;;  %v1181_v33 = vpack.c.bf16 %v5150_v40, %v1160_v42 }
  0x85   : > { %7122 = vst [vmem:[#allocation67_spill] sm:$0xff] %v7121_v62  ;;  %v5693_v32 = vsel %vm7123_vm3, %v1948_v13, %v1950_v35  ;;  %vm5697_vm11 = vcmp.le.s32.totalorder %v865_v53, 14  ;;  %v7125_v16 = vmov 0  ;;  %vm7127_vm2 = vmmov %vm7123_vm3  ;;  %vm7129_vm15 = vcmask 64512  }
  0x86   : > { %7124 = vst [vmem:[#allocation68_spill] sm:$0xff] %v5693_v32  ;;  %v7126_v16 = vsel %vm5697_vm11, 4294967295, %v7125_v16  ;;  %v5702_v9 = vsel %vm7127_vm2, %v1952_v26, %v1954_v25  ;;  %4684 = vmatmul.mubr.msk.bf16.gmra.mxu0 %vm7129_vm15, %v2035_v24  ;;  %v1182_v15 = vpack.c.bf16 %v5174_v27, %v1162_v21  ;;  %vm5706_vm6 = vcmp.ge.s32.totalorder %v844_v22, 1  ;;  %vm7133_vm3 = vmmov %vm7127_vm2 }
  0x87   : > { %7128 = vst [vmem:[#allocation69_spill] sm:$0xff] %v5702_v9  ;;  %v7130_v29 = vmov 0  ;;  %v5711_v58 = vsel %vm7133_vm3, %v1946_v4, %v1948_v13  ;;  %vm7135_vm4 = vmmov %vm7129_vm15  ;;  %v2019_v53 = vsel %vm5688_vm0, %v5693_v32, 0.0  ;;  %vm5717_vm13 = vcmp.ge.s32.totalorder %v858_v14, 1  ;;  %v7213_v32 = vld [vmem:[#allocation17_spill] sm:$0xff] }
  0x88   : > { %v7131_v29 = vsel %vm5706_vm6, 4294967295, %v7130_v29  ;;  %7134 = vst [vmem:[#allocation71_spill] sm:$0xff] %v5711_v58  ;;  %4687 = vmatprep.mubr.msk.bf16.mxu0 %vm7135_vm4, %v2036_v28  ;;  %vm7138_vm15 = vmmov %vm7127_vm2  ;;  %v429_v21 = vadd.s32 240, %v4977_v3  ;;  %v2021_v4 = vsel %vm5697_vm11, %v5702_v9, 0.0  ;;  %v879_v13 = vand.u32 15, %v430_v20  ;;  %4650 = vmatmul.mubr.msk.bf16.gmra.mxu1 %vm7135_vm4, %v1181_v33 }
  0x89   : > { %7132 = vst [vmem:[#allocation70_spill] sm:$0xff] %v7131_v29  ;;  %v5722_v24 = vsel %vm7138_vm15, %v1950_v35, %v1952_v26  ;;  %v1956_v22 = vrot.slane %v5289_v60, 2  ;;  %vm7140_vm2 = vmmov %vm7135_vm4  ;;  %v1164_v35 = vsel %vm5706_vm6, %v5209_v31, 0.0  ;;  %v2037_v26 = vpack.c.bf16 %v2019_v53, %v5711_v58 }
  0x8a   : > { %7139 = vst [vmem:[#allocation72_spill] sm:$0xff] %v5722_v24  ;;  %4653 = vmatprep.mubr.msk.bf16.mxu1 %vm7140_vm2, %v1182_v15  ;;  %v1166_v14 = vsel %vm5717_vm13, %v5242_v44, 0.0  ;;  %v2038_v20 = vpack.c.bf16 %v2021_v4, %v5722_v24  ;;  %v872_v62 = vand.u32 15, %v429_v21  ;;  %vm5740_vm3 = vcmp.le.s32.totalorder %v879_v13, 14  ;;  %vm7146_vm4 = vmmov %vm7140_vm2  ;;  %v7204_v24 = vld [vmem:[#allocation6_spill] sm:$0xff]  ;;  %v7333_v21 = vld [vmem:[#allocation28_spill] sm:$0xff] }
  0x8b   : > { %v7141_v28 = vmov 0  ;;  %v7144_v33 = vrot.slane %v5293_v46, 2  ;;  %v662_v9 = vand.u32 15, %v4977_v3  ;;  %v1183_v53 = vpack.c.bf16 %v5216_v63, %v1164_v35  ;;  %vm7149_vm11 = vmmov %vm7138_vm15  ;;  %v233_v35 = vld [vmem:[%s5002_s26 + $0x88] sm:$0xf] }
  0x8c   : > { %v7142_v28 = vsel %vm5740_vm3, 4294967295, %v7141_v28  ;;  %v1184_v58 = vpack.c.bf16 %v5245_v41, %v1166_v14  ;;  %vm5754_vm0 = vcmp.ge.s32.totalorder %v872_v62, 1  ;;  %v5759_v4 = vsel %vm7149_vm11, %v1954_v25, %v1956_v22  ;;  %vm7154_vm11 = vmmov %vm7140_vm2 }
  0x8d   : > { %7143 = vst [vmem:[#allocation73_spill] sm:$0xff] %v7142_v28  ;;  %v5747_v15 = vsel %vm7138_vm15, %v1956_v22, %v7144_v33  ;;  %7150 = vst [vmem:[#allocation75_spill] sm:$0xff] %v5759_v4  ;;  %vm5764_vm15 = vcmp.ge.s32.totalorder %v662_v9, 1  ;;  %v1168_v25 = vsel %vm5754_vm0, %v5275_v38, 0.0  ;;  %v270_v14 = vunpack.c.l.bf16 %v233_v35  ;;  %v7187_v28 = vld [vmem:[#allocation23_spill] sm:$0xff] }
  0x8e   : > { %7145 = vst [vmem:[#allocation74_spill] sm:$0xff] %v5747_v15  ;;  %4688 = vmatmul.mubr.msk.bf16.gmra.mxu0 %vm7146_vm4, %v2037_v26  ;;  %v2023_v13 = vsel %vm5740_vm3, %v5747_v15, 0.0  ;;  %v2808_v26 = vsel %vm5280_vm5, %v5325_v43, 0.0  ;;  %vm7153_vm4 = vmmov %vm7140_vm2  ;;  %v2286_v22 = vsel %vm5764_vm15, %v5069_v57, 0.0  ;;  %v2812_v43 = vsel %vm5373_vm9, %v5386_v7, 0.0 }
  0x8f   : > { %4691 = vmatprep.mubr.msk.bf16.mxu0 %vm7140_vm2, %v2038_v20  ;;  %v5774_v62 = vpack.c.bf16 %v2808_v26, %v5332_v6  ;;  %v2039_v9 = vpack.c.bf16 %v2023_v13, %v5759_v4  ;;  %v5788_v6 = vpack.c.bf16 %v2812_v43, %v5394_v36  ;;  %v4423_v20 = vunpack.c.h.bf16 %v5236_v8  ;;  %v4923_v57 = vld [vmem:[%s6795_s2] ss:$0 sm:$0xff]  ;;  %vm7157_vm9 = vmmov %vm7140_vm2  ;;  %v7202_v4 = vld [vmem:[#allocation57_spill] sm:$0xff] }
  0x90   : > { %4654 = vmatmul.mubr.msk.bf16.gmra.mxu1 %vm7153_vm4, %v1183_v53  ;;  %v2318_v53 = vpack.c.bf16 %v5049_v49, %v2286_v22  ;;  %vm7155_vm4 = vmmov %vm7140_vm2  ;;  %v314_v13 = vmul.f32 %v4923_v57, %v270_v14  ;;  %v2288_v8 = vsel %vm5317_vm7, %v5065_v56, 0.0  ;;  %v2290_v49 = vsel %vm5334_vm8, %v5127_v19, 0.0  ;;  %v5817_v14 = vld [vmem:[%s6794_s1 + $0x20] sm:$0xf] }
  0x91   : > { %4657 = vmatprep.mubr.msk.bf16.mxu1 %vm7154_vm11, %v1184_v58  ;;  %v1185_v58 = vpack.c.bf16 %v5289_v60, %v1168_v25  ;;  %vm7156_vm11 = vmmov %vm7140_vm2  ;;  %v313_v7 = vmul.f32 %v4923_v57, %v4423_v20  ;;  %v433_v26 = vadd.s32 272, %v4977_v3  ;;  %v7159_v25 = vld [vmem:[#allocation5_spill] sm:$0xff]  ;;  %v7160_v43 = vld [vmem:[#allocation10_spill] sm:$0xff]  ;;  %v3101_v42 = vsel %vm5764_vm15, %v5065_v56, 0.0 }
  0x92   : > { %vm7228_vm15 = vnez %v7126_v16  ;;  %v3107_v11 = vsel %vm5381_vm10, %v5188_v10, 0.0 }
  0x96   : > { %4692 = vmatmul.mubr.msk.bf16.gmra.mxu0 %vm7140_vm2, %v2039_v9  ;;  %vm7158_vm2 = vcmask 1043456   ;;  %v2319_v9 = vpack.c.bf16 %v7159_v25, %v2288_v8  ;;  %v2294_v8 = vsel %vm5431_vm12, %v5188_v10, 0.0 }
  0x97   : > { %4731 = vmatprep.mubr.msk.bf16.mxu0 %vm7155_vm4, %v5110_v47  ;;  %v4924_v47 = vld [vmem:[%s6796_s3] ss:$0 sm:$0xff]  ;;  %v3200_v35 = vsel %vm7158_vm2, %v5414_v5, 0  ;;  %v7163_v5 = vld [vmem:[#allocation12_spill] sm:$0xff] }
  0x98   : > { %4658 = vmatmul.mubr.msk.bf16.gmra.mxu1 %vm7156_vm11, %v1185_v58  ;;  %v358_v36 = vadd.f32 %v4924_v47, %v314_v13  ;;  %v357_v22 = vadd.f32 %v4924_v47, %v313_v7  ;;  %v2320_v58 = vpack.c.bf16 %v5132_v23, %v2290_v49  ;;  %v2292_v13 = vsel %vm5381_vm10, %v5155_v48, 0.0  ;;  %v7250_v7 = vld [vmem:[#allocation32_spill] sm:$0xff] }
  0x99   : > { %4697 = vmatprep.mubr.msk.bf16.mxu1 %vm7157_vm9, %v2318_v53  ;;  %vm7161_vm9 = vmmov %vm7155_vm4  ;;  %v5829_v53 = vld [vmem:[%s6794_s1 + $0x1c] sm:$0xf]  ;;  %v3129_v47 = vsel %vm5717_vm13, %v5293_v46, 0.0 }
  0x9a   : > { %vm7162_vm4 = vmmov %vm7158_vm2  ;;  %v395_v3 = vmax.f32 %v358_v36, 0.0  ;;  %vm507_vm2 = vcmp.lt.s32.totalorder %v433_v26, 273  ;;  %v5834_v57 = vmax.f32 %v357_v22, 0.0  ;;  %v7172_v22 = vld [vmem:[#allocation9_spill] sm:$0xff] }
  0x9b   : > { %v2906_v20 = vsel %vm7162_vm4, %v5439_v18, 0  ;;  %vm7164_vm11 = vmmov %vm7161_vm9 }
  0x9c   : > { %vm7165_vm5 = vmmov %vm7162_vm4  ;;  %v5843_v49 = vsel %vm507_vm2, %v395_v3, 0.0  ;;  %v2801_v36 = vrot.slane %v5834_v57, 2 }
  0x9d   : > { %vm7166_vm4 = vmmov %vm7161_vm9  ;;  %7169 = vst [vmem:[#allocation5_spill] sm:$0xff] %v5843_v49  ;;  %v6963_v26 = vrot.slane %v5843_v49, 2 }
  0x9e   : > { %4732 = vmatmul.mubr.msk.bf16.vlgmr.msra.gmra.mxu0 %vm7161_vm9, %v7160_v43  ;;  %vm7176_vm2 = vmmov %vm7166_vm4  ;;  %v2322_v43 = vpack.c.bf16 %v5192_v1, %v2294_v8  ;;  %v7183_v8 = vld [vmem:[#allocation15_spill] sm:$0xff] }
  0x9f   : > { %4798 = vmatpush3.bf16.msra.mxu0 %v3200_v35  ;;  %4735 = vmatprep.mubr.msk.bf16.mxu0 %vm7164_vm11, %v7163_v5  ;;  %vm7170_vm11 = vmmov %vm7165_vm5  ;;  %v5852_v35 = vpack.c.bf16 %v5834_v57, %v3129_v47  ;;  %v7175_v5 = vld [vmem:[#allocation16_spill] sm:$0xff] }
  0xa0   : > { %4910 = vmatprep.subr.msk.bf16.mxu0 %vm7165_vm5, %v5817_v14  ;;  %4698 = vmatmul.mubr.msk.bf16.vlgmr.msra.gmra.mxu1 %vm7161_vm9, %v2319_v9  ;;  %vm7174_vm5 = vcmask 1045504   ;;  %v7262_v9 = vld [vmem:[#allocation41_spill] sm:$0xff] }
  0xa1   : > { %4764 = vmatpush3.bf16.msra.mxu1 %v2906_v20  ;;  %4701 = vmatprep.mubr.msk.bf16.mxu1 %vm7166_vm4, %v2320_v58  ;;  %7171 = vst [vmem:[#allocation29_spill] sm:$0xff] %v5852_v35  ;;  %v2321_v58 = vpack.c.bf16 %v7172_v22, %v2292_v13  ;;  %v7173_v20 = vrot.slane %v5293_v46, 2  ;;  %vm7177_vm9 = vmmov %vm7174_vm5 }
  0xa2   : > { %4909 = vmatprep.subr.msk.bf16.mxu1 %vm7170_vm11, %v5829_v53  ;;  %v5870_v47 = vsel %vm7177_vm9, %v2801_v36, %v6963_v26  ;;  %vm7179_vm4 = vmmov %vm7176_vm2  ;;  %v2298_v26 = vsel %vm5486_vm1, %v5260_v45, 0.0 }
  0xa3   : > { %v5862_v3 = vsel %vm7174_vm5, %v7173_v20, %v2801_v36  ;;  %v2838_v13 = vsel %vm5740_vm3, %v5870_v47, 0.0  ;;  %vm7181_vm11 = vmmov %vm7176_vm2 }
  0xa4   : > { %v5878_v20 = vpack.c.bf16 %v2838_v13, %v5862_v3  ;;  %vm7182_vm5 = vmmov %vm7176_vm2  ;;  %v2324_v13 = vpack.c.bf16 %v5263_v30, %v2298_v26 }
  0xa5   : > { %vm7188_vm9 = vmmov %vm7176_vm2 }
  0xa6   : > { %4736 = vmatmul.mubr.msk.bf16.gmra.mxu0 %vm7176_vm2, %v7175_v5  ;;  %7180 = vst [vmem:[#allocation34_spill] sm:$0xff] %v5878_v20  ;;  %v2296_v5 = vsel %vm5460_vm14, %v7183_v8, 0.0  ;;  %v7194_v20 = vld [vmem:[#allocation4_spill] sm:$0xff] }
  0xa7   : > { %4739 = vmatprep.mubr.msk.bf16.mxu0 %vm7179_vm4, %v7178_v2  ;;  %v2323_v2 = vpack.c.bf16 %v5240_v39, %v2296_v5  ;;  %vm7189_vm4 = vmmov %vm7176_vm2 }
  0xa8   : > { %4702 = vmatmul.mubr.msk.bf16.gmra.mxu1 %vm7181_vm11, %v2321_v58  ;;  %vm7190_vm11 = vmmov %vm7176_vm2  ;;  %v7192_v58 = vld [vmem:[#allocation47_spill] sm:$0xff] }
  0xa9   : > { %4705 = vmatprep.mubr.msk.bf16.mxu1 %vm7182_vm5, %v2322_v43  ;;  %vm7191_vm5 = vnez %v7062_v59  ;;  %vm7193_vm3 = vnez %v7192_v58 }
  0xaa   : > { %v2300_v43 = vsel %vm7191_vm5, %v5051_v50, 0.0  ;;  %v2302_v5 = vsel %vm7193_vm3, %v5061_v54, 0.0  ;;  %vm7203_vm3 = vnez %v7202_v4 }
  0xab   : > { %v2325_v35 = vpack.c.bf16 %v7194_v20, %v2300_v43  ;;  %v2326_v26 = vpack.c.bf16 %v5063_v55, %v2302_v5  ;;  %v2306_v43 = vsel %vm7203_vm3, %v5146_v37, 0.0 }
  0xac   : > { %v2328_v5 = vpack.c.bf16 %v5150_v40, %v2306_v43 }
  0xae   : > { %4740 = vmatmul.mubr.msk.bf16.gmra.mxu0 %vm7176_vm2, %v7186_v51  ;;  %v7195_v51 = vld [vmem:[#allocation7_spill] sm:$0xff] }
  0xaf   : > { %4743 = vmatprep.mubr.msk.bf16.mxu0 %vm7188_vm9, %v7187_v28  ;;  %v7196_v28 = vld [vmem:[#allocation8_spill] sm:$0xff]  ;;  %vm7197_vm9 = vmmov %vm7176_vm2 }
  0xb0   : > { %4706 = vmatmul.mubr.msk.bf16.gmra.mxu1 %vm7189_vm4, %v2323_v2  ;;  %vm7198_vm4 = vmmov %vm7176_vm2  ;;  %v7200_v2 = vld [vmem:[#allocation55_spill] sm:$0xff] }
  0xb1   : > { %4709 = vmatprep.mubr.msk.bf16.mxu1 %vm7190_vm11, %v2324_v13  ;;  %vm7199_vm11 = vmmov %vm7176_vm2  ;;  %vm7201_vm5 = vnez %v7200_v2 }
  0xb2   : > { %v2304_v13 = vsel %vm7201_vm5, %v5093_v34, 0.0  ;;  %vm7212_vm5 = vnez %v7115_v61  ;;  %v7218_v61 = vld [vmem:[#allocation25_spill] sm:$0xff] }
  0xb3   : > { %v2327_v15 = vpack.c.bf16 %v7204_v24, %v2304_v13  ;;  %v2310_v13 = vsel %vm7212_vm5, %v5209_v31, 0.0 }
  0xb6   : > { %4744 = vmatmul.mubr.msk.bf16.gmra.mxu0 %vm7176_vm2, %v7195_v51  ;;  %v7205_v51 = vld [vmem:[#allocation11_spill] sm:$0xff] }
  0xb7   : > { %4747 = vmatprep.mubr.msk.bf16.mxu0 %vm7197_vm9, %v7196_v28  ;;  %v7206_v28 = vld [vmem:[#allocation13_spill] sm:$0xff]  ;;  %vm7207_vm9 = vmmov %vm7176_vm2 }
  0xb8   : > { %4710 = vmatmul.mubr.msk.bf16.gmra.mxu1 %vm7198_vm4, %v2325_v35  ;;  %v2580_v35 = vpack.c.bf16 %v5834_v57, %v5293_v46  ;;  %vm7208_vm4 = vmmov %vm7176_vm2 }
  0xb9   : > { %4713 = vmatprep.mubr.msk.bf16.mxu1 %vm7199_vm11, %v2326_v26  ;;  %vm7209_vm11 = vmmov %vm7176_vm2  ;;  %v7210_v26 = vld [vmem:[#allocation63_spill] sm:$0xff] }
  0xba   : > { %vm7211_vm3 = vnez %v7210_v26  ;;  %v7221_v26 = vld [vmem:[#allocation24_spill] sm:$0xff] }
  0xbb   : > { %v2308_v0 = vsel %vm7211_vm3, %v5169_v52, 0.0 }
  0xbc   : > { %v2329_v43 = vpack.c.bf16 %v5174_v27, %v2308_v0  ;;  %v2312_v0 = vsel %vm5706_vm6, %v5242_v44, 0.0 }
  0xbe   : > { %4748 = vmatmul.mubr.msk.bf16.gmra.mxu0 %vm7176_vm2, %v7205_v51  ;;  %v2585_v51 = vshll.u32 %v2580_v35, 16 }
  0xbf   : > { %4751 = vmatprep.mubr.msk.bf16.mxu0 %vm7207_vm9, %v7206_v28  ;;  %v2330_v28 = vpack.c.bf16 %v5216_v63, %v2310_v13  ;;  %vm7215_vm9 = vmmov %vm7176_vm2  ;;  %v2589_v13 = vshrl.u32 %v2580_v35, 16  ;;  %v7223_v35 = vmov 0.0  }
  0xc0   : > { %4714 = vmatmul.mubr.msk.bf16.gmra.mxu1 %vm7208_vm4, %v2327_v15  ;;  %v2581_v15 = vpack.c.bf16 %v5843_v49, %v5843_v49  ;;  %vm7216_vm4 = vmmov %vm7176_vm2 }
  0xc1   : > { %4717 = vmatprep.mubr.msk.bf16.mxu1 %vm7209_vm11, %v2328_v5  ;;  %v2587_v5 = vrot.slane %v2585_v51, 1  ;;  %vm7217_vm11 = vmmov %vm7176_vm2  ;;  %v2331_v51 = vpack.c.bf16 %v5245_v41, %v2312_v0  ;;  %v3651_v0 = vsel %vm7228_vm15, %v5870_v47, 0.0  ;;  %v7235_v47 = vld [vmem:[#allocation21_spill] sm:$0xff] }
  0xc2   : > { %v2593_v63 = vshll.u32 %v2581_v15, 16 }
  0xc4   : > { %v2595_v29 = vrot.slane %v2593_v63, 1 }
  0xc6   : > { %4752 = vmatmul.mubr.msk.bf16.gmra.mxu0 %vm7176_vm2, %v7213_v32  ;;  %v2314_v32 = vsel %vm5717_vm13, %v5275_v38, 0.0  ;;  %vm7219_vm2 = vsmask.f32 7424  ;;  %vm7225_vm13 = vmmov %vm7216_vm4 }
  0xc7   : > { %4755 = vmatprep.mubr.msk.bf16.mxu0 %vm7215_vm9, %v7214_v12  ;;  %v5950_v12 = vsel %vm7219_vm2, %v7218_v61, %v2587_v5  ;;  %vm7222_vm9 = vmmov %vm7216_vm4  ;;  %v5963_v61 = vpack.c.bf16 %v7223_v35, %v5843_v49 }
  0xc8   : > { %4718 = vmatmul.mubr.msk.bf16.gmra.mxu1 %vm7216_vm4, %v2329_v43  ;;  %7220 = vst [vmem:[#allocation9_spill] sm:$0xff] %v5950_v12  ;;  %v2591_v43 = vor.u32 %v2589_v13, %v2587_v5  ;;  %v3133_v5 = vpack.c.bf16 %v7159_v25, %v3101_v42  ;;  %v5981_v13 = vpack.c.bf16 %v3651_v0, %v5862_v3  ;;  %v3105_v25 = vsel %vm5334_vm8, %v5155_v48, 0.0  ;;  %v7247_v42 = vld [vmem:[#allocation39_spill] sm:$0xff] }
  0xc9   : > { %4721 = vmatprep.mubr.msk.bf16.mxu1 %vm7217_vm11, %v2330_v28  ;;  %v2332_v28 = vpack.c.bf16 %v5289_v60, %v2314_v32  ;;  %7224 = vst [vmem:[#allocation15_spill] sm:$0xff] %v5963_v61  ;;  %vm7226_vm11 = vmmov %vm7216_vm4  ;;  %v2316_v32 = vsel %vm5754_vm0, %v5293_v46, 0.0  ;;  %v3400_v15 = vshll.u32 %v5963_v61, 16  ;;  %v3103_v46 = vsel %vm5317_vm7, %v5127_v19, 0.0 }
  0xca   : > { %v2596_v63 = vsel %vm7219_vm2, %v2591_v43, %v2595_v29  ;;  %v2333_v56 = vpack.c.bf16 %v5834_v57, %v2316_v32  ;;  %7230 = vst [vmem:[#allocation40_spill] sm:$0xff] %v5981_v13  ;;  %v7234_v57 = vld [vmem:[#allocation27_spill] sm:$0xff]  ;;  %v3134_v17 = vpack.c.bf16 %v5132_v23, %v3103_v46  ;;  %v3135_v19 = vpack.c.bf16 %v7172_v22, %v3105_v25  ;;  %v7259_v46 = vld [vmem:[#allocation45_spill] sm:$0xff] }
  0xcb   : > { %v5973_v33 = vrot.slane %v3400_v15, 1  ;;  %vm7238_vm7 = vcmask 1043456   ;;  %v3109_v23 = vsel %vm5431_vm12, %v7183_v8, 0.0  ;;  %v3136_v22 = vpack.c.bf16 %v5192_v1, %v3107_v11  ;;  %v7248_v32 = vld [vmem:[#allocation35_spill] sm:$0xff]  ;;  %v7252_v15 = vld [vmem:[#allocation37_spill] sm:$0xff] }
  0xcc   : > { %vm7240_vm8 = vmmov %vm7238_vm7  ;;  %v3137_v18 = vpack.c.bf16 %v5240_v39, %v3109_v23  ;;  %v3113_v1 = vsel %vm5486_vm1, %v5051_v50, 0.0  ;;  %v7256_v39 = vld [vmem:[#allocation42_spill] sm:$0xff]  ;;  %v7260_v25 = vld [vmem:[#allocation43_spill] sm:$0xff] }
  0xcd   : > { %7227 = vst [vmem:[#allocation36_spill] sm:$0xff] %v5973_v33  ;;  %v3419_v48 = vsel %vm7240_vm8, %v5829_v53, 0  ;;  %v7264_v50 = vld [vmem:[#allocation46_spill] sm:$0xff] }
  0xce   : > { %4756 = vmatmul.mubr.msk.bf16.gmra.mxu0 %vm7222_vm9, %v7221_v26  ;;  %vm7229_vm9 = vmmov %vm7216_vm4 }
  0xcf   : > { %4759 = vmatprep.mubr.msk.bf16.mxu0 %vm7216_vm4, %v5950_v12 }
  0xd0   : > { %4722 = vmatmul.mubr.msk.bf16.gmra.mxu1 %vm7225_vm13, %v2331_v51  ;;  %vm7231_vm13 = vmmov %vm7219_vm2  ;;  %vm7236_vm2 = vnez %v7235_v47  ;;  %v3721_v51 = vsel %vm7238_vm7, %v5817_v14, 0  ;;  %v7245_v14 = vld [vmem:[#allocation30_spill] sm:$0xff]  ;;  %vm7249_vm7 = vnez %v7248_v32 }
  0xd1   : > { %4725 = vmatprep.mubr.msk.bf16.mxu1 %vm7226_vm11, %v2332_v28  ;;  %v5989_v29 = vsel %vm7231_vm13, %v2591_v43, %v5973_v33  ;;  %vm7233_vm11 = vmmov %vm7216_vm4  ;;  %v2810_v3 = vsel %vm7236_vm2, %v7234_v57, 0.0  ;;  %v7239_v28 = vld [vmem:[#allocation26_spill] sm:$0xff]  ;;  %v2816_v10 = vsel %vm7249_vm7, %v7247_v42, 0.0  ;;  %v7308_v33 = vld [vmem:[#allocation71_spill] sm:$0xff] }
  0xd2   : > { %7232 = vst [vmem:[#allocation47_spill] sm:$0xff] %v5989_v29  ;;  %v2840_v43 = vpack.c.bf16 %v2810_v3, %v7239_v28  ;;  %vm7241_vm13 = vmmov %vm7216_vm4 }
  0xd3   : > { %vm7243_vm2 = vmmov %vm7216_vm4 }
  0xd4   : > { %vm7251_vm10 = vmmov %vm7243_vm2 }
  0xd5   : > { %vm7253_vm12 = vmmov %vm7243_vm2 }
  0xd6   : > { %4760 = vmatmul.mubr.msk.bf16.gmra.mxu0 %vm7229_vm9, %v2596_v63  ;;  %vm7237_vm9 = vmmov %vm7216_vm4  ;;  %v2843_v63 = vpack.c.bf16 %v2816_v10, %v7252_v15 }
  0xd7   : > { %4799 = vmatprep.mubr.msk.bf16.mxu0 %vm7216_vm4, %v3133_v5  ;;  %vm7255_vm8 = vmmov %vm7243_vm2  ;;  %v7257_v5 = vld [vmem:[#allocation38_spill] sm:$0xff] }
  0xd8   : > { %4726 = vmatmul.mubr.msk.bf16.gmra.mxu1 %vm7233_vm11, %v2333_v56  ;;  %vm7242_vm11 = vmmov %vm7216_vm4 }
  0xd9   : > { %4765 = vmatprep.mubr.msk.bf16.mxu1 %vm7237_vm9, %v5774_v62  ;;  %v7244_v62 = vld [vmem:[#allocation33_spill] sm:$0xff]  ;;  %vm7246_vm9 = vnez %v7245_v14  ;;  %vm7265_vm1 = vmmov %vm7243_vm2 }
  0xda   : > { %v2814_v53 = vsel %vm7246_vm9, %v7244_v62, 0.0 }
  0xdb   : > { %v2842_v8 = vpack.c.bf16 %v2814_v53, %v7250_v7 }
  0xde   : > { %4800 = vmatmul.mubr.msk.bf16.vlgmr.msra.gmra.mxu0 %vm7216_vm4, %v3134_v17  ;;  %vm7254_vm4 = vmmov %vm7243_vm2 }
  0xdf   : > { %4866 = vmatpush3.bf16.msra.mxu0 %v3721_v51  ;;  %4803 = vmatprep.mubr.msk.bf16.mxu0 %vm7241_vm13, %v3135_v19  ;;  %vm7258_vm13 = vnez %v7257_v5  ;;  %v7271_v51 = vld [vmem:[#allocation44_spill] sm:$0xff]  ;;  %v7353_v5 = vld [vmem:[#allocation22_spill] sm:$0xff] }
  0xe0   : > { %4766 = vmatmul.mubr.msk.bf16.vlgmr.msra.gmra.mxu1 %vm7242_vm11, %v2840_v43  ;;  %v2818_v56 = vsel %vm7258_vm13, %v7256_v39, 0.0  ;;  %vm7261_vm11 = vnez %v7260_v25 }
  0xe1   : > { %4832 = vmatpush3.bf16.msra.mxu1 %v3419_v48  ;;  %4769 = vmatprep.mubr.msk.bf16.mxu1 %vm7243_vm2, %v5788_v6  ;;  %v3111_v6 = vsel %vm5460_vm14, %v5260_v45, 0.0  ;;  %v2820_v47 = vsel %vm7261_vm11, %v7259_v46, 0.0  ;;  %v3139_v45 = vpack.c.bf16 %v7194_v20, %v3113_v1  ;;  %v2844_v3 = vpack.c.bf16 %v2818_v56, %v7262_v9  ;;  %vm7263_vm14 = vmmov %vm7243_vm2  ;;  %v7270_v20 = vld [vmem:[#allocation50_spill] sm:$0xff]  ;;  %v7284_v56 = vld [vmem:[#allocation51_spill] sm:$0xff] }
  0xe2   : > { %v3138_v0 = vpack.c.bf16 %v5263_v30, %v3111_v6  ;;  %v2845_v36 = vpack.c.bf16 %v2820_v47, %v7264_v50  ;;  %vm7266_vm2 = vnez %v7062_v59  ;;  %v7273_v59 = vld [vmem:[#allocation52_spill] sm:$0xff]  ;;  %v7283_v1 = vld [vmem:[#allocation54_spill] sm:$0xff] }
  0xe3   : > { %v3115_v30 = vsel %vm7266_vm2, %v5061_v54, 0.0  ;;  %v7274_v54 = vld [vmem:[#allocation48_spill] sm:$0xff]  ;;  %vm7278_vm2 = vmmov %vm7265_vm1 }
  0xe4   : > { %v6049_v17 = vpop.f32.mrf.mxu0  ;;  %v3140_v48 = vpack.c.bf16 %v5063_v55, %v3115_v30 }
  0xe6   : > { %4804 = vmatmul.mubr.msk.bf16.gmra.mxu0 %vm7251_vm10, %v3136_v22  ;;  %vm7267_vm10 = vnez %v7192_v58  ;;  %v6066_v23 = vpop.f32.mrf.mxu0  ;;  %v7276_v58 = vld [vmem:[#allocation49_spill] sm:$0xff] }
  0xe7   : > { %4807 = vmatprep.mubr.msk.bf16.mxu0 %vm7253_vm12, %v3137_v18  ;;  %v3117_v19 = vsel %vm7267_vm10, %v5093_v34, 0.0  ;;  %vm7268_vm12 = vmmov %vm7265_vm1  ;;  %v7277_v18 = vld [vmem:[#allocation56_spill] sm:$0xff]  ;;  %vm7279_vm10 = vnez %v7200_v2 }
  0xe8   : > { %4770 = vmatmul.mubr.msk.bf16.gmra.mxu1 %vm7254_vm4, %v2842_v8  ;;  %vm7269_vm4 = vmmov %vm7265_vm1  ;;  %v3141_v34 = vpack.c.bf16 %v7204_v24, %v3117_v19  ;;  %v3119_v55 = vsel %vm7279_vm10, %v5146_v37, 0.0  ;;  %v7286_v2 = vld [vmem:[#allocation60_spill] sm:$0xff]  ;;  %v7287_v37 = vld [vmem:[#allocation53_spill] sm:$0xff] }
  0xe9   : > { %4773 = vmatprep.mubr.msk.bf16.mxu1 %vm7255_vm8, %v2843_v63  ;;  %vm7272_vm8 = vnez %v7271_v51  ;;  %v6064_v11 = vpop.f32.mrf.mxu1  ;;  %v6077_v63 = vpop.f32.mrf.mxu0  ;;  %v3142_v47 = vpack.c.bf16 %v5150_v40, %v3119_v55  ;;  %v7292_v19 = vld [vmem:[#allocation64_spill] sm:$0xff]  ;;  %v7299_v55 = vld [vmem:[#allocation59_spill] sm:$0xff]  ;;  %v7304_v40 = vld [vmem:[#allocation61_spill] sm:$0xff] }
  0xea   : > { %v2822_v43 = vsel %vm7272_vm8, %v7270_v20, 0.0  ;;  %v7360_v51 = vld [vmem:[#allocation7_spill] sm:$0xff] }
  0xeb   : > { %v2846_v22 = vpack.c.bf16 %v2822_v43, %v7276_v58  ;;  %v6073_v10 = vpop.f32.mrf.mxu1 }
  0xed   : > { %v6087_v6 = vpop.f32.mrf.mxu1 }
  0xee   : > { %4808 = vmatmul.mubr.msk.bf16.gmra.mxu0 %vm7263_vm14, %v3138_v0  ;;  %vm7275_vm14 = vnez %v7274_v54 }
  0xef   : > { %4811 = vmatprep.mubr.msk.bf16.mxu0 %vm7265_vm1, %v3139_v45  ;;  %v2824_v53 = vsel %vm7275_vm14, %v7273_v59, 0.0  ;;  %vm7282_vm14 = vmmov %vm7265_vm1  ;;  %v6094_v45 = vpop.f32.mrf.mxu0  ;;  %v6101_v30 = vpop.f32.mrf.mxu1 }
  0xf0   : > { %4774 = vmatmul.mubr.msk.bf16.gmra.mxu1 %vm7268_vm12, %v2844_v3  ;;  %v2847_v8 = vpack.c.bf16 %v2824_v53, %v7277_v18  ;;  %vm7280_vm12 = vnez %v7202_v4  ;;  %v7289_v4 = vld [vmem:[#allocation58_spill] sm:$0xff]  ;;  %7290 = vst [vmem:[#allocation4_spill] sm:$0xff] %v6101_v30  ;;  %v3123_v53 = vsel %vm7211_vm3, %v5209_v31, 0.0  ;;  %v7303_v31 = vld [vmem:[#allocation68_spill] sm:$0xff]  ;;  %vm7305_vm3 = vnez %v7304_v40 }
  0xf1   : > { %4777 = vmatprep.mubr.msk.bf16.mxu1 %vm7269_vm4, %v2845_v36  ;;  %v3121_v24 = vsel %vm7280_vm12, %v5169_v52, 0.0  ;;  %vm7281_vm4 = vmmov %vm7265_vm1 }
  0xf2   : > { %v3143_v52 = vpack.c.bf16 %v5174_v27, %v3121_v24  ;;  %vm7291_vm10 = vmmov %vm7281_vm4  ;;  %v3125_v27 = vsel %vm7212_vm5, %v5242_v44, 0.0  ;;  %v2832_v44 = vsel %vm7305_vm3, %v7303_v31, 0.0 }
  0xf3   : > { %vm7296_vm12 = vmmov %vm7281_vm4  ;;  %v2851_v12 = vpack.c.bf16 %v2832_v44, %v7308_v33 }
  0xf4   : > { %vm7307_vm5 = vmmov %vm7281_vm4 }
  0xf6   : > { %4812 = vmatmul.mubr.msk.bf16.gmra.mxu0 %vm7265_vm1, %v3140_v48  ;;  %vm7285_vm1 = vnez %v7284_v56  ;;  %v6105_v48 = vpop.f32.mrf.mxu0  ;;  %v7365_v56 = vld [vmem:[#allocation11_spill] sm:$0xff] }
  0xf7   : > { %4815 = vmatprep.mubr.msk.bf16.mxu0 %vm7278_vm2, %v3141_v34  ;;  %v2826_v0 = vsel %vm7285_vm1, %v7283_v1, 0.0  ;;  %vm7288_vm2 = vnez %v7287_v37  ;;  %v7306_v34 = vld [vmem:[#allocation66_spill] sm:$0xff] }
  0xf8   : > { %4778 = vmatmul.mubr.msk.bf16.gmra.mxu1 %vm7281_vm4, %v2846_v22  ;;  %v2828_v3 = vsel %vm7288_vm2, %v7286_v2, 0.0  ;;  %v2848_v36 = vpack.c.bf16 %v2826_v0, %v7289_v4  ;;  %v6115_v22 = vpop.f32.mrf.mxu1  ;;  %v7301_v0 = vld [vmem:[#allocation14_spill] sm:$0xff] }
  0xf9   : > { %4781 = vmatprep.mubr.msk.bf16.mxu1 %vm7282_vm14, %v2847_v8  ;;  %v2849_v43 = vpack.c.bf16 %v2828_v3, %v7292_v19  ;;  %vm7293_vm14 = vmmov %vm7281_vm4  ;;  %7297 = vst [vmem:[#allocation55_spill] sm:$0xff] %v6115_v22  ;;  %v7298_v8 = vld [vmem:[#allocation62_spill] sm:$0xff]  ;;  %v6122_v3 = vpop.f32.mrf.mxu0  ;;  %v7322_v22 = vld [vmem:[#allocation29_spill] sm:$0xff] }
  0xfe   : > { %4816 = vmatmul.mubr.msk.bf16.gmra.mxu0 %vm7291_vm10, %v3142_v47  ;;  %vm7300_vm10 = vnez %v7299_v55  ;;  %v3144_v47 = vpack.c.bf16 %v7301_v0, %v3123_v53  ;;  %v3127_v0 = vsel %vm5706_vm6, %v5275_v38, 0.0  ;;  %v7318_v53 = vld [vmem:[#allocation72_spill] sm:$0xff]  ;;  %vm7319_vm6 = vmmov %vm7281_vm4  ;;  %v7371_v55 = vld [vmem:[#allocation17_spill] sm:$0xff] }
  0xff   : > { %4819 = vmatprep.mubr.msk.bf16.mxu0 %vm7293_vm14, %v3143_v52  ;;  %v2830_v24 = vsel %vm7300_vm10, %v7298_v8, 0.0  ;;  %v6124_v52 = vpop.f32.mrf.mxu1  ;;  %vm7310_vm14 = vmmov %vm7281_vm4 }
 0x100   : > { %4782 = vmatmul.mubr.msk.bf16.gmra.mxu1 %vm7296_vm12, %v2848_v36  ;;  %7302 = vst [vmem:[#allocation57_spill] sm:$0xff] %v6124_v52  ;;  %v3145_v36 = vpack.c.bf16 %v5245_v41, %v3125_v27  ;;  %v2850_v29 = vpack.c.bf16 %v2830_v24, %v7306_v34  ;;  %vm7312_vm12 = vmmov %vm7281_vm4  ;;  %v7313_v41 = vld [vmem:[#allocation69_spill] sm:$0xff]  ;;  %v7314_v27 = vld [vmem:[#allocation67_spill] sm:$0xff] }
 0x101   : > { %4785 = vmatprep.mubr.msk.bf16.mxu1 %vm7281_vm4, %v2849_v43  ;;  %v6132_v43 = vpop.f32.mrf.mxu0  ;;  %v6135_v13 = vpop.f32.mrf.mxu1 }
 0x102   : > { %7309 = vst [vmem:[#allocation6_spill] sm:$0xff] %v6135_v13  ;;  %v7317_v13 = vld [vmem:[#allocation74_spill] sm:$0xff] }
 0x103   : > { %v6142_v61 = vpop.f32.mrf.mxu0  ;;  %v6149_v44 = vpop.f32.mrf.mxu1 }
 0x104   : > { %7316 = vst [vmem:[#allocation25_spill] sm:$0xff] %v6149_v44 }
 0x105   : > { %v6155_v52 = vpop.f32.mrf.mxu0  ;;  %v6159_v26 = vpop.f32.mrf.mxu1 }
 0x106   : > { %4820 = vmatmul.mubr.msk.bf16.gmra.mxu0 %vm7307_vm5, %v3144_v47  ;;  %vm7315_vm5 = vnez %v7314_v27  ;;  %v3146_v47 = vpack.c.bf16 %v5289_v60, %v3127_v0  ;;  %7321 = vst [vmem:[#allocation27_spill] sm:$0xff] %v6159_v26  ;;  %v7324_v0 = vld [vmem:[#allocation19_spill] sm:$0xff] }
 0x107   : > { %4823 = vmatprep.mubr.msk.bf16.mxu0 %vm7310_vm14, %v3145_v36  ;;  %v2834_v24 = vsel %vm7315_vm5, %v7313_v41, 0.0  ;;  %v2836_v36 = vsel %vm7228_vm15, %v7317_v13, 0.0  ;;  %vm7323_vm14 = vmmov %vm7281_vm4  ;;  %v6163_v60 = vpop.f32.mrf.mxu0 }
 0x108   : > { %4786 = vmatmul.mubr.msk.bf16.gmra.mxu1 %vm7312_vm12, %v2850_v29  ;;  %v2852_v38 = vpack.c.bf16 %v2834_v24, %v7318_v53  ;;  %v7320_v29 = vld [vmem:[#allocation75_spill] sm:$0xff]  ;;  %vm7325_vm12 = vnez %v7324_v0  ;;  %vm7326_vm15 = vmmov %vm7281_vm4  ;;  %v6169_v24 = vpop.f32.mrf.mxu1 }
 0x109   : > { %4789 = vmatprep.mubr.msk.bf16.mxu1 %vm7281_vm4, %v2851_v12  ;;  %v2853_v12 = vpack.c.bf16 %v2836_v36, %v7320_v29  ;;  %v3623_v16 = vsel %vm7325_vm12, %v7234_v57, 0.0  ;;  %7327 = vst [vmem:[#allocation21_spill] sm:$0xff] %v6169_v24  ;;  %v6171_v44 = vpop.f32.mrf.mxu0  ;;  %vm7337_vm12 = vmmov %vm7281_vm4 }
 0x10a   : > { %v6179_v36 = vpop.f32.mrf.mxu1  ;;  %v3654_v26 = vpack.c.bf16 %v3623_v16, %v7239_v28  ;;  %v7338_v16 = vld [vmem:[#allocation10_spill] sm:$0xff] }
 0x10b   : > { %7329 = vst [vmem:[#allocation26_spill] sm:$0xff] %v6179_v36  ;;  %v6182_v0 = vpop.f32.mrf.mxu0  ;;  %v7336_v36 = vld [vmem:[#allocation34_spill] sm:$0xff] }
 0x10c   : > { %v6184_v57 = vpop.f32.mrf.mxu1 }
 0x10d   : > { %7330 = vst [vmem:[#allocation33_spill] sm:$0xff] %v6184_v57 }
 0x10e   : > { %4824 = vmatmul.mubr.msk.bf16.gmra.mxu0 %vm7319_vm6, %v3146_v47  ;;  %v7328_v47 = vsel %vm5754_vm0, %v5843_v49, 0.0  ;;  %vm7331_vm6 = vmmov %vm7281_vm4  ;;  %vm7334_vm0 = vnez %v7333_v21  ;;  %v7347_v49 = vld [vmem:[#allocation16_spill] sm:$0xff] }
 0x10f   : > { %4827 = vmatprep.mubr.msk.bf16.mxu0 %vm7323_vm14, %v7322_v22  ;;  %v3148_v22 = vpack.c.bf16 %v7223_v35, %v7328_v47  ;;  %vm7332_vm14 = vmmov %vm7281_vm4  ;;  %v3627_v35 = vsel %vm7334_vm0, %v7244_v62, 0.0  ;;  %v7342_v62 = vld [vmem:[#allocation31_spill] sm:$0xff] }
 0x110   : > { %4790 = vmatmul.mubr.msk.bf16.gmra.mxu1 %vm7326_vm15, %v2852_v38  ;;  %v6186_v38 = vpop.f32.mrf.mxu0  ;;  %vm7339_vm15 = vmmov %vm7281_vm4 }
 0x111   : > { %4793 = vmatprep.mubr.msk.bf16.mxu1 %vm7281_vm4, %v2853_v12  ;;  %v6195_v47 = vpop.f32.mrf.mxu1  ;;  %vm7348_vm0 = vmmov %vm7281_vm4 }
 0x112   : > { %v6190_v12 = vpop.f32.mrf.mxu0  ;;  %7335 = vst [vmem:[#allocation30_spill] sm:$0xff] %v6195_v47 }
 0x113   : > { %v6203_v57 = vpop.f32.mrf.mxu1 }
 0x114   : > { %v6199_v28 = vpop.f32.mrf.mxu0  ;;  %7340 = vst [vmem:[#allocation39_spill] sm:$0xff] %v6203_v57  ;;  %v7345_v57 = vld [vmem:[#allocation12_spill] sm:$0xff] }
 0x115   : > { %v6208_v24 = vpop.f32.mrf.mxu1 }
 0x116   : > { %4828 = vmatmul.mubr.msk.bf16.gmra.mxu0 %vm7331_vm6, %v3148_v22  ;;  %v6206_v22 = vpop.f32.mrf.mxu0  ;;  %7341 = vst [vmem:[#allocation35_spill] sm:$0xff] %v6208_v24  ;;  %vm7344_vm6 = vmmov %vm7281_vm4 }
 0x117   : > { %4867 = vmatprep.mubr.msk.bf16.mxu0 %vm7332_vm14, %v3654_v26  ;;  %v3656_v26 = vpack.c.bf16 %v3627_v35, %v7250_v7  ;;  %v6212_v47 = vpop.f32.mrf.mxu1  ;;  %v3631_v7 = vsel %vm7249_vm7, %v7256_v39, 0.0  ;;  %vm7346_vm14 = vmmov %vm7281_vm4 }
 0x118   : > { %4794 = vmatmul.mubr.msk.bf16.gmra.mxu1 %vm7337_vm12, %v7336_v36  ;;  %v4665_v21 = vpop.f32.mrf.mxu0  ;;  %7343 = vst [vmem:[#allocation32_spill] sm:$0xff] %v6212_v47  ;;  %v3629_v36 = vsel %vm7246_vm9, %v7247_v42, 0.0  ;;  %v3658_v14 = vpack.c.bf16 %v3631_v7, %v7262_v9  ;;  %vm7349_vm9 = vmmov %vm7348_vm0 }
 0x119   : > { %4833 = vmatprep.mubr.msk.bf16.mxu1 %vm7339_vm15, %v7338_v16  ;;  %v4631_v35 = vpop.f32.mrf.mxu1  ;;  %vm7350_vm7 = vmmov %vm7348_vm0 }
 0x11a   : > { %v2127_v16 = vpop.f32.mrf.mxu0  ;;  %v1647_v24 = vadd.f32 %v4631_v35, %v6049_v17  ;;  %vm7352_vm12 = vmmov %vm7348_vm0 }
 0x11b   : > { %v1638_v47 = vpop.f32.mrf.mxu1  ;;  %vm7356_vm15 = vmmov %vm7348_vm0 }
 0x11c   : > { %v6228_v42 = vadd.f32 %v4665_v21, %v1647_v24  ;;  %v1639_v32 = vadd.f32 %v1638_v47, %v6066_v23  ;;  %v3635_v24 = vsel %vm7261_vm11, %v7270_v20, 0.0  ;;  %vm7355_vm11 = vmmov %vm7348_vm0 }
 0x11d   : > { %v4632_v29 = vpop.f32.mrf.mxu1 }
 0x11e   : > { %4868 = vmatmul.mubr.msk.bf16.vlgmr.msra.gmra.mxu0 %vm7281_vm4, %v7342_v62  ;;  %v4666_v62 = vpop.f32.mrf.mxu0  ;;  %v6231_v30 = vadd.f32 %v2127_v16, %v1639_v32  ;;  %v3660_v16 = vpack.c.bf16 %v3635_v24, %v7276_v58  ;;  %vm7357_vm4 = vnez %v7274_v54 }
 0x11f   : > { %4871 = vmatprep.mubr.msk.bf16.mxu0 %vm7344_vm6, %v3656_v26  ;;  %v3657_v26 = vpack.c.bf16 %v3629_v36, %v7252_v15  ;;  %v1641_v35 = vpop.f32.mrf.mxu1  ;;  %vm7359_vm6 = vmmov %vm7348_vm0 }
 0x120   : > { %4834 = vmatmul.mubr.msk.bf16.vlgmr.msra.gmra.mxu1 %vm7346_vm14, %v7345_v57  ;;  %v2130_v39 = vpop.f32.mrf.mxu0  ;;  %v1650_v57 = vadd.f32 %v4632_v29, %v6077_v63  ;;  %v1642_v9 = vadd.f32 %v1641_v35, %v6094_v45  ;;  %v7351_v29 = vld [vmem:[#allocation18_spill] sm:$0xff]  ;;  %vm7362_vm14 = vmmov %vm7348_vm0 }
 0x121   : > { %4837 = vmatprep.mubr.msk.bf16.mxu1 %vm7348_vm0, %v7347_v49  ;;  %v3633_v49 = vsel %vm7258_vm13, %v7259_v46, 0.0  ;;  %v4635_v63 = vpop.f32.mrf.mxu1  ;;  %vm7354_vm13 = vmmov %vm7348_vm0 }
 0x122   : > { %v4669_v17 = vpop.f32.mrf.mxu0  ;;  %v6239_v15 = vadd.f32 %v4666_v62, %v1650_v57  ;;  %v6247_v47 = vadd.f32 %v2130_v39, %v1642_v9  ;;  %v1663_v21 = vadd.f32 %v4635_v63, %v6105_v48  ;;  %v3659_v46 = vpack.c.bf16 %v3633_v49, %v7264_v50 }
 0x123   : > { %v1654_v45 = vpop.f32.mrf.mxu1  ;;  %v3637_v50 = vsel %vm7272_vm8, %v7273_v59, 0.0  ;;  %v3639_v57 = vsel %vm7357_vm4, %v7283_v1, 0.0  ;;  %vm7361_vm8 = vmmov %vm7348_vm0 }
 0x124   : > { %v2143_v23 = vpop.f32.mrf.mxu0  ;;  %v6254_v7 = vadd.f32 %v4669_v17, %v1663_v21  ;;  %v1655_v25 = vadd.f32 %v1654_v45, %v6122_v3  ;;  %v7358_v17 = vld [vmem:[#allocation23_spill] sm:$0xff]  ;;  %v3661_v59 = vpack.c.bf16 %v3637_v50, %v7277_v18  ;;  %v3641_v18 = vsel %vm7285_vm1, %v7286_v2, 0.0  ;;  %v7363_v45 = vld [vmem:[#allocation8_spill] sm:$0xff]  ;;  %vm7366_vm1 = vmmov %vm7348_vm0 }
 0x125   : > { %v4636_v62 = vpop.f32.mrf.mxu1  ;;  %v3663_v2 = vpack.c.bf16 %v3641_v18, %v7292_v19  ;;  %v3645_v19 = vsel %vm7300_vm10, %v7303_v31, 0.0  ;;  %vm7372_vm10 = vmmov %vm7348_vm0  ;;  %v7378_v18 = vld [vmem:[#allocation55_spill] sm:$0xff] }
 0x126   : > { %4872 = vmatmul.mubr.msk.bf16.gmra.mxu0 %vm7349_vm9, %v3657_v26  ;;  %v4670_v36 = vpop.f32.mrf.mxu0  ;;  %v6257_v26 = vadd.f32 %v2143_v23, %v1655_v25  ;;  %v3662_v23 = vpack.c.bf16 %v3639_v57, %v7289_v4  ;;  %vm7364_vm9 = vmmov %vm7348_vm0  ;;  %v3647_v57 = vsel %vm7305_vm3, %v7313_v41, 0.0  ;;  %v3665_v31 = vpack.c.bf16 %v3645_v19, %v7308_v33  ;;  %v7388_v19 = vld [vmem:[#allocation3_spill] sm:$0xff] }
 0x127   : > { %4875 = vmatprep.mubr.msk.bf16.mxu0 %vm7350_vm7, %v3658_v14  ;;  %v1666_v14 = vadd.f32 %v4636_v62, %v6132_v43  ;;  %v1657_v32 = vpop.f32.mrf.mxu1  ;;  %vm7368_vm7 = vmmov %vm7348_vm0  ;;  %v3649_v33 = vsel %vm7315_vm5, %v7317_v13, 0.0 }
 0x128   : > { %4838 = vmatmul.mubr.msk.bf16.gmra.mxu1 %vm7352_vm12, %v7351_v29  ;;  %v2146_v20 = vpop.f32.mrf.mxu0  ;;  %v1658_v3 = vadd.f32 %v1657_v32, %v6142_v61  ;;  %vm7370_vm12 = vmmov %vm7348_vm0 }
 0x129   : > { %4841 = vmatprep.mubr.msk.bf16.mxu1 %vm7354_vm13, %v7353_v5  ;;  %v6265_v58 = vadd.f32 %v4670_v36, %v1666_v14  ;;  %vm7373_vm3 = vmmov %vm7348_vm0 }
 0x12a   : > { %v6273_v35 = vadd.f32 %v2146_v20, %v1658_v3  ;;  %vm7374_vm13 = vmmov %vm7348_vm0 }
 0x12b   : > { %vm7384_vm5 = vmmov %vm7348_vm0 }
 0x12c   : > { %v4673_v48 = vpop.f32.mrf.mxu0  ;;  %vm7387_vm4 = vmmov %vm7348_vm0 }
 0x12e   : > { %4876 = vmatmul.mubr.msk.bf16.gmra.mxu0 %vm7355_vm11, %v3659_v46  ;;  %v2159_v39 = vpop.f32.mrf.mxu0  ;;  %v3643_v46 = vsel %vm7288_vm2, %v7298_v8, 0.0  ;;  %vm7367_vm2 = vmmov %vm7348_vm0 }
 0x12f   : > { %4879 = vmatprep.mubr.msk.bf16.mxu0 %vm7356_vm15, %v3660_v16  ;;  %v4639_v43 = vpop.f32.mrf.mxu1  ;;  %v3664_v62 = vpack.c.bf16 %v3643_v46, %v7306_v34  ;;  %vm7377_vm11 = vmmov %vm7348_vm0  ;;  %v7379_v46 = vld [vmem:[#allocation24_spill] sm:$0xff] }
 0x130   : > { %4842 = vmatmul.mubr.msk.bf16.gmra.mxu1 %vm7359_vm6, %v7358_v17  ;;  %v1679_v49 = vadd.f32 %v4639_v43, %v6155_v52  ;;  %v4674_v9 = vpop.f32.mrf.mxu0  ;;  %v7369_v43 = vld [vmem:[#allocation13_spill] sm:$0xff]  ;;  %vm7380_vm15 = vmmov %vm7348_vm0  ;;  %vm7391_vm6 = vcmask 1045504  }
 0x131   : > { %4845 = vmatprep.mubr.msk.bf16.mxu1 %vm7361_vm8, %v7360_v51  ;;  %v1670_v61 = vpop.f32.mrf.mxu1  ;;  %v3666_v51 = vpack.c.bf16 %v3647_v57, %v7318_v53 }
 0x132   : > { %v6280_v24 = vadd.f32 %v4673_v48, %v1679_v49  ;;  %v1671_v54 = vadd.f32 %v1670_v61, %v6163_v60  ;;  %v2162_v1 = vpop.f32.mrf.mxu0 }
 0x133   : > { %v4640_v63 = vpop.f32.mrf.mxu1 }
 0x134   : > { %v6283_v29 = vadd.f32 %v2159_v39, %v1671_v54  ;;  %v1682_v21 = vadd.f32 %v4640_v63, %v6171_v44  ;;  %v4677_v52 = vpop.f32.mrf.mxu0  ;;  %v7375_v63 = vld [vmem:[#allocation4_spill] sm:$0xff] }
 0x135   : > { %v1673_v36 = vpop.f32.mrf.mxu1 }
 0x136   : > { %4880 = vmatmul.mubr.msk.bf16.gmra.mxu0 %vm7362_vm14, %v3661_v59  ;;  %v6291_v4 = vadd.f32 %v4674_v9, %v1682_v21  ;;  %v1674_v60 = vadd.f32 %v1673_v36, %v6182_v0  ;;  %v2175_v5 = vpop.f32.mrf.mxu0  ;;  %v7376_v36 = vld [vmem:[#allocation20_spill] sm:$0xff]  ;;  %vm7396_vm14 = vmmov %vm7348_vm0 }
 0x137   : > { %4883 = vmatprep.mubr.msk.bf16.mxu0 %vm7348_vm0, %v3662_v23  ;;  %v4643_v44 = vpop.f32.mrf.mxu1 }
 0x138   : > { %4846 = vmatmul.mubr.msk.bf16.gmra.mxu1 %vm7364_vm9, %v7363_v45  ;;  %v6299_v16 = vadd.f32 %v2162_v1, %v1674_v60  ;;  %v1695_v25 = vadd.f32 %v4643_v44, %v6186_v38  ;;  %v4678_v20 = vpop.f32.mrf.mxu0  ;;  %v7381_v44 = vld [vmem:[#allocation75_spill] sm:$0xff]  ;;  %vm7403_vm9 = vsmask.f32 7424 }
 0x139   : > { %4849 = vmatprep.mubr.msk.bf16.mxu1 %vm7366_vm1, %v7365_v56  ;;  %v1686_v0 = vpop.f32.mrf.mxu1  ;;  %v3667_v27 = vpack.c.bf16 %v3649_v33, %v7381_v44  ;;  %v7399_v33 = vld [vmem:[#allocation47_spill] sm:$0xff]  ;;  %vm7404_vm1 = vmmov %vm7348_vm0 }
 0x13a   : > { %v6306_v14 = vadd.f32 %v4677_v52, %v1695_v25  ;;  %v1687_v37 = vadd.f32 %v1686_v0, %v6190_v12  ;;  %v2178_v8 = vpop.f32.mrf.mxu0  ;;  %v7382_v25 = vld [vmem:[#allocation57_spill] sm:$0xff] }
 0x13b   : > { %v4644_v48 = vpop.f32.mrf.mxu1 }
 0x13c   : > { %v6309_v32 = vadd.f32 %v2175_v5, %v1687_v37  ;;  %v1698_v50 = vadd.f32 %v4644_v48, %v6199_v28  ;;  %v7385_v48 = vld [vmem:[#allocation15_spill] sm:$0xff] }
 0x13d   : > { %v4681_v38 = vpop.f32.mrf.mxu0  ;;  %v1689_v3 = vpop.f32.mrf.mxu1 }
 0x13e   : > { %4884 = vmatmul.mubr.msk.bf16.gmra.mxu0 %vm7367_vm2, %v3663_v2  ;;  %v6317_v34 = vadd.f32 %v4678_v20, %v1698_v50  ;;  %v1690_v12 = vadd.f32 %v1689_v3, %v6206_v22  ;;  %v3404_v50 = vshrl.u32 %v7385_v48, 16  ;;  %v7386_v3 = vld [vmem:[#allocation40_spill] sm:$0xff]  ;;  %vm7406_vm2 = vmmov %vm7348_vm0 }
 0x13f   : > { %4887 = vmatprep.mubr.msk.bf16.mxu0 %vm7368_vm7, %v3664_v62  ;;  %v2191_v39 = vpop.f32.mrf.mxu0  ;;  %v4647_v28 = vpop.f32.mrf.mxu1  ;;  %v7383_v62 = vld [vmem:[#allocation6_spill] sm:$0xff]  ;;  %vm4044_vm7 = vcmask 125952  }
 0x140   : > { %4850 = vmatmul.mubr.msk.bf16.gmra.mxu1 %vm7370_vm12, %v7369_v43  ;;  %v6325_v17 = vadd.f32 %v2178_v8, %v1690_v12  ;;  %v1711_v49 = vadd.f32 %v4647_v28, %v6064_v11  ;;  %v7389_v12 = vld [vmem:[#allocation5_spill] sm:$0xff] }
 0x141   : > { %v4682_v9 = vpop.f32.mrf.mxu0  ;;  %4853 = vmatprep.mubr.msk.bf16.mxu1 %vm7372_vm10, %v7371_v55  ;;  %v1702_v22 = vpop.f32.mrf.mxu1  ;;  %v7392_v28 = vld [vmem:[#allocation73_spill] sm:$0xff] }
 0x142   : > { %v6332_v59 = vadd.f32 %v4681_v38, %v1711_v49  ;;  %v1703_v40 = vadd.f32 %v1702_v22, %v6073_v10  ;;  %vm7393_vm8 = vnez %v7392_v28 }
 0x143   : > { %v2194_v41 = vpop.f32.mrf.mxu0  ;;  %v4648_v61 = vpop.f32.mrf.mxu1  ;;  %v3653_v43 = vsel %vm7393_vm8, %v7388_v19, 0.0 }
 0x144   : > { %v6335_v23 = vadd.f32 %v2191_v39, %v1703_v40  ;;  %v1714_v54 = vadd.f32 %v4648_v61, %v6087_v6  ;;  %v7390_v39 = vrot.slane %v7389_v12, 2 }
 0x145   : > { %v1705_v1 = vpop.f32.mrf.mxu1 }
 0x146   : > { %v4685_v11 = vpop.f32.mrf.mxu0  ;;  %4888 = vmatmul.mubr.msk.bf16.gmra.mxu0 %vm7373_vm3, %v3665_v31  ;;  %v6343_v53 = vadd.f32 %v4682_v9, %v1714_v54  ;;  %v1706_v10 = vadd.f32 %v1705_v1, %v7375_v63  ;;  %v3617_v57 = vsel %vm7391_vm6, %v7390_v39, %v7388_v19  ;;  %v7394_v9 = vld [vmem:[#allocation25_spill] sm:$0xff]  ;;  %v7408_v39 = vld [vmem:[#allocation39_spill] sm:$0xff] }
 0x147   : > { %4891 = vmatprep.mubr.msk.bf16.mxu0 %vm7374_vm13, %v3666_v51  ;;  %v7395_v51 = vld [vmem:[#allocation9_spill] sm:$0xff]  ;;  %v3669_v63 = vpack.c.bf16 %v3653_v43, %v3617_v57 }
 0x148   : > { %v2207_v21 = vpop.f32.mrf.mxu0  ;;  %v4651_v52 = vpop.f32.mrf.mxu1  ;;  %4854 = vmatmul.mubr.msk.bf16.gmra.mxu1 %vm7377_vm11, %v7376_v36  ;;  %v6348_v6 = vadd.f32 %v2194_v41, %v1706_v10  ;;  %v7397_v41 = vld [vmem:[#allocation27_spill] sm:$0xff] }
 0x149   : > { %v1727_v60 = vadd.f32 %v4651_v52, %v7378_v18  ;;  %4857 = vmatprep.mubr.msk.bf16.mxu1 %vm7380_vm15, %v7379_v46  ;;  %v7400_v52 = vld [vmem:[#allocation21_spill] sm:$0xff]  ;;  %v7401_v46 = vld [vmem:[#allocation26_spill] sm:$0xff] }
 0x14a   : > { %v4686_v5 = vpop.f32.mrf.mxu0  ;;  %v1718_v13 = vpop.f32.mrf.mxu1 }
 0x14b   : > { %v6354_v45 = vadd.f32 %v4685_v11, %v1727_v60  ;;  %v1719_v20 = vadd.f32 %v1718_v13, %v7382_v25  ;;  %v7398_v11 = vld [vmem:[#allocation36_spill] sm:$0xff]  ;;  %v7402_v13 = vld [vmem:[#allocation2_spill] sm:$0xff] }
 0x14c   : > { %v2210_v56 = vpop.f32.mrf.mxu0  ;;  %v4652_v2 = vpop.f32.mrf.mxu1  ;;  %v3406_v1 = vor.u32 %v3404_v50, %v7398_v11  ;;  %v7407_v50 = vld [vmem:[#allocation30_spill] sm:$0xff] }
 0x14d   : > { %v6357_v0 = vadd.f32 %v2207_v21, %v1719_v20  ;;  %v1730_v37 = vadd.f32 %v4652_v2, %v7383_v62  ;;  %v7405_v2 = vld [vmem:[#allocation33_spill] sm:$0xff] }
 0x14e   : > { %v4689_v8 = vpop.f32.mrf.mxu0  ;;  %4892 = vmatmul.mubr.msk.bf16.gmra.mxu0 %vm7384_vm5, %v3667_v27  ;;  %v1721_v38 = vpop.f32.mrf.mxu1  ;;  %v3411_v25 = vsel %vm7403_vm9, %v3406_v1, %v7402_v13 }
 0x14f   : > { %4895 = vmatprep.mubr.msk.bf16.mxu0 %vm7387_vm4, %v7386_v3  ;;  %v6371_v49 = vadd.f32 %v4686_v5, %v1730_v37  ;;  %v1722_v55 = vadd.f32 %v1721_v38, %v7394_v9 }
 0x150   : > { %v2223_v31 = vpop.f32.mrf.mxu0  ;;  %v4655_v22 = vpop.f32.mrf.mxu1  ;;  %4858 = vmatmul.mubr.msk.bf16.gmra.mxu1 %vm7396_vm14, %v7395_v51 }
 0x151   : > { %v6376_v40 = vadd.f32 %v2210_v56, %v1722_v55  ;;  %v1743_v61 = vadd.f32 %v4655_v22, %v7397_v41  ;;  %4861 = vmatprep.mubr.msk.bf16.mxu1 %vm7348_vm0, %v7399_v33  ;;  %v7409_v55 = vld [vmem:[#allocation35_spill] sm:$0xff] }
 0x152   : > { %v4690_v54 = vpop.f32.mrf.mxu0  ;;  %v1734_v10 = vpop.f32.mrf.mxu1 }
 0x153   : > { %v6382_v21 = vadd.f32 %v4689_v8, %v1743_v61  ;;  %v1735_v36 = vadd.f32 %v1734_v10, %v7400_v52  ;;  %v7410_v61 = vld [vmem:[#allocation32_spill] sm:$0xff] }
 0x154   : > { %v2226_v18 = vpop.f32.mrf.mxu0  ;;  %v4656_v60 = vpop.f32.mrf.mxu1 }
 0x155   : > { %v6385_v5 = vadd.f32 %v2223_v31, %v1735_v36  ;;  %v1746_v44 = vadd.f32 %v4656_v60, %v7401_v46 }
 0x156   : > { %v4693_v27 = vpop.f32.mrf.mxu0  ;;  %4896 = vmatmul.mubr.msk.bf16.gmra.mxu0 %vm7404_vm1, %v3669_v63  ;;  %v1737_v20 = vpop.f32.mrf.mxu1 }
 0x157   : > { %v6391_v56 = vadd.f32 %v4690_v54, %v1746_v44  ;;  %v1738_v62 = vadd.f32 %v1737_v20, %v7405_v2 }
 0x158   : > { %v2239_v37 = vpop.f32.mrf.mxu0  ;;  %v4659_v8 = vpop.f32.mrf.mxu1  ;;  %4862 = vmatmul.mubr.msk.bf16.gmra.mxu1 %vm7406_vm2, %v3411_v25 }
 0x159   : > { %v6395_v48 = vadd.f32 %v2226_v18, %v1738_v62  ;;  %v1759_v38 = vadd.f32 %v4659_v8, %v7407_v50 }
 0x15a   : > { %v4694_v3 = vpop.f32.mrf.mxu0  ;;  %v1750_v19 = vpop.f32.mrf.mxu1 }
 0x15b   : > { %v6398_v12 = vadd.f32 %v4693_v27, %v1759_v38  ;;  %v1751_v57 = vadd.f32 %v1750_v19, %v7408_v39 }
 0x15c   : > { %v2242_v28 = vpop.f32.mrf.mxu0  ;;  %v4660_v43 = vpop.f32.mrf.mxu1 }
 0x15d   : > { %v6401_v9 = vadd.f32 %v2239_v37, %v1751_v57  ;;  %v1762_v31 = vadd.f32 %v4660_v43, %v7409_v55 }
 0x15e   : > { %v4733_v22 = vpop.f32.mrf.mxu0  ;;  %v1753_v51 = vpop.f32.mrf.mxu1 }
 0x15f   : > { %v6404_v41 = vadd.f32 %v4694_v3, %v1762_v31  ;;  %v1754_v54 = vadd.f32 %v1753_v51, %v7410_v61 }
 0x160   : > { %v2640_v11 = vpop.f32.mrf.mxu0  ;;  %v4699_v1 = vpop.f32.mrf.mxu1 }
 0x161   : > { %v6407_v33 = vadd.f32 %v2242_v28, %v1754_v54  ;;  %v2550_v63 = vadd.f32 %v4699_v1, %v6228_v42 }
 0x162   : > { %v4734_v10 = vpop.f32.mrf.mxu0  ;;  %v2421_v52 = vpop.f32.mrf.mxu1 }
 0x163   : > { %v6410_v36 = vadd.f32 %v4733_v22, %v2550_v63  ;;  %v2548_v18 = vadd.f32 %v2421_v52, %v6231_v30 }
 0x164   : > { %v2643_v60 = vpop.f32.mrf.mxu0  ;;  %v4700_v46 = vpop.f32.mrf.mxu1 }
 0x165   : > { %v6413_v44 = vadd.f32 %v2640_v11, %v2548_v18  ;;  %v2551_v27 = vadd.f32 %v4700_v46, %v6239_v15 }
 0x166   : > { %v4737_v13 = vpop.f32.mrf.mxu0  ;;  %v2424_v25 = vpop.f32.mrf.mxu1 }
 0x167   : > { %v6416_v20 = vadd.f32 %v4734_v10, %v2551_v27  ;;  %v2549_v2 = vadd.f32 %v2424_v25, %v6247_v47 }
 0x168   : > { %v2656_v62 = vpop.f32.mrf.mxu0  ;;  %v4703_v42 = vpop.f32.mrf.mxu1 }
 0x169   : > { %v6419_v37 = vadd.f32 %v2643_v60, %v2549_v2  ;;  %v2554_v8 = vadd.f32 %v4703_v42, %v6254_v7 }
 0x16a   : > { %v4738_v50 = vpop.f32.mrf.mxu0  ;;  %v2437_v30 = vpop.f32.mrf.mxu1 }
 0x16b   : > { %v6422_v38 = vadd.f32 %v4737_v13, %v2554_v8  ;;  %v2552_v3 = vadd.f32 %v2437_v30, %v6257_v26 }
 0x16c   : > { %v2659_v19 = vpop.f32.mrf.mxu0  ;;  %v4704_v15 = vpop.f32.mrf.mxu1 }
 0x16d   : > { %v6425_v39 = vadd.f32 %v2656_v62, %v2552_v3  ;;  %v2555_v57 = vadd.f32 %v4704_v15, %v6265_v58 }
 0x16e   : > { %v4741_v28 = vpop.f32.mrf.mxu0  ;;  %v2440_v47 = vpop.f32.mrf.mxu1 }
 0x16f   : > { %v6428_v43 = vadd.f32 %v4738_v50, %v2555_v57  ;;  %v2553_v55 = vadd.f32 %v2440_v47, %v6273_v35 }
 0x170   : > { %v2672_v31 = vpop.f32.mrf.mxu0  ;;  %v4707_v7 = vpop.f32.mrf.mxu1 }
 0x171   : > { %v6431_v22 = vadd.f32 %v2659_v19, %v2553_v55  ;;  %v2558_v51 = vadd.f32 %v4707_v7, %v6280_v24 }
 0x172   : > { %v4742_v61 = vpop.f32.mrf.mxu0  ;;  %v2453_v26 = vpop.f32.mrf.mxu1 }
 0x173   : > { %v6434_v54 = vadd.f32 %v4741_v28, %v2558_v51  ;;  %v2556_v11 = vadd.f32 %v2453_v26, %v6283_v29 }
 0x174   : > { %v2675_v1 = vpop.f32.mrf.mxu0  ;;  %v4708_v58 = vpop.f32.mrf.mxu1 }
 0x175   : > { %v6437_v63 = vadd.f32 %v2672_v31, %v2556_v11  ;;  %v2559_v10 = vadd.f32 %v4708_v58, %v6291_v4 }
 0x176   : > { %v4745_v52 = vpop.f32.mrf.mxu0  ;;  %v2456_v35 = vpop.f32.mrf.mxu1 }
 0x177   : > { %v6440_v18 = vadd.f32 %v4742_v61, %v2559_v10  ;;  %v2557_v60 = vadd.f32 %v2456_v35, %v6299_v16 }
 0x178   : > { %v2688_v46 = vpop.f32.mrf.mxu0  ;;  %v4711_v24 = vpop.f32.mrf.mxu1 }
 0x179   : > { %v6443_v27 = vadd.f32 %v2675_v1, %v2557_v60  ;;  %v2562_v13 = vadd.f32 %v4711_v24, %v6306_v14 }
 0x17a   : > { %v4746_v25 = vpop.f32.mrf.mxu0  ;;  %v2469_v29 = vpop.f32.mrf.mxu1 }
 0x17b   : > { %v6446_v2 = vadd.f32 %v4745_v52, %v2562_v13  ;;  %v2560_v62 = vadd.f32 %v2469_v29, %v6309_v32 }
 0x17c   : > { %v2691_v42 = vpop.f32.mrf.mxu0  ;;  %v4712_v4 = vpop.f32.mrf.mxu1 }
 0x17d   : > { %v6449_v8 = vadd.f32 %v2688_v46, %v2560_v62  ;;  %v2563_v50 = vadd.f32 %v4712_v4, %v6317_v34 }
 0x17e   : > { %v4749_v30 = vpop.f32.mrf.mxu0  ;;  %v2472_v16 = vpop.f32.mrf.mxu1 }
 0x17f   : > { %v6452_v3 = vadd.f32 %v4746_v25, %v2563_v50  ;;  %v2561_v19 = vadd.f32 %v2472_v16, %v6325_v17 }
 0x180   : > { %v2704_v15 = vpop.f32.mrf.mxu0  ;;  %v4715_v14 = vpop.f32.mrf.mxu1 }
 0x181   : > { %v6455_v57 = vadd.f32 %v2691_v42, %v2561_v19  ;;  %v2566_v28 = vadd.f32 %v4715_v14, %v6332_v59 }
 0x182   : > { %v4750_v47 = vpop.f32.mrf.mxu0  ;;  %v2485_v32 = vpop.f32.mrf.mxu1 }
 0x183   : > { %v6458_v55 = vadd.f32 %v4749_v30, %v2566_v28  ;;  %v2564_v31 = vadd.f32 %v2485_v32, %v6335_v23 }
 0x184   : > { %v2707_v7 = vpop.f32.mrf.mxu0  ;;  %v4716_v34 = vpop.f32.mrf.mxu1 }
 0x185   : > { %v6461_v51 = vadd.f32 %v2704_v15, %v2564_v31  ;;  %v2567_v61 = vadd.f32 %v4716_v34, %v6343_v53 }
 0x186   : > { %v4753_v26 = vpop.f32.mrf.mxu0  ;;  %v2488_v17 = vpop.f32.mrf.mxu1 }
 0x187   : > { %v6464_v11 = vadd.f32 %v4750_v47, %v2567_v61  ;;  %v2565_v1 = vadd.f32 %v2488_v17, %v6348_v6 }
 0x188   : > { %v2720_v58 = vpop.f32.mrf.mxu0  ;;  %v4719_v59 = vpop.f32.mrf.mxu1 }
 0x189   : > { %7411 = vst [vmem:[#allocation37_spill] sm:$0xff] %v6464_v11  ;;  %v6467_v10 = vadd.f32 %v2707_v7, %v2565_v1  ;;  %v2570_v52 = vadd.f32 %v4719_v59, %v6354_v45 }
 0x18a   : > { %v4754_v35 = vpop.f32.mrf.mxu0  ;;  %v2501_v23 = vpop.f32.mrf.mxu1 }
 0x18b   : > { %7412 = vst [vmem:[#allocation42_spill] sm:$0xff] %v6467_v10  ;;  %v6470_v60 = vadd.f32 %v4753_v26, %v2570_v52  ;;  %v2568_v46 = vadd.f32 %v2501_v23, %v6357_v0 }
 0x18c   : > { %v2723_v24 = vpop.f32.mrf.mxu0  ;;  %v4720_v53 = vpop.f32.mrf.mxu1 }
 0x18d   : > { %7413 = vst [vmem:[#allocation38_spill] sm:$0xff] %v6470_v60  ;;  %v6473_v13 = vadd.f32 %v2720_v58, %v2568_v46  ;;  %v2571_v25 = vadd.f32 %v4720_v53, %v6371_v49 }
 0x18e   : > { %v4757_v29 = vpop.f32.mrf.mxu0  ;;  %v2504_v6 = vpop.f32.mrf.mxu1 }
 0x18f   : > { %7414 = vst [vmem:[#allocation45_spill] sm:$0xff] %v6473_v13  ;;  %v6476_v62 = vadd.f32 %v4754_v35, %v2571_v25  ;;  %v2569_v42 = vadd.f32 %v2504_v6, %v6376_v40 }
 0x190   : > { %v2736_v4 = vpop.f32.mrf.mxu0  ;;  %v4723_v45 = vpop.f32.mrf.mxu1 }
 0x191   : > { %7415 = vst [vmem:[#allocation43_spill] sm:$0xff] %v6476_v62  ;;  %v6479_v50 = vadd.f32 %v2723_v24, %v2569_v42  ;;  %v2574_v30 = vadd.f32 %v4723_v45, %v6382_v21 }
 0x192   : > { %v4758_v16 = vpop.f32.mrf.mxu0  ;;  %v2517_v0 = vpop.f32.mrf.mxu1 }
 0x193   : > { %7416 = vst [vmem:[#allocation41_spill] sm:$0xff] %v6479_v50  ;;  %v6482_v19 = vadd.f32 %v4757_v29, %v2574_v30  ;;  %v2572_v15 = vadd.f32 %v2517_v0, %v6385_v5 }
 0x194   : > { %v2739_v14 = vpop.f32.mrf.mxu0  ;;  %v4724_v49 = vpop.f32.mrf.mxu1 }
 0x195   : > { %7417 = vst [vmem:[#allocation46_spill] sm:$0xff] %v6482_v19  ;;  %v6485_v28 = vadd.f32 %v2736_v4, %v2572_v15  ;;  %v2575_v47 = vadd.f32 %v4724_v49, %v6391_v56 }
 0x196   : > { %v4761_v32 = vpop.f32.mrf.mxu0  ;;  %v2520_v40 = vpop.f32.mrf.mxu1 }
 0x197   : > { %7418 = vst [vmem:[#allocation50_spill] sm:$0xff] %v6485_v28  ;;  %v6488_v31 = vadd.f32 %v4758_v16, %v2575_v47  ;;  %v2573_v7 = vadd.f32 %v2520_v40, %v6395_v48 }
 0x198   : > { %v2752_v34 = vpop.f32.mrf.mxu0  ;;  %v4727_v21 = vpop.f32.mrf.mxu1 }
 0x199   : > { %7419 = vst [vmem:[#allocation44_spill] sm:$0xff] %v6488_v31  ;;  %v6491_v61 = vadd.f32 %v2739_v14, %v2573_v7  ;;  %v2578_v26 = vadd.f32 %v4727_v21, %v6398_v12 }
 0x19a   : > { %v4762_v17 = vpop.f32.mrf.mxu0  ;;  %v2533_v5 = vpop.f32.mrf.mxu1 }
 0x19b   : > { %7420 = vst [vmem:[#allocation52_spill] sm:$0xff] %v6491_v61  ;;  %v6494_v1 = vadd.f32 %v4761_v32, %v2578_v26  ;;  %v2576_v58 = vadd.f32 %v2533_v5, %v6401_v9 }
 0x19c   : > { %v2755_v59 = vpop.f32.mrf.mxu0  ;;  %v4728_v56 = vpop.f32.mrf.mxu1 }
 0x19d   : > { %7421 = vst [vmem:[#allocation48_spill] sm:$0xff] %v6494_v1  ;;  %v6497_v52 = vadd.f32 %v2752_v34, %v2576_v58  ;;  %v2579_v35 = vadd.f32 %v4728_v56, %v6404_v41 }
 0x19e   : > { %v6500_v23 = vpop.f32.mrf.mxu0  ;;  %v2536_v48 = vpop.f32.mrf.mxu1 }
 0x19f   : > { %7422 = vst [vmem:[#allocation49_spill] sm:$0xff] %v6497_v52  ;;  %v6502_v46 = vadd.f32 %v4762_v17, %v2579_v35  ;;  %v2577_v24 = vadd.f32 %v2536_v48, %v6407_v33 }
 0x1a0   : > { %v6505_v12 = vpop.f32.mrf.mxu0  ;;  %v4767_v53 = vpop.f32.mrf.mxu1 }
 0x1a1   : > { %7423 = vst [vmem:[#allocation56_spill] sm:$0xff] %v6502_v46  ;;  %v6507_v25 = vadd.f32 %v2755_v59, %v2577_v24 }
 0x1a2   : > { %v6509_v29 = vpop.f32.mrf.mxu0  ;;  %v2942_v9 = vpop.f32.mrf.mxu1 }
 0x1a3   : > { %7424 = vst [vmem:[#allocation54_spill] sm:$0xff] %v6507_v25 }
 0x1a4   : > { %v6511_v6 = vpop.f32.mrf.mxu0  ;;  %v4768_v42 = vpop.f32.mrf.mxu1 }
 0x1a6   : > { %v6513_v4 = vpop.f32.mrf.mxu0  ;;  %v6515_v41 = vpop.f32.mrf.mxu1 }
 0x1a8   : > { %v6517_v45 = vpop.f32.mrf.mxu0  ;;  %v6519_v30 = vpop.f32.mrf.mxu1 }
 0x1aa   : > { %v6521_v33 = vpop.f32.mrf.mxu0  ;;  %v6523_v16 = vpop.f32.mrf.mxu1 }
 0x1ac   : > { %v6525_v0 = vpop.f32.mrf.mxu0  ;;  %v6527_v15 = vpop.f32.mrf.mxu1 }
 0x1ae   : > { %v6529_v14 = vpop.f32.mrf.mxu0  ;;  %v6531_v49 = vpop.f32.mrf.mxu1 }
 0x1b0   : > { %v6533_v47 = vpop.f32.mrf.mxu0  ;;  %v6535_v32 = vpop.f32.mrf.mxu1 }
 0x1b2   : > { %v6537_v40 = vpop.f32.mrf.mxu0  ;;  %v6539_v7 = vpop.f32.mrf.mxu1 }
 0x1b4   : > { %v6541_v34 = vpop.f32.mrf.mxu0  ;;  %v6543_v21 = vpop.f32.mrf.mxu1 }
 0x1b6   : > { %v6545_v26 = vpop.f32.mrf.mxu0  ;;  %v6547_v17 = vpop.f32.mrf.mxu1 }
 0x1b8   : > { %v6549_v5 = vpop.f32.mrf.mxu0  ;;  %v6551_v58 = vpop.f32.mrf.mxu1 }
 0x1ba   : > { %v6553_v59 = vpop.f32.mrf.mxu0  ;;  %v6555_v56 = vpop.f32.mrf.mxu1 }
 0x1bc   : > { %v6557_v35 = vpop.f32.mrf.mxu0  ;;  %v6559_v48 = vpop.f32.mrf.mxu1 }
 0x1be   : > { %v6561_v24 = vpop.f32.mrf.mxu0  ;;  %v6563_v25 = vpop.f32.mrf.mxu1 }
 0x1bf   : > { %7425 = vst [vmem:[#allocation51_spill] sm:$0xff] %v6561_v24 }
 0x1c0   : > { %v6565_v46 = vpop.f32.mrf.mxu0  ;;  %v6567_v52 = vpop.f32.mrf.mxu1 }
 0x1c1   : > { %7426 = vst [vmem:[#allocation60_spill] sm:$0xff] %v6565_v46 }
 0x1c2   : > { %v6569_v1 = vpop.f32.mrf.mxu0  ;;  %v6571_v61 = vpop.f32.mrf.mxu1 }
 0x1c3   : > { %7427 = vst [vmem:[#allocation53_spill] sm:$0xff] %v6569_v1 }
 0x1c4   : > { %v6573_v31 = vpop.f32.mrf.mxu0  ;;  %v6575_v28 = vpop.f32.mrf.mxu1 }
 0x1c5   : > { %7428 = vst [vmem:[#allocation58_spill] sm:$0xff] %v6573_v31  ;;  %7429 = vst [vmem:[#allocation64_spill] sm:$0xff] %v6575_v28 }
 0x1c6   : > { %v6577_v19 = vpop.f32.mrf.mxu0  ;;  %v6579_v50 = vpop.f32.mrf.mxu1 }
 0x1c7   : > { %7430 = vst [vmem:[#allocation63_spill] sm:$0xff] %v6577_v19  ;;  %7431 = vst [vmem:[#allocation65_spill] sm:$0xff] %v6579_v50 }
 0x1c8   : > { %v6581_v62 = vpop.f32.mrf.mxu0  ;;  %v6583_v13 = vpop.f32.mrf.mxu1 }
 0x1c9   : > { %7432 = vst [vmem:[#allocation62_spill] sm:$0xff] %v6581_v62  ;;  %7433 = vst [vmem:[#allocation59_spill] sm:$0xff] %v6583_v13 }
 0x1ca   : > { %v6585_v60 = vpop.f32.mrf.mxu0  ;;  %v6587_v10 = vpop.f32.mrf.mxu1 }
 0x1cb   : > { %7434 = vst [vmem:[#allocation14_spill] sm:$0xff] %v6585_v60  ;;  %7435 = vst [vmem:[#allocation68_spill] sm:$0xff] %v6587_v10 }
 0x1cc   : > { %v6589_v46 = vpop.f32.mrf.mxu0  ;;  %v6591_v1 = vpop.f32.mrf.mxu1 }
 0x1cd   : > { %7436 = vst [vmem:[#allocation61_spill] sm:$0xff] %v6589_v46  ;;  %7437 = vst [vmem:[#allocation66_spill] sm:$0xff] %v6591_v1 }
 0x1ce   : > { %v6593_v11 = vpop.f32.mrf.mxu0  ;;  %v6595_v31 = vpop.f32.mrf.mxu1 }
 0x1cf   : > { %7438 = vst [vmem:[#allocation71_spill] sm:$0xff] %v6593_v11  ;;  %7439 = vst [vmem:[#allocation70_spill] sm:$0xff] %v6595_v31 }
 0x1d0   : > { %v6597_v28 = vpop.f32.mrf.mxu0  ;;  %v6599_v19 = vpop.f32.mrf.mxu1 }
 0x1d1   : > { %7440 = vst [vmem:[#allocation69_spill] sm:$0xff] %v6597_v28  ;;  %7441 = vst [vmem:[#allocation67_spill] sm:$0xff] %v6599_v19 }
 0x1d2   : > { %v6601_v50 = vpop.f32.mrf.mxu0  ;;  %v6603_v62 = vpop.f32.mrf.mxu1 }
 0x1d3   : > { %7442 = vst [vmem:[#allocation74_spill] sm:$0xff] %v6601_v50  ;;  %7443 = vst [vmem:[#allocation72_spill] sm:$0xff] %v6603_v62  ;;  %v3071_v50 = vadd.f32 %v4767_v53, %v6410_v36  ;;  %v3070_v36 = vadd.f32 %v6515_v41, %v6419_v37 }
 0x1d4   : > { %v6605_v13 = vpop.f32.mrf.mxu0  ;;  %v6607_v60 = vpop.f32.mrf.mxu1 }
 0x1d5   : > { %7444 = vst [vmem:[#allocation29_spill] sm:$0xff] %v6605_v13  ;;  %7445 = vst [vmem:[#allocation19_spill] sm:$0xff] %v6607_v60  ;;  %v3069_v60 = vadd.f32 %v2942_v9, %v6413_v44  ;;  %v3075_v44 = vadd.f32 %v6519_v30, %v6422_v38 }
 0x1d6   : > { %v6609_v10 = vpop.f32.mrf.mxu0  ;;  %v6611_v46 = vpop.f32.mrf.mxu1 }
 0x1d7   : > { %7446 = vst [vmem:[#allocation28_spill] sm:$0xff] %v6609_v10  ;;  %7447 = vst [vmem:[#allocation34_spill] sm:$0xff] %v6611_v46  ;;  %v3365_v46 = vadd.f32 %v6500_v23, %v3071_v50 }
 0x1d8   : > { %v6613_v11 = vpop.f32.mrf.mxu0  ;;  %v6615_v31 = vpop.f32.mrf.mxu1 }
 0x1d9   : > { %7448 = vst [vmem:[#allocation10_spill] sm:$0xff] %v6613_v11  ;;  %7449 = vst [vmem:[#allocation31_spill] sm:$0xff] %v6615_v31  ;;  %v3072_v11 = vadd.f32 %v4768_v42, %v6416_v20  ;;  %v3073_v20 = vadd.f32 %v6523_v16, %v6425_v39 }
 0x1da   : > { %v6617_v28 = vpop.f32.mrf.mxu0  ;;  %v6619_v19 = vpop.f32.mrf.mxu1 }
 0x1db   : > { %7450 = vst [vmem:[#allocation12_spill] sm:$0xff] %v6617_v28  ;;  %v3363_v28 = vadd.f32 %v6505_v12, %v3069_v60  ;;  %v3364_v60 = vadd.f32 %v6511_v6, %v3070_v36  ;;  %v3367_v6 = vadd.f32 %v6517_v45, %v3073_v20 }
 0x1dc   : > { %v6622_v62 = vpop.f32.mrf.mxu0  ;;  %v6624_v13 = vpop.f32.mrf.mxu1 }
 0x1dd   : > { %7451 = vst [vmem:[#allocation16_spill] sm:$0xff] %v6622_v62  ;;  %7452 = vst [vmem:[#allocation18_spill] sm:$0xff] %v6624_v13 }
 0x1de   : > { %v4869_v10 = vpop.f32.mrf.mxu0  ;;  %v6627_v1 = vpop.f32.mrf.mxu1 }
 0x1df   : > { %7453 = vst [vmem:[#allocation22_spill] sm:$0xff] %v6627_v1  ;;  %v3366_v1 = vadd.f32 %v6509_v29, %v3072_v11  ;;  %v3076_v29 = vadd.f32 %v6527_v15, %v6428_v43  ;;  %v3079_v15 = vadd.f32 %v6535_v32, %v6434_v54 }
 0x1e0   : > { %v3757_v31 = vpop.f32.mrf.mxu0  ;;  %v4835_v24 = vpop.f32.mrf.mxu1 }
 0x1e1   : > { %v3584_v53 = vadd.f32 %v4835_v24, %v3365_v46 }
 0x1e2   : > { %v4870_v62 = vpop.f32.mrf.mxu0  ;;  %v3455_v9 = vpop.f32.mrf.mxu1 }
 0x1e3   : > { %v3886_v13 = vadd.f32 %v4869_v10, %v3584_v53  ;;  %v3582_v50 = vadd.f32 %v3455_v9, %v3363_v28  ;;  %v3369_v28 = vadd.f32 %v6513_v4, %v3075_v44 }
 0x1e4   : > { %v3760_v23 = vpop.f32.mrf.mxu0  ;;  %v4836_v37 = vpop.f32.mrf.mxu1 }
 0x1e5   : > { %v4330_v38 = vpack.c.bf16 %v3886_v13, %v3886_v13  ;;  %v3884_v46 = vadd.f32 %v3757_v31, %v3582_v50  ;;  %v3585_v11 = vadd.f32 %v4836_v37, %v3366_v1  ;;  %v3074_v13 = vadd.f32 %v6531_v49, %v6431_v22 }
 0x1e6   : > { %v4873_v10 = vpop.f32.mrf.mxu0  ;;  %v3458_v12 = vpop.f32.mrf.mxu1  ;;  %v3077_v49 = vadd.f32 %v6539_v7, %v6437_v63  ;;  %v3080_v37 = vadd.f32 %v6543_v21, %v6440_v18  ;;  %v3083_v21 = vadd.f32 %v6551_v58, %v6446_v2 }
 0x1e7   : > { %4047 = vst.msk [vmem:[%s6641_s16 + $0x8] sm:$0xf] %vm4044_vm7, %v4330_v38  ;;  %v4328_v42 = vpack.c.bf16 %v3884_v46, %v3884_v46  ;;  %v3887_v39 = vadd.f32 %v4870_v62, %v3585_v11  ;;  %v3583_v41 = vadd.f32 %v3458_v12, %v3364_v60  ;;  %v3370_v62 = vadd.f32 %v6521_v33, %v3076_v29 }
 0x1e8   : > { %v3773_v30 = vpop.f32.mrf.mxu0  ;;  %v4839_v16 = vpop.f32.mrf.mxu1  ;;  %v3368_v9 = vadd.f32 %v6525_v0, %v3074_v13  ;;  %v3371_v38 = vadd.f32 %v6533_v47, %v3077_v49  ;;  %v3078_v11 = vadd.f32 %v6547_v17, %v6443_v27  ;;  %v3374_v29 = vadd.f32 %v6537_v40, %v3080_v37 }
 0x1e9   : > { %4045 = vst.msk [vmem:[%s6641_s16] sm:$0xf] %vm4044_vm7, %v4328_v42  ;;  %v4331_v31 = vpack.c.bf16 %v3887_v39, %v3887_v39  ;;  %v3885_v1 = vadd.f32 %v3760_v23, %v3583_v41  ;;  %v3588_v4 = vadd.f32 %v4839_v16, %v3369_v28  ;;  %v3373_v23 = vadd.f32 %v6529_v14, %v3079_v15 }
 0x1ea   : > { %v4874_v43 = vpop.f32.mrf.mxu0  ;;  %v3471_v24 = vpop.f32.mrf.mxu1  ;;  %v3081_v17 = vadd.f32 %v6555_v56, %v6449_v8  ;;  %v3377_v16 = vadd.f32 %v6545_v26, %v3083_v21  ;;  %v3082_v15 = vadd.f32 %v6563_v25, %v6455_v57  ;;  %v3085_v25 = vadd.f32 %v6571_v61, %v6461_v51  ;;  %v7461_v21 = vld [vmem:[#allocation59_spill] sm:$0xff] }
 0x1eb   : > { %4048 = vst.msk [vmem:[%s6641_s16 + $0xc] sm:$0xf] %vm4044_vm7, %v4331_v31  ;;  %v4329_v45 = vpack.c.bf16 %v3885_v1, %v3885_v1  ;;  %v3890_v36 = vadd.f32 %v4873_v10, %v3588_v4  ;;  %v3586_v53 = vadd.f32 %v3471_v24, %v3367_v6  ;;  %v3084_v31 = vadd.f32 %v6559_v48, %v6452_v3 }
 0x1ec   : > { %v3776_v22 = vpop.f32.mrf.mxu0  ;;  %v4840_v44 = vpop.f32.mrf.mxu1  ;;  %v3375_v4 = vadd.f32 %v6549_v5, %v3081_v17  ;;  %v3087_v48 = vadd.f32 %v6567_v52, %v6458_v55 }
 0x1ed   : > { %4046 = vst.msk [vmem:[%s6641_s16 + $0x4] sm:$0xf] %vm4044_vm7, %v4329_v45  ;;  %v4334_v54 = vpack.c.bf16 %v3890_v36, %v3890_v36  ;;  %v3888_v32 = vadd.f32 %v3773_v30, %v3586_v53  ;;  %v3589_v50 = vadd.f32 %v4840_v44, %v3370_v62  ;;  %v3372_v30 = vadd.f32 %v6541_v34, %v3078_v11 }
 0x1ee   : > { %v4877_v33 = vpop.f32.mrf.mxu0  ;;  %v3474_v20 = vpop.f32.mrf.mxu1  ;;  %v3378_v36 = vadd.f32 %v6553_v59, %v3084_v31  ;;  %v3376_v44 = vadd.f32 %v6557_v35, %v3082_v15  ;;  %v7468_v15 = vld [vmem:[#allocation66_spill] sm:$0xff] }
 0x1ef   : > { %4051 = vst.msk [vmem:[%s6641_s16 + $0x18] sm:$0xf] %vm4044_vm7, %v4334_v54  ;;  %v4332_v63 = vpack.c.bf16 %v3888_v32, %v3888_v32  ;;  %v3891_v7 = vadd.f32 %v4874_v43, %v3589_v50  ;;  %v3587_v60 = vadd.f32 %v3474_v20, %v3368_v9  ;;  %v7454_v54 = vld [vmem:[#allocation51_spill] sm:$0xff] }
 0x1f0   : > { %v3789_v0 = vpop.f32.mrf.mxu0  ;;  %v4843_v46 = vpop.f32.mrf.mxu1  ;;  %v3381_v32 = vadd.f32 %v7454_v54, %v3087_v48 }
 0x1f1   : > { %4049 = vst.msk [vmem:[%s6641_s16 + $0x10] sm:$0xf] %vm4044_vm7, %v4332_v63  ;;  %v4335_v14 = vpack.c.bf16 %v3891_v7, %v3891_v7  ;;  %v3889_v10 = vadd.f32 %v3776_v22, %v3587_v60  ;;  %v3592_v28 = vadd.f32 %v4843_v46, %v3373_v23  ;;  %v7456_v23 = vld [vmem:[#allocation64_spill] sm:$0xff] }
 0x1f2   : > { %v4878_v18 = vpop.f32.mrf.mxu0  ;;  %v3487_v12 = vpop.f32.mrf.mxu1  ;;  %v7457_v63 = vld [vmem:[#allocation60_spill] sm:$0xff] }
 0x1f3   : > { %4052 = vst.msk [vmem:[%s6641_s16 + $0x1c] sm:$0xf] %vm4044_vm7, %v4335_v14  ;;  %v4333_v47 = vpack.c.bf16 %v3889_v10, %v3889_v10  ;;  %v3894_v42 = vadd.f32 %v4877_v33, %v3592_v28  ;;  %v3590_v39 = vadd.f32 %v3487_v12, %v3371_v38  ;;  %v7455_v33 = vld [vmem:[#allocation37_spill] sm:$0xff]  ;;  %v3379_v7 = vadd.f32 %v7457_v63, %v3085_v25 }
 0x1f4   : > { %v3792_v27 = vpop.f32.mrf.mxu0  ;;  %v4844_v41 = vpop.f32.mrf.mxu1  ;;  %v3088_v20 = vadd.f32 %v7456_v23, %v7455_v33  ;;  %v7459_v38 = vld [vmem:[#allocation65_spill] sm:$0xff] }
 0x1f5   : > { %4050 = vst.msk [vmem:[%s6641_s16 + $0x14] sm:$0xf] %vm4044_vm7, %v4333_v47  ;;  %v4338_v2 = vpack.c.bf16 %v3894_v42, %v3894_v42  ;;  %v3892_v58 = vadd.f32 %v3789_v0, %v3590_v39  ;;  %v3593_v6 = vadd.f32 %v4844_v41, %v3374_v29  ;;  %v7458_v0 = vld [vmem:[#allocation42_spill] sm:$0xff]  ;;  %v7462_v47 = vld [vmem:[#allocation53_spill] sm:$0xff] }
 0x1f6   : > { %v4881_v40 = vpop.f32.mrf.mxu0  ;;  %v3490_v13 = vpop.f32.mrf.mxu1  ;;  %v3086_v46 = vadd.f32 %v7459_v38, %v7458_v0  ;;  %v3382_v42 = vadd.f32 %v7462_v47, %v3088_v20 }
 0x1f7   : > { %4055 = vst.msk [vmem:[%s6641_s16 + $0x28] sm:$0xf] %vm4044_vm7, %v4338_v2  ;;  %v4336_v8 = vpack.c.bf16 %v3892_v58, %v3892_v58  ;;  %v3895_v56 = vadd.f32 %v4878_v18, %v3593_v6  ;;  %v3591_v1 = vadd.f32 %v3490_v13, %v3372_v30  ;;  %v7460_v18 = vld [vmem:[#allocation38_spill] sm:$0xff]  ;;  %v7463_v30 = vld [vmem:[#allocation45_spill] sm:$0xff]  ;;  %v7464_v2 = vld [vmem:[#allocation68_spill] sm:$0xff] }
 0x1f8   : > { %v3805_v34 = vpop.f32.mrf.mxu0  ;;  %v4847_v43 = vpop.f32.mrf.mxu1  ;;  %v3091_v12 = vadd.f32 %v7461_v21, %v7460_v18  ;;  %v3089_v58 = vadd.f32 %v7464_v2, %v7463_v30  ;;  %v7479_v18 = vld [vmem:[#allocation44_spill] sm:$0xff]  ;;  %v7480_v21 = vld [vmem:[#allocation19_spill] sm:$0xff]  ;;  %v7483_v2 = vld [vmem:[#allocation34_spill] sm:$0xff] }
 0x1f9   : > { %4053 = vst.msk [vmem:[%s6641_s16 + $0x20] sm:$0xf] %vm4044_vm7, %v4336_v8  ;;  %v4339_v26 = vpack.c.bf16 %v3895_v56, %v3895_v56  ;;  %v3893_v24 = vadd.f32 %v3792_v27, %v3591_v1  ;;  %v3596_v62 = vadd.f32 %v4847_v43, %v3377_v16  ;;  %v7466_v1 = vld [vmem:[#allocation63_spill] sm:$0xff]  ;;  %v7482_v30 = vld [vmem:[#allocation52_spill] sm:$0xff] }
 0x1fa   : > { %v4882_v3 = vpop.f32.mrf.mxu0  ;;  %v3503_v45 = vpop.f32.mrf.mxu1  ;;  %v7467_v43 = vld [vmem:[#allocation43_spill] sm:$0xff] }
 0x1fb   : > { %4056 = vst.msk [vmem:[%s6641_s16 + $0x2c] sm:$0xf] %vm4044_vm7, %v4339_v26  ;;  %v4337_v5 = vpack.c.bf16 %v3893_v24, %v3893_v24  ;;  %v3898_v53 = vadd.f32 %v4881_v40, %v3596_v62  ;;  %v3594_v22 = vadd.f32 %v3503_v45, %v3375_v4  ;;  %v7465_v40 = vld [vmem:[#allocation58_spill] sm:$0xff]  ;;  %v3092_v26 = vadd.f32 %v7468_v15, %v7467_v43 }
 0x1fc   : > { %v3808_v57 = vpop.f32.mrf.mxu0  ;;  %v4848_v49 = vpop.f32.mrf.mxu1  ;;  %v3380_v16 = vadd.f32 %v7465_v40, %v3086_v46  ;;  %v7469_v45 = vld [vmem:[#allocation62_spill] sm:$0xff] }
 0x1fd   : > { %4054 = vst.msk [vmem:[%s6641_s16 + $0x24] sm:$0xf] %vm4044_vm7, %v4337_v5  ;;  %v4342_v55 = vpack.c.bf16 %v3898_v53, %v3898_v53  ;;  %v3896_v52 = vadd.f32 %v3805_v34, %v3594_v22  ;;  %v3597_v9 = vadd.f32 %v4848_v49, %v3378_v36  ;;  %v3385_v34 = vadd.f32 %v7466_v1, %v3091_v12  ;;  %v7470_v53 = vld [vmem:[#allocation41_spill] sm:$0xff]  ;;  %v7471_v22 = vld [vmem:[#allocation70_spill] sm:$0xff] }
 0x1fe   : > { %v4885_v59 = vpop.f32.mrf.mxu0  ;;  %v3506_v50 = vpop.f32.mrf.mxu1  ;;  %v3383_v36 = vadd.f32 %v7469_v45, %v3089_v58  ;;  %v3096_v12 = vadd.f32 %v7480_v21, %v7479_v18  ;;  %v3094_v58 = vadd.f32 %v7483_v2, %v7482_v30  ;;  %v7488_v45 = vld [vmem:[#allocation29_spill] sm:$0xff] }
 0x1ff   : > { %4059 = vst.msk [vmem:[%s6641_s16 + $0x38] sm:$0xf] %vm4044_vm7, %v4342_v55  ;;  %v4340_v51 = vpack.c.bf16 %v3896_v52, %v3896_v52  ;;  %v3899_v61 = vadd.f32 %v4882_v3, %v3597_v9  ;;  %v3595_v37 = vadd.f32 %v3506_v50, %v3376_v44  ;;  %v7472_v52 = vld [vmem:[#allocation46_spill] sm:$0xff]  ;;  %v7473_v9 = vld [vmem:[#allocation67_spill] sm:$0xff] }
 0x200   : > { %v3821_v35 = vpop.f32.mrf.mxu0  ;;  %v4851_v60 = vpop.f32.mrf.mxu1 }
 0x201   : > { %4057 = vst.msk [vmem:[%s6641_s16 + $0x30] sm:$0xf] %vm4044_vm7, %v4340_v51  ;;  %v4343_v11 = vpack.c.bf16 %v3899_v61, %v3899_v61  ;;  %v3897_v14 = vadd.f32 %v3808_v57, %v3595_v37  ;;  %v3600_v10 = vadd.f32 %v4851_v60, %v3381_v32  ;;  %v3090_v57 = vadd.f32 %v7471_v22, %v7470_v53  ;;  %v7474_v32 = vld [vmem:[#allocation14_spill] sm:$0xff]  ;;  %v7476_v37 = vld [vmem:[#allocation72_spill] sm:$0xff] }
 0x202   : > { %v4886_v28 = vpop.f32.mrf.mxu0  ;;  %v3519_v29 = vpop.f32.mrf.mxu1  ;;  %v3386_v50 = vadd.f32 %v7474_v32, %v3092_v26  ;;  %v7475_v61 = vld [vmem:[#allocation50_spill] sm:$0xff] }
 0x203   : > { %4060 = vst.msk [vmem:[%s6641_s16 + $0x3c] sm:$0xf] %vm4044_vm7, %v4343_v11  ;;  %v4341_v39 = vpack.c.bf16 %v3897_v14, %v3897_v14  ;;  %v3902_v27 = vadd.f32 %v4885_v59, %v3600_v10  ;;  %v3598_v17 = vadd.f32 %v3519_v29, %v3379_v7  ;;  %v3095_v59 = vadd.f32 %v7473_v9, %v7472_v52  ;;  %v7477_v7 = vld [vmem:[#allocation61_spill] sm:$0xff]  ;;  %v7478_v14 = vld [vmem:[#allocation71_spill] sm:$0xff]  ;;  %v7491_v52 = vld [vmem:[#allocation18_spill] sm:$0xff] }
 0x204   : > { %v3824_v41 = vpop.f32.mrf.mxu0  ;;  %v4852_v6 = vpop.f32.mrf.mxu1  ;;  %v3384_v60 = vadd.f32 %v7477_v7, %v3090_v57  ;;  %v7492_v32 = vld [vmem:[#allocation10_spill] sm:$0xff] }
 0x205   : > { %4058 = vst.msk [vmem:[%s6641_s16 + $0x34] sm:$0xf] %vm4044_vm7, %v4341_v39  ;;  %v4346_v13 = vpack.c.bf16 %v3902_v27, %v3902_v27  ;;  %v3900_v31 = vadd.f32 %v3821_v35, %v3598_v17  ;;  %v3601_v8 = vadd.f32 %v4852_v6, %v3382_v42  ;;  %v3093_v35 = vadd.f32 %v7476_v37, %v7475_v61  ;;  %v7481_v27 = vld [vmem:[#allocation69_spill] sm:$0xff] }
 0x206   : > { %v4889_v56 = vpop.f32.mrf.mxu0  ;;  %v3522_v4 = vpop.f32.mrf.mxu1  ;;  %v3389_v10 = vadd.f32 %v7478_v14, %v3095_v59 }
 0x207   : > { %4063 = vst.msk [vmem:[%s6641_s16 + $0x48] sm:$0xf] %vm4044_vm7, %v4346_v13  ;;  %v4344_v24 = vpack.c.bf16 %v3900_v31, %v3900_v31  ;;  %v3903_v62 = vadd.f32 %v4886_v28, %v3601_v8  ;;  %v3599_v3 = vadd.f32 %v3522_v4, %v3380_v16  ;;  %v3387_v17 = vadd.f32 %v7481_v27, %v3093_v35  ;;  %v7484_v31 = vld [vmem:[#allocation48_spill] sm:$0xff]  ;;  %v7485_v8 = vld [vmem:[#allocation31_spill] sm:$0xff] }
 0x208   : > { %v3837_v48 = vpop.f32.mrf.mxu0  ;;  %v4855_v5 = vpop.f32.mrf.mxu1 }
 0x209   : > { %4061 = vst.msk [vmem:[%s6641_s16 + $0x40] sm:$0xf] %vm4044_vm7, %v4344_v24  ;;  %v4347_v25 = vpack.c.bf16 %v3903_v62, %v3903_v62  ;;  %v3901_v49 = vadd.f32 %v3824_v41, %v3599_v3  ;;  %v3604_v44 = vadd.f32 %v4855_v5, %v3385_v34  ;;  %v7486_v34 = vld [vmem:[#allocation74_spill] sm:$0xff]  ;;  %v7487_v62 = vld [vmem:[#allocation49_spill] sm:$0xff] }
 0x20a   : > { %v4890_v55 = vpop.f32.mrf.mxu0  ;;  %v3535_v54 = vpop.f32.mrf.mxu1  ;;  %v3390_v4 = vadd.f32 %v7486_v34, %v3096_v12  ;;  %v3097_v3 = vadd.f32 %v6619_v19, %v7487_v62 }
 0x20b   : > { %4064 = vst.msk [vmem:[%s6641_s16 + $0x4c] sm:$0xf] %vm4044_vm7, %v4347_v25  ;;  %v4345_v33 = vpack.c.bf16 %v3901_v49, %v3901_v49  ;;  %v3906_v23 = vadd.f32 %v4889_v56, %v3604_v44  ;;  %v3602_v20 = vadd.f32 %v3535_v54, %v3383_v36  ;;  %v3099_v56 = vadd.f32 %v7485_v8, %v7484_v31  ;;  %v7489_v25 = vld [vmem:[#allocation28_spill] sm:$0xff] }
 0x20c   : > { %v3840_v51 = vpop.f32.mrf.mxu0  ;;  %v4856_v63 = vpop.f32.mrf.mxu1  ;;  %v3388_v36 = vadd.f32 %v7488_v45, %v3094_v58 }
 0x20d   : > { %4062 = vst.msk [vmem:[%s6641_s16 + $0x44] sm:$0xf] %vm4044_vm7, %v4345_v33  ;;  %v4350_v0 = vpack.c.bf16 %v3906_v23, %v3906_v23  ;;  %v3904_v38 = vadd.f32 %v3837_v48, %v3602_v20  ;;  %v3605_v46 = vadd.f32 %v4856_v63, %v3386_v50  ;;  %v3393_v49 = vadd.f32 %v7489_v25, %v3099_v56  ;;  %v7493_v20 = vld [vmem:[#allocation54_spill] sm:$0xff] }
 0x20e   : > { %v4893_v11 = vpop.f32.mrf.mxu0  ;;  %v3538_v28 = vpop.f32.mrf.mxu1  ;;  %v3391_v50 = vadd.f32 %v7492_v32, %v3097_v3 }
 0x20f   : > { %4067 = vst.msk [vmem:[%s6641_s16 + $0x58] sm:$0xf] %vm4044_vm7, %v4350_v0  ;;  %v4348_v29 = vpack.c.bf16 %v3904_v38, %v3904_v38  ;;  %v3907_v47 = vadd.f32 %v4890_v55, %v3605_v46  ;;  %v3603_v42 = vadd.f32 %v3538_v28, %v3384_v60  ;;  %v7490_v55 = vld [vmem:[#allocation56_spill] sm:$0xff] }
 0x210   : > { %v3853_v39 = vpop.f32.mrf.mxu0  ;;  %v4859_v41 = vpop.f32.mrf.mxu1  ;;  %v3100_v9 = vadd.f32 %v7491_v52, %v7490_v55  ;;  %v7495_v60 = vld [vmem:[#allocation12_spill] sm:$0xff] }
 0x211   : > { %4065 = vst.msk [vmem:[%s6641_s16 + $0x50] sm:$0xf] %vm4044_vm7, %v4348_v29  ;;  %v4351_v6 = vpack.c.bf16 %v3907_v47, %v3907_v47  ;;  %v3905_v40 = vadd.f32 %v3840_v51, %v3603_v42  ;;  %v3608_v16 = vadd.f32 %v4859_v41, %v3389_v10  ;;  %v7494_v51 = vld [vmem:[#allocation22_spill] sm:$0xff]  ;;  %v7496_v28 = vld [vmem:[#allocation16_spill] sm:$0xff] }
 0x212   : > { %v4894_v13 = vpop.f32.mrf.mxu0  ;;  %v3551_v1 = vpop.f32.mrf.mxu1  ;;  %v3098_v61 = vadd.f32 %v7494_v51, %v7493_v20  ;;  %v3394_v0 = vadd.f32 %v7495_v60, %v3100_v9 }
 0x213   : > { %4068 = vst.msk [vmem:[%s6641_s16 + $0x5c] sm:$0xf] %vm4044_vm7, %v4351_v6  ;;  %v4349_v43 = vpack.c.bf16 %v3905_v40, %v3905_v40  ;;  %v3910_v15 = vadd.f32 %v4893_v11, %v3608_v16  ;;  %v3606_v26 = vadd.f32 %v3551_v1, %v3387_v17 }
 0x214   : > { %v3856_v24 = vpop.f32.mrf.mxu0  ;;  %v4860_v48 = vpop.f32.mrf.mxu1  ;;  %v3392_v18 = vadd.f32 %v7496_v28, %v3098_v61 }
 0x215   : > { %4066 = vst.msk [vmem:[%s6641_s16 + $0x54] sm:$0xf] %vm4044_vm7, %v4349_v43  ;;  %v4354_v5 = vpack.c.bf16 %v3910_v15, %v3910_v15  ;;  %v3908_v53 = vadd.f32 %v3853_v39, %v3606_v26  ;;  %v3609_v22 = vadd.f32 %v4860_v48, %v3390_v4 }
 0x216   : > { %v4897_v57 = vpop.f32.mrf.mxu0  ;;  %v3554_v44 = vpop.f32.mrf.mxu1 }
 0x217   : > { %4071 = vst.msk [vmem:[%s6641_s16 + $0x68] sm:$0xf] %vm4044_vm7, %v4354_v5  ;;  %v4352_v19 = vpack.c.bf16 %v3908_v53, %v3908_v53  ;;  %v3911_v59 = vadd.f32 %v4894_v13, %v3609_v22  ;;  %v3607_v54 = vadd.f32 %v3554_v44, %v3388_v36 }
 0x218   : > { %v4863_v33 = vpop.f32.mrf.mxu1  ;;  %v3869_v23 = vpop.f32.mrf.mxu0 }
 0x219   : > { %4069 = vst.msk [vmem:[%s6641_s16 + $0x60] sm:$0xf] %vm4044_vm7, %v4352_v19  ;;  %v4355_v37 = vpack.c.bf16 %v3911_v59, %v3911_v59  ;;  %v3909_v35 = vadd.f32 %v3856_v24, %v3607_v54  ;;  %v3612_v63 = vadd.f32 %v4863_v33, %v3393_v49 }
 0x21a   : > { %v3567_v7 = vpop.f32.mrf.mxu1  ;;  %v4898_v10 = vpop.f32.mrf.mxu0 }
 0x21b   : > { %4072 = vst.msk [vmem:[%s6641_s16 + $0x6c] sm:$0xf] %vm4044_vm7, %v4355_v37  ;;  %v4353_v38 = vpack.c.bf16 %v3909_v35, %v3909_v35  ;;  %v3914_v46 = vadd.f32 %v4897_v57, %v3612_v63  ;;  %v3610_v11 = vadd.f32 %v3567_v7, %v3391_v50 }
 0x21c   : > { %v4864_v14 = vpop.f32.mrf.mxu1  ;;  %v3872_v17 = vpop.f32.mrf.mxu0 }
 0x21d   : > { %4070 = vst.msk [vmem:[%s6641_s16 + $0x64] sm:$0xf] %vm4044_vm7, %v4353_v38  ;;  %v4358_v21 = vpack.c.bf16 %v3914_v46, %v3914_v46  ;;  %v3912_v12 = vadd.f32 %v3869_v23, %v3610_v11  ;;  %v3613_v29 = vadd.f32 %v4864_v14, %v3394_v0 }
 0x21e   : > { %v3570_v47 = vpop.f32.mrf.mxu1 }
 0x21f   : > { %4075 = vst.msk [vmem:[%s6641_s16 + $0x78] sm:$0xf] %vm4044_vm7, %v4358_v21  ;;  %v4356_v42 = vpack.c.bf16 %v3912_v12, %v3912_v12  ;;  %v3915_v39 = vadd.f32 %v4898_v10, %v3613_v29  ;;  %v3611_v27 = vadd.f32 %v3570_v47, %v3392_v18 }
 0x221   : > { %4073 = vst.msk [vmem:[%s6641_s16 + $0x70] sm:$0xf] %vm4044_vm7, %v4356_v42  ;;  %v4359_v41 = vpack.c.bf16 %v3915_v39, %v3915_v39  ;;  %v3913_v30 = vadd.f32 %v3872_v17, %v3611_v27 }
 0x223   : > { %4076 = vst.msk [vmem:[%s6641_s16 + $0x7c] sm:$0xf] %vm4044_vm7, %v4359_v41  ;;  %v4357_v2 = vpack.c.bf16 %v3913_v30, %v3913_v30 }
 0x225   : > { %4074 = vst.msk [vmem:[%s6641_s16 + $0x74] sm:$0xf] %vm4044_vm7, %v4357_v2 }
 0x226 PF: > { %s14_s15 = sadd.s32 1, %s4931_s15  }
 0x227   : > { %p11_p4 = scmp.ge.s32.totalorder %s14_s15, 4  }
 0x229   :  { %13 = sbr.rel (!%p11_p4) target bundleno = 1 (0x1), region = 74 }

</bundles_post_ra>
